<compile_context>
chip_gen: v6e
topology: v6e:2x2x1
jax: 0.10.0
libtpu: 0.0.40
codegen_flags: <defaults>
</compile_context>

<pallas_src>
import functools

import jax
import jax.numpy as jnp
from jax import lax
from jax.experimental import pallas as pl
from jax.experimental.pallas import tpu as pltpu


# 48 MiB scoped VMEM: plenty on v5e/v6e (128 MiB) and leaves headroom on v7x (64 MiB).
_VMEM_LIMIT = 48 * 1024 * 1024

# Contract dim 1 of LHS with dim 1 of RHS (i.e. "@ rhs.T" without a transpose).
_DN_CONTRACT_11 = (((1,), (1,)), ((), ()))
# Contract dim 0 of LHS with dim 0 of RHS (i.e. "lhs.T @" without a transpose).
_DN_CONTRACT_00 = (((0,), (0,)), ((), ()))


def _pick_tile(dim, target, align):
    """Largest tile <= target that divides `dim`; full dim if dim <= target.

    Chosen tiles are multiples of `align` (sublane 8 / lane 128); falls back to
    the full dimension when no aligned divisor exists (e.g. N = 400).
    """
    if dim <= target:
        return dim
    t = (target // align) * align
    while t >= align:
        if dim % t == 0:
            return t
        t -= align
    return dim


# ----------------------------------------------------------------------------
# Kernel 1: fused q / k linear projections (no bias), emitted in [B, N, C]
# layout:  q[b, n, c] = sum_k wq[n, k] * x[b, c, k]   (and same for k).
# ----------------------------------------------------------------------------
def _qk_kernel(x_ref, wq_ref, wk_ref, q_ref, k_ref, q_acc, k_acc):
    @pl.when(pl.program_id(2) == 0)
    def _init():
        q_acc[...] = jnp.zeros_like(q_acc)
        k_acc[...] = jnp.zeros_like(k_acc)

    xb = x_ref[0].astype(jnp.bfloat16)                 # [C, tk]  bf16 for MXU
    q_acc[...] += lax.dot_general(wq_ref[...], xb, _DN_CONTRACT_11,
                                  preferred_element_type=jnp.float32)
    k_acc[...] += lax.dot_general(wk_ref[...], xb, _DN_CONTRACT_11,
                                  preferred_element_type=jnp.float32)

    @pl.when(pl.program_id(2) == pl.num_programs(2) - 1)
    def _finalize():
        q_ref[0] = q_acc[...]
        k_ref[0] = k_acc[...]


def qk_linear(x3, wq, wk, *, tn_target=256, tk_target=512):
    """x3: [B, C, N] f32;  wq/wk: [Nout, K] bf16 (PyTorch (out, in) layout)."""
    B, C, _ = x3.shape
    Nout, K = wq.shape
    tn = _pick_tile(Nout, tn_target, 8)
    tk = _pick_tile(K, tk_target, 128)
    grid = (B, Nout // tn, K // tk)

    x_spec = pl.BlockSpec((1, C, tk), lambda b, j, kk: (b, 0, kk))
    w_spec = pl.BlockSpec((tn, tk), lambda b, j, kk: (j, kk))
    o_spec = pl.BlockSpec((1, tn, C), lambda b, j, kk: (b, j, 0))

    return pl.pallas_call(
        _qk_kernel,
        out_shape=(jax.ShapeDtypeStruct((B, Nout, C), jnp.float32),
                   jax.ShapeDtypeStruct((B, Nout, C), jnp.float32)),
        grid=grid,
        in_specs=[x_spec, w_spec, w_spec],
        out_specs=(o_spec, o_spec),
        scratch_shapes=[pltpu.VMEM((tn, C), jnp.float32),
                        pltpu.VMEM((tn, C), jnp.float32)],
        compiler_params=pltpu.CompilerParams(
            dimension_semantics=("parallel", "parallel", "arbitrary"),
            vmem_limit_bytes=_VMEM_LIMIT),
    )(x3, wq, wk)


# ----------------------------------------------------------------------------
# Kernel 2: spectral attention (per-batch), native [B, N, Cf] in/out layout.
#   attn_r = alpha * (q_r^T @ k_r);  attn_i = alpha * (q_i^T @ k_i)
#   x_r^T  = q_i @ logmax(attn_r)^T; x_i^T = q_r @ logmax(attn_i)^T
# All transposes are expressed as dot_general dimension numbers (MXU-free).
# Kept in f32: the log/"logmax" path is numerically fragile (see notes).
# ----------------------------------------------------------------------------
def _spectral_kernel(alpha_ref, qr_ref, qi_ref, kr_ref, ki_ref, xr_ref, xi_ref):
    alpha = alpha_ref[...]                              # [Cf, Cf]
    qr = qr_ref[0]                                      # [N, Cf]
    qi = qi_ref[0]
    kr = kr_ref[0]
    ki = ki_ref[0]

    attn_r = alpha * lax.dot_general(qr, kr, _DN_CONTRACT_00,
                                     preferred_element_type=jnp.float32)
    attn_i = alpha * lax.dot_general(qi, ki, _DN_CONTRACT_00,
                                     preferred_element_type=jnp.float32)

    # logmax: log(X) / sum(log(X), axis=-1, keepdims=True)  (faithful to ref;
    # negative/zero attn entries produce NaN/-inf exactly as in PyTorch).
    lr = jnp.log(attn_r)
    lr = lr / jnp.sum(lr, axis=-1, keepdims=True)
    li = jnp.log(attn_i)
    li = li / jnp.sum(li, axis=-1, keepdims=True)

    # x_r = lr @ q_i^T  ->  emit x_r^T = q_i @ lr^T  (already in [N, Cf])
    xr_ref[0] = lax.dot_general(qi, lr, _DN_CONTRACT_11,
                                preferred_element_type=jnp.float32)
    xi_ref[0] = lax.dot_general(qr, li, _DN_CONTRACT_11,
                                preferred_element_type=jnp.float32)


def spectral_attention(alpha, qr, qi, kr, ki):
    """alpha: [Cf, Cf] f32;  qr/qi/kr/ki: [B, N, Cf] f32. Returns x_r, x_i [B, N, Cf]."""
    B, N, Cf = qr.shape
    io_spec = pl.BlockSpec((1, N, Cf), lambda b: (b, 0, 0))
    # TODO(synk): on v7x (2 TCs) a second parallel grid axis splitting the
    # independent real/imag branches would keep both cores busy when B is odd.
    return pl.pallas_call(
        _spectral_kernel,
        out_shape=(jax.ShapeDtypeStruct((B, N, Cf), jnp.float32),
                   jax.ShapeDtypeStruct((B, N, Cf), jnp.float32)),
        grid=(B,),
        in_specs=[pl.BlockSpec((Cf, Cf), lambda b: (0, 0)),
                  io_spec, io_spec, io_spec, io_spec],
        out_specs=(io_spec, io_spec),
        compiler_params=pltpu.CompilerParams(
            dimension_semantics=("parallel",),
            vmem_limit_bytes=_VMEM_LIMIT),
    )(alpha, qr, qi, kr, ki)


# ----------------------------------------------------------------------------
# Kernel 3: output projection  y = x @ Wp^T + bias, tiled over M = B*N.
# ----------------------------------------------------------------------------
def _proj_kernel(x_ref, w_ref, b_ref, o_ref):
    xb = x_ref[...].astype(jnp.bfloat16)
    acc = lax.dot_general(xb, w_ref[...], _DN_CONTRACT_11,
                          preferred_element_type=jnp.float32)
    o_ref[...] = acc + b_ref[...]


def proj_linear(x2d, wp, bias_row, *, tm_target=256):
    """x2d: [M, C] f32;  wp: [C, C] bf16 (out, in);  bias_row: [1, C] f32."""
    M, K = x2d.shape
    Cout = wp.shape[0]
    tm = _pick_tile(M, tm_target, 8)
    grid = (M // tm,)
    return pl.pallas_call(
        _proj_kernel,
        out_shape=jax.ShapeDtypeStruct((M, Cout), jnp.float32),
        grid=grid,
        in_specs=[pl.BlockSpec((tm, K), lambda i: (i, 0)),
                  pl.BlockSpec((Cout, K), lambda i: (0, 0)),
                  pl.BlockSpec((1, Cout), lambda i: (0, 0))],
        out_specs=pl.BlockSpec((tm, Cout), lambda i: (i, 0)),
        compiler_params=pltpu.CompilerParams(
            dimension_semantics=("parallel",),
            vmem_limit_bytes=_VMEM_LIMIT),
    )(x2d, wp, bias_row)


# ----------------------------------------------------------------------------
# Kernels 4a/4b: ReLU -> BatchNorm2d (training-mode batch stats) -> residual.
# Two tiled passes over the [B, C, H*W] view:
#   4a: accumulate per-channel sum and sum-of-squares of relu(y)
#   4b: normalize (biased variance) + affine + residual add
# ----------------------------------------------------------------------------
def _bn_stats_kernel(y_ref, sum_ref, sq_ref):
    @pl.when((pl.program_id(0) == 0) & (pl.program_id(1) == 0))
    def _init():
        sum_ref[...] = jnp.zeros_like(sum_ref)
        sq_ref[...] = jnp.zeros_like(sq_ref)

    y = jnp.maximum(y_ref[0], 0.0)                         # [C, tL] ReLU
    sum_ref[...] += jnp.sum(y, axis=-1, keepdims=True)
    sq_ref[...] += jnp.sum(y * y, axis=-1, keepdims=True)


def _bn_apply_kernel(y_ref, raw_ref, sum_ref, sq_ref, gamma_ref, beta_ref,
                     o_ref, *, inv_count):
    y = jnp.maximum(y_ref[0], 0.0)                         # [C, tL]
    mean = sum_ref[...] * inv_count                        # [C, 1]
    var = sq_ref[...] * inv_count - mean * mean            # biased variance
    inv_std = lax.rsqrt(var + 1e-5)
    o_ref[0] = raw_ref[0] + gamma_ref[...] * (y - mean) * inv_std + beta_ref[...]


def relu_bn_residual(y3, raw3, gamma_col, beta_col, *, tl_target=2048):
    """y3/raw3: [B, C, L] f32;  gamma/beta: [C, 1] f32."""
    B, C, L = y3.shape
    tL = _pick_tile(L, tl_target, 128)
    grid = (B, L // tL)

    chunk = pl.BlockSpec((1, C, tL), lambda b, l: (b, 0, l))
    col = pl.BlockSpec((C, 1), lambda b, l: (0, 0))

    s, ss = pl.pallas_call(
        _bn_stats_kernel,
        out_shape=(jax.ShapeDtypeStruct((C, 1), jnp.float32),
                   jax.ShapeDtypeStruct((C, 1), jnp.float32)),
        grid=grid,
        in_specs=[chunk],
        out_specs=(col, col),
        compiler_params=pltpu.CompilerParams(
            dimension_semantics=("arbitrary", "arbitrary"),
            vmem_limit_bytes=_VMEM_LIMIT),
    )(y3)

    apply_fn = functools.partial(_bn_apply_kernel, inv_count=1.0 / float(B * L))
    return pl.pallas_call(
        apply_fn,
        out_shape=jax.ShapeDtypeStruct((B, C, L), jnp.float32),
        grid=grid,
        in_specs=[chunk, chunk, col, col, col, col],
        out_specs=chunk,
        compiler_params=pltpu.CompilerParams(
            dimension_semantics=("parallel", "parallel"),
            vmem_limit_bytes=_VMEM_LIMIT),
    )(y3, raw3, s, ss, gamma_col, beta_col)


# ----------------------------------------------------------------------------
# Full FCT forward
# ----------------------------------------------------------------------------
def init_fct_params(key, C, N):
    """Deterministic parameter init.  C == dim_o (channels), N == H*W.

    Matmul weights are stored in bfloat16 (halves weight DMA, native MXU dtype);
    all accumulation inside the kernels is f32.
    """
    Cf = C // 2 + 1
    k1, k2, k3, k4, k5 = jax.random.split(key, 5)
    return {
        "wq": (jax.random.normal(k1, (N, N), jnp.float32) * 0.02).astype(jnp.bfloat16),
        "wk": (jax.random.normal(k2, (N, N), jnp.float32) * 0.02).astype(jnp.bfloat16),
        "alpha": jax.random.normal(k3, (Cf, Cf), jnp.float32) * 0.02,
        "wp": (jax.random.normal(k4, (C, C), jnp.float32) * 0.02).astype(jnp.bfloat16),
        "bp": jax.random.normal(k5, (C,), jnp.float32) * 0.02,
        "bn_gamma": jnp.ones((C,), jnp.float32),
        "bn_beta": jnp.zeros((C,), jnp.float32),
    }


@jax.jit
def fct_forward(x, params):
    # TODO(synk): the PyTorch module opens '../../nan_check.txt' in __init__; file I/O not replicated.
    raw = x
    B, C, H, W = x.shape
    N = H * W

    # ---- fused q / k linear (Pallas, batched; output already [B, N, C]) ----
    x3 = x.reshape(B, C, N)
    q3, k3 = qk_linear(x3, params["wq"], params["wk"])       # [B, N, C] f32

    # ---- 2-D real FFT over (N, C) dims (plain JAX; no Pallas FFT primitive) ----
    qf = jnp.fft.rfft2(q3, axes=(-2, -1), norm="ortho")      # [B, N, Cf] complex64
    kf = jnp.fft.rfft2(k3, axes=(-2, -1), norm="ortho")

    # ---- spectral attention + logmax (Pallas; native [B, N, Cf] layout) ----
    xr, xi = spectral_attention(params["alpha"],
                                qf.real, qf.imag, kf.real, kf.imag)

    # ---- inverse FFT back to real space (plain JAX) ----
    xc = lax.complex(xr, xi)                                 # [B, N, Cf]
    xs = jnp.fft.irfft2(xc, axes=(-2, -1), norm="ortho")     # [B, N, C] real

    # ---- output projection (Pallas matmul + bias), tiled over B*N ----
    y2d = proj_linear(xs.reshape(B * N, C), params["wp"],
                      params["bp"].reshape(1, C))            # [B*N, C]

    # PyTorch-style raw reinterpretation of the contiguous [B, N, C] buffer as
    # [B, C, H, W]; for the BN stage we only need its [B, C, H*W] view.
    y3 = y2d.reshape(B, C, N)
    raw3 = raw.reshape(B, C, N)

    # ---- ReLU + BatchNorm2d (training-mode batch stats) + residual (Pallas) ----
    out3 = relu_bn_residual(y3, raw3,
                            params["bn_gamma"].reshape(C, 1),
                            params["bn_beta"].reshape(C, 1))
    return out3.reshape(B, C, H, W)


if __name__ == "__main__":
    # Small NCHW demo shapes consistent with the module's forward.
    B, C, H, W = 2, 4, 16, 16
    N = H * W

    key = jax.random.PRNGKey(0)
    kx, kp = jax.random.split(key)
    x = jax.random.normal(kx, (B, C, H, W), jnp.float32)
    params = init_fct_params(kp, C, N)

    out = fct_forward(x, params)
    out = jax.block_until_ready(out)
    assert out.shape == (B, C, H, W)
    print("KERNEL_OK")
</pallas_src>

<mosaic_0001>
module attributes {stable_mosaic.version = 11 : i64} {
  func.func @_qk_kernel(%arg0: i32, %arg1: i32, %arg2: i32, %arg3: memref<1x4x256xf32, #tpu.memory_space<vmem>>, %arg4: memref<256x256xbf16, #tpu.memory_space<vmem>>, %arg5: memref<256x256xbf16, #tpu.memory_space<vmem>>, %arg6: memref<1x256x4xf32, #tpu.memory_space<vmem>>, %arg7: memref<1x256x4xf32, #tpu.memory_space<vmem>>, %arg8: memref<256x4xf32, #tpu.memory_space<vmem>>, %arg9: memref<256x4xf32, #tpu.memory_space<vmem>>) attributes {dimension_semantics = [#tpu.dimension_semantics<parallel>, #tpu.dimension_semantics<parallel>, #tpu.dimension_semantics<arbitrary>], iteration_bounds = array<i64: 2, 1, 1>, scalar_prefetch = 0 : i64, scratch_operands = 2 : i64, tpu.core_type = #tpu.core_type<tc>, window_params = [{transform_indices = @transform_0, window_bounds = array<i64: 1, 4, 256>}, {transform_indices = @transform_1, window_bounds = array<i64: 256, 256>}, {transform_indices = @transform_2, window_bounds = array<i64: 256, 256>}, {transform_indices = @transform_3, window_bounds = array<i64: 1, 256, 4>}, {transform_indices = @transform_4, window_bounds = array<i64: 1, 256, 4>}]} {
    %c0_i32 = arith.constant 0 : i32
    %0 = arith.cmpi eq, %arg2, %c0_i32 : i32
    %1 = arith.extui %0 : i1 to i32
    %c0_i32_0 = arith.constant 0 : i32
    %2 = arith.cmpi ne, %1, %c0_i32_0 : i32
    scf.if %2 {
      %cst_18 = arith.constant 0.000000e+00 : f32
      %19 = vector.broadcast %cst_18 : f32 to vector<256x4xf32>
      %c0_19 = arith.constant 0 : index
      %c0_20 = arith.constant 0 : index
      %20 = vector.load %arg8[%c0_19, %c0_20] : memref<256x4xf32, #tpu.memory_space<vmem>>, vector<256x4xf32>
      tpu.vector_store %arg8[%c0_19, %c0_20], %19 {strides = array<i32>} : memref<256x4xf32, #tpu.memory_space<vmem>>, vector<256x4xf32>,
      %cst_21 = arith.constant 0.000000e+00 : f32
      %21 = vector.broadcast %cst_21 : f32 to vector<256x4xf32>
      %c0_22 = arith.constant 0 : index
      %c0_23 = arith.constant 0 : index
      %22 = vector.load %arg9[%c0_22, %c0_23] : memref<256x4xf32, #tpu.memory_space<vmem>>, vector<256x4xf32>
      tpu.vector_store %arg9[%c0_22, %c0_23], %21 {strides = array<i32>} : memref<256x4xf32, #tpu.memory_space<vmem>>, vector<256x4xf32>,
    } else {
    }
    %c0 = arith.constant 0 : index
    %c0_1 = arith.constant 0 : index
    %c0_2 = arith.constant 0 : index
    %3 = vector.load %arg3[%c0, %c0_1, %c0_2] : memref<1x4x256xf32, #tpu.memory_space<vmem>>, vector<1x4x256xf32>
    %4 = vector.shape_cast %3 : vector<1x4x256xf32> to vector<4x256xf32>
    %5 = arith.truncf %4 : vector<4x256xf32> to vector<4x256xbf16>
    %c0_3 = arith.constant 0 : index
    %c0_4 = arith.constant 0 : index
    %6 = vector.load %arg8[%c0_3, %c0_4] : memref<256x4xf32, #tpu.memory_space<vmem>>, vector<256x4xf32>
    %c0_5 = arith.constant 0 : index
    %c0_6 = arith.constant 0 : index
    %7 = vector.load %arg4[%c0_5, %c0_6] : memref<256x256xbf16, #tpu.memory_space<vmem>>, vector<256x256xbf16>
    %cst = arith.constant dense<0.000000e+00> : vector<256x4xf32>
    %8 = tpu.matmul %7, %5, %cst {dimension_numbers = #tpu.dot_dimension_numbers<[1], [1], [0], [0], [0, 0, 1, 0], [], []>} : vector<256x256xbf16>, vector<4x256xbf16>, vector<256x4xf32> -> vector<256x4xf32>
    %9 = arith.addf %6, %8 : vector<256x4xf32>
    %c0_7 = arith.constant 0 : index
    %c0_8 = arith.constant 0 : index
    %10 = vector.load %arg8[%c0_7, %c0_8] : memref<256x4xf32, #tpu.memory_space<vmem>>, vector<256x4xf32>
    tpu.vector_store %arg8[%c0_7, %c0_8], %9 {strides = array<i32>} : memref<256x4xf32, #tpu.memory_space<vmem>>, vector<256x4xf32>,
    %c0_9 = arith.constant 0 : index
    %c0_10 = arith.constant 0 : index
    %11 = vector.load %arg9[%c0_9, %c0_10] : memref<256x4xf32, #tpu.memory_space<vmem>>, vector<256x4xf32>
    %c0_11 = arith.constant 0 : index
    %c0_12 = arith.constant 0 : index
    %12 = vector.load %arg5[%c0_11, %c0_12] : memref<256x256xbf16, #tpu.memory_space<vmem>>, vector<256x256xbf16>
    %cst_13 = arith.constant dense<0.000000e+00> : vector<256x4xf32>
    %13 = tpu.matmul %12, %5, %cst_13 {dimension_numbers = #tpu.dot_dimension_numbers<[1], [1], [0], [0], [0, 0, 1, 0], [], []>} : vector<256x256xbf16>, vector<4x256xbf16>, vector<256x4xf32> -> vector<256x4xf32>
    %14 = arith.addf %11, %13 : vector<256x4xf32>
    %c0_14 = arith.constant 0 : index
    %c0_15 = arith.constant 0 : index
    %15 = vector.load %arg9[%c0_14, %c0_15] : memref<256x4xf32, #tpu.memory_space<vmem>>, vector<256x4xf32>
    tpu.vector_store %arg9[%c0_14, %c0_15], %14 {strides = array<i32>} : memref<256x4xf32, #tpu.memory_space<vmem>>, vector<256x4xf32>,
    %c0_i32_16 = arith.constant 0 : i32
    %16 = arith.cmpi eq, %arg2, %c0_i32_16 : i32
    %17 = arith.extui %16 : i1 to i32
    %c0_i32_17 = arith.constant 0 : i32
    %18 = arith.cmpi ne, %17, %c0_i32_17 : i32
    scf.if %18 {
      %c0_18 = arith.constant 0 : index
      %c0_19 = arith.constant 0 : index
      %19 = vector.load %arg8[%c0_18, %c0_19] : memref<256x4xf32, #tpu.memory_space<vmem>>, vector<256x4xf32>
      %c0_20 = arith.constant 0 : index
      %c0_21 = arith.constant 0 : index
      %c0_22 = arith.constant 0 : index
      %20 = vector.load %arg6[%c0_20, %c0_21, %c0_22] : memref<1x256x4xf32, #tpu.memory_space<vmem>>, vector<1x256x4xf32>
      %21 = vector.shape_cast %20 : vector<1x256x4xf32> to vector<256x4xf32>
      %22 = vector.shape_cast %19 : vector<256x4xf32> to vector<1x256x4xf32>
      tpu.vector_store %arg6[%c0_20, %c0_21, %c0_22], %22 {strides = array<i32>} : memref<1x256x4xf32, #tpu.memory_space<vmem>>, vector<1x256x4xf32>,
      %c0_23 = arith.constant 0 : index
      %c0_24 = arith.constant 0 : index
      %23 = vector.load %arg9[%c0_23, %c0_24] : memref<256x4xf32, #tpu.memory_space<vmem>>, vector<256x4xf32>
      %c0_25 = arith.constant 0 : index
      %c0_26 = arith.constant 0 : index
      %c0_27 = arith.constant 0 : index
      %24 = vector.load %arg7[%c0_25, %c0_26, %c0_27] : memref<1x256x4xf32, #tpu.memory_space<vmem>>, vector<1x256x4xf32>
      %25 = vector.shape_cast %24 : vector<1x256x4xf32> to vector<256x4xf32>
      %26 = vector.shape_cast %23 : vector<256x4xf32> to vector<1x256x4xf32>
      tpu.vector_store %arg7[%c0_25, %c0_26, %c0_27], %26 {strides = array<i32>} : memref<1x256x4xf32, #tpu.memory_space<vmem>>, vector<1x256x4xf32>,
    } else {
    }
    return
  }
  func.func @transform_0(%arg0: i32, %arg1: i32, %arg2: i32) -> (i32, i32, i32) {
    %c0_i32 = arith.constant 0 : i32
    %c0_i32_0 = arith.constant 0 : i32
    return %arg0, %c0_i32, %arg2 : i32, i32, i32
  }
  func.func @transform_1(%arg0: i32, %arg1: i32, %arg2: i32) -> (i32, i32) {
    %c0_i32 = arith.constant 0 : i32
    return %arg1, %arg2 : i32, i32
  }
  func.func @transform_2(%arg0: i32, %arg1: i32, %arg2: i32) -> (i32, i32) {
    %c0_i32 = arith.constant 0 : i32
    return %arg1, %arg2 : i32, i32
  }
  func.func @transform_3(%arg0: i32, %arg1: i32, %arg2: i32) -> (i32, i32, i32) {
    %c0_i32 = arith.constant 0 : i32
    %c0_i32_0 = arith.constant 0 : i32
    return %arg0, %arg1, %c0_i32 : i32, i32, i32
  }
  func.func @transform_4(%arg0: i32, %arg1: i32, %arg2: i32) -> (i32, i32, i32) {
    %c0_i32 = arith.constant 0 : i32
    %c0_i32_0 = arith.constant 0 : i32
    return %arg0, %arg1, %c0_i32 : i32, i32, i32
  }
}

module attributes {stable_mosaic.version = 11 : i64} {
  func.func @_spectral_kernel(%arg0: i32, %arg1: memref<3x3xf32, #tpu.memory_space<vmem>>, %arg2: memref<1x256x3xf32, #tpu.memory_space<vmem>>, %arg3: memref<1x256x3xf32, #tpu.memory_space<vmem>>, %arg4: memref<1x256x3xf32, #tpu.memory_space<vmem>>, %arg5: memref<1x256x3xf32, #tpu.memory_space<vmem>>, %arg6: memref<1x256x3xf32, #tpu.memory_space<vmem>>, %arg7: memref<1x256x3xf32, #tpu.memory_space<vmem>>) attributes {dimension_semantics = [#tpu.dimension_semantics<parallel>], iteration_bounds = array<i64: 2>, scalar_prefetch = 0 : i64, scratch_operands = 0 : i64, tpu.core_type = #tpu.core_type<tc>, window_params = [{pipeline_mode = #tpu.pipeline_mode<synchronous>, transform_indices = @transform_0, window_bounds = array<i64: 3, 3>}, {transform_indices = @transform_1, window_bounds = array<i64: 1, 256, 3>}, {transform_indices = @transform_2, window_bounds = array<i64: 1, 256, 3>}, {transform_indices = @transform_3, window_bounds = array<i64: 1, 256, 3>}, {transform_indices = @transform_4, window_bounds = array<i64: 1, 256, 3>}, {transform_indices = @transform_5, window_bounds = array<i64: 1, 256, 3>}, {transform_indices = @transform_6, window_bounds = array<i64: 1, 256, 3>}]} {
    %c0 = arith.constant 0 : index
    %c0_0 = arith.constant 0 : index
    %0 = vector.load %arg1[%c0, %c0_0] : memref<3x3xf32, #tpu.memory_space<vmem>>, vector<3x3xf32>
    %c0_1 = arith.constant 0 : index
    %c0_2 = arith.constant 0 : index
    %c0_3 = arith.constant 0 : index
    %1 = vector.load %arg2[%c0_1, %c0_2, %c0_3] : memref<1x256x3xf32, #tpu.memory_space<vmem>>, vector<1x256x3xf32>
    %2 = vector.shape_cast %1 : vector<1x256x3xf32> to vector<256x3xf32>
    %c0_4 = arith.constant 0 : index
    %c0_5 = arith.constant 0 : index
    %c0_6 = arith.constant 0 : index
    %3 = vector.load %arg3[%c0_4, %c0_5, %c0_6] : memref<1x256x3xf32, #tpu.memory_space<vmem>>, vector<1x256x3xf32>
    %4 = vector.shape_cast %3 : vector<1x256x3xf32> to vector<256x3xf32>
    %c0_7 = arith.constant 0 : index
    %c0_8 = arith.constant 0 : index
    %c0_9 = arith.constant 0 : index
    %5 = vector.load %arg4[%c0_7, %c0_8, %c0_9] : memref<1x256x3xf32, #tpu.memory_space<vmem>>, vector<1x256x3xf32>
    %6 = vector.shape_cast %5 : vector<1x256x3xf32> to vector<256x3xf32>
    %c0_10 = arith.constant 0 : index
    %c0_11 = arith.constant 0 : index
    %c0_12 = arith.constant 0 : index
    %7 = vector.load %arg5[%c0_10, %c0_11, %c0_12] : memref<1x256x3xf32, #tpu.memory_space<vmem>>, vector<1x256x3xf32>
    %8 = vector.shape_cast %7 : vector<1x256x3xf32> to vector<256x3xf32>
    %cst = arith.constant dense<0.000000e+00> : vector<3x3xf32>
    %9 = tpu.matmul %2, %6, %cst {dimension_numbers = #tpu.dot_dimension_numbers<[0], [0], [1], [1], [0, 1, 1, 1], [], []>} : vector<256x3xf32>, vector<256x3xf32>, vector<3x3xf32> -> vector<3x3xf32>
    %10 = arith.mulf %0, %9 : vector<3x3xf32>
    %cst_13 = arith.constant dense<0.000000e+00> : vector<3x3xf32>
    %11 = tpu.matmul %4, %8, %cst_13 {dimension_numbers = #tpu.dot_dimension_numbers<[0], [0], [1], [1], [0, 1, 1, 1], [], []>} : vector<256x3xf32>, vector<256x3xf32>, vector<3x3xf32> -> vector<3x3xf32>
    %12 = arith.mulf %0, %11 : vector<3x3xf32>
    %13 = math.log %10 : vector<3x3xf32>
    %cst_14 = arith.constant dense<0.000000e+00> : vector<3xf32>
    %14 = vector.multi_reduction <add>, %13, %cst_14 [1] : vector<3x3xf32> to vector<3xf32>
    %15 = vector.shape_cast %14 : vector<3xf32> to vector<3x1xf32>
    %16 = vector.broadcast %15 : vector<3x1xf32> to vector<3x3xf32>
    %17 = arith.divf %13, %16 : vector<3x3xf32>
    %18 = math.log %12 : vector<3x3xf32>
    %cst_15 = arith.constant dense<0.000000e+00> : vector<3xf32>
    %19 = vector.multi_reduction <add>, %18, %cst_15 [1] : vector<3x3xf32> to vector<3xf32>
    %20 = vector.shape_cast %19 : vector<3xf32> to vector<3x1xf32>
    %21 = vector.broadcast %20 : vector<3x1xf32> to vector<3x3xf32>
    %22 = arith.divf %18, %21 : vector<3x3xf32>
    %cst_16 = arith.constant dense<0.000000e+00> : vector<256x3xf32>
    %23 = tpu.matmul %4, %17, %cst_16 {dimension_numbers = #tpu.dot_dimension_numbers<[1], [1], [0], [0], [0, 0, 1, 0], [], []>} : vector<256x3xf32>, vector<3x3xf32>, vector<256x3xf32> -> vector<256x3xf32>
    %c0_17 = arith.constant 0 : index
    %c0_18 = arith.constant 0 : index
    %c0_19 = arith.constant 0 : index
    %24 = vector.load %arg6[%c0_17, %c0_18, %c0_19] : memref<1x256x3xf32, #tpu.memory_space<vmem>>, vector<1x256x3xf32>
    %25 = vector.shape_cast %24 : vector<1x256x3xf32> to vector<256x3xf32>
    %26 = vector.shape_cast %23 : vector<256x3xf32> to vector<1x256x3xf32>
    tpu.vector_store %arg6[%c0_17, %c0_18, %c0_19], %26 {strides = array<i32>} : memref<1x256x3xf32, #tpu.memory_space<vmem>>, vector<1x256x3xf32>,
    %cst_20 = arith.constant dense<0.000000e+00> : vector<256x3xf32>
    %27 = tpu.matmul %2, %22, %cst_20 {dimension_numbers = #tpu.dot_dimension_numbers<[1], [1], [0], [0], [0, 0, 1, 0], [], []>} : vector<256x3xf32>, vector<3x3xf32>, vector<256x3xf32> -> vector<256x3xf32>
    %c0_21 = arith.constant 0 : index
    %c0_22 = arith.constant 0 : index
    %c0_23 = arith.constant 0 : index
    %28 = vector.load %arg7[%c0_21, %c0_22, %c0_23] : memref<1x256x3xf32, #tpu.memory_space<vmem>>, vector<1x256x3xf32>
    %29 = vector.shape_cast %28 : vector<1x256x3xf32> to vector<256x3xf32>
    %30 = vector.shape_cast %27 : vector<256x3xf32> to vector<1x256x3xf32>
    tpu.vector_store %arg7[%c0_21, %c0_22, %c0_23], %30 {strides = array<i32>} : memref<1x256x3xf32, #tpu.memory_space<vmem>>, vector<1x256x3xf32>,
    return
  }
  func.func @transform_0(%arg0: i32) -> (i32, i32) {
    %c0_i32 = arith.constant 0 : i32
    %c0_i32_0 = arith.constant 0 : i32
    %c0_i32_1 = arith.constant 0 : i32
    return %c0_i32, %c0_i32_0 : i32, i32
  }
  func.func @transform_1(%arg0: i32) -> (i32, i32, i32) {
    %c0_i32 = arith.constant 0 : i32
    %c0_i32_0 = arith.constant 0 : i32
    %c0_i32_1 = arith.constant 0 : i32
    return %arg0, %c0_i32, %c0_i32_0 : i32, i32, i32
  }
  func.func @transform_2(%arg0: i32) -> (i32, i32, i32) {
    %c0_i32 = arith.constant 0 : i32
    %c0_i32_0 = arith.constant 0 : i32
    %c0_i32_1 = arith.constant 0 : i32
    return %arg0, %c0_i32, %c0_i32_0 : i32, i32, i32
  }
  func.func @transform_3(%arg0: i32) -> (i32, i32, i32) {
    %c0_i32 = arith.constant 0 : i32
    %c0_i32_0 = arith.constant 0 : i32
    %c0_i32_1 = arith.constant 0 : i32
    return %arg0, %c0_i32, %c0_i32_0 : i32, i32, i32
  }
  func.func @transform_4(%arg0: i32) -> (i32, i32, i32) {
    %c0_i32 = arith.constant 0 : i32
    %c0_i32_0 = arith.constant 0 : i32
    %c0_i32_1 = arith.constant 0 : i32
    return %arg0, %c0_i32, %c0_i32_0 : i32, i32, i32
  }
  func.func @transform_5(%arg0: i32) -> (i32, i32, i32) {
    %c0_i32 = arith.constant 0 : i32
    %c0_i32_0 = arith.constant 0 : i32
    %c0_i32_1 = arith.constant 0 : i32
    return %arg0, %c0_i32, %c0_i32_0 : i32, i32, i32
  }
  func.func @transform_6(%arg0: i32) -> (i32, i32, i32) {
    %c0_i32 = arith.constant 0 : i32
    %c0_i32_0 = arith.constant 0 : i32
    %c0_i32_1 = arith.constant 0 : i32
    return %arg0, %c0_i32, %c0_i32_0 : i32, i32, i32
  }
}

module attributes {stable_mosaic.version = 11 : i64} {
  func.func @_proj_kernel(%arg0: i32, %arg1: memref<256x4xf32, #tpu.memory_space<vmem>>, %arg2: memref<4x4xbf16, #tpu.memory_space<vmem>>, %arg3: memref<1x4xf32, #tpu.memory_space<vmem>>, %arg4: memref<256x4xf32, #tpu.memory_space<vmem>>) attributes {dimension_semantics = [#tpu.dimension_semantics<parallel>], iteration_bounds = array<i64: 2>, scalar_prefetch = 0 : i64, scratch_operands = 0 : i64, tpu.core_type = #tpu.core_type<tc>, window_params = [{transform_indices = @transform_0, window_bounds = array<i64: 256, 4>}, {pipeline_mode = #tpu.pipeline_mode<synchronous>, transform_indices = @transform_1, window_bounds = array<i64: 4, 4>}, {pipeline_mode = #tpu.pipeline_mode<synchronous>, transform_indices = @transform_2, window_bounds = array<i64: 1, 4>}, {transform_indices = @transform_3, window_bounds = array<i64: 256, 4>}]} {
    %c0 = arith.constant 0 : index
    %c0_0 = arith.constant 0 : index
    %0 = vector.load %arg1[%c0, %c0_0] : memref<256x4xf32, #tpu.memory_space<vmem>>, vector<256x4xf32>
    %1 = arith.truncf %0 : vector<256x4xf32> to vector<256x4xbf16>
    %c0_1 = arith.constant 0 : index
    %c0_2 = arith.constant 0 : index
    %2 = vector.load %arg2[%c0_1, %c0_2] : memref<4x4xbf16, #tpu.memory_space<vmem>>, vector<4x4xbf16>
    %cst = arith.constant dense<0.000000e+00> : vector<256x4xf32>
    %3 = tpu.matmul %1, %2, %cst {dimension_numbers = #tpu.dot_dimension_numbers<[1], [1], [0], [0], [0, 0, 1, 0], [], []>} : vector<256x4xbf16>, vector<4x4xbf16>, vector<256x4xf32> -> vector<256x4xf32>
    %c0_3 = arith.constant 0 : index
    %c0_4 = arith.constant 0 : index
    %4 = vector.load %arg3[%c0_3, %c0_4] : memref<1x4xf32, #tpu.memory_space<vmem>>, vector<1x4xf32>
    %5 = vector.broadcast %4 : vector<1x4xf32> to vector<256x4xf32>
    %6 = arith.addf %3, %5 : vector<256x4xf32>
    %c0_5 = arith.constant 0 : index
    %c0_6 = arith.constant 0 : index
    %7 = vector.load %arg4[%c0_5, %c0_6] : memref<256x4xf32, #tpu.memory_space<vmem>>, vector<256x4xf32>
    tpu.vector_store %arg4[%c0_5, %c0_6], %6 {strides = array<i32>} : memref<256x4xf32, #tpu.memory_space<vmem>>, vector<256x4xf32>,
    return
  }
  func.func @transform_0(%arg0: i32) -> (i32, i32) {
    %c0_i32 = arith.constant 0 : i32
    %c0_i32_0 = arith.constant 0 : i32
    return %arg0, %c0_i32 : i32, i32
  }
  func.func @transform_1(%arg0: i32) -> (i32, i32) {
    %c0_i32 = arith.constant 0 : i32
    %c0_i32_0 = arith.constant 0 : i32
    %c0_i32_1 = arith.constant 0 : i32
    return %c0_i32, %c0_i32_0 : i32, i32
  }
  func.func @transform_2(%arg0: i32) -> (i32, i32) {
    %c0_i32 = arith.constant 0 : i32
    %c0_i32_0 = arith.constant 0 : i32
    %c0_i32_1 = arith.constant 0 : i32
    return %c0_i32, %c0_i32_0 : i32, i32
  }
  func.func @transform_3(%arg0: i32) -> (i32, i32) {
    %c0_i32 = arith.constant 0 : i32
    %c0_i32_0 = arith.constant 0 : i32
    return %arg0, %c0_i32 : i32, i32
  }
}

module attributes {stable_mosaic.version = 11 : i64} {
  func.func @_bn_stats_kernel(%arg0: i32, %arg1: i32, %arg2: memref<1x4x256xf32, #tpu.memory_space<vmem>>, %arg3: memref<4x1xf32, #tpu.memory_space<vmem>>, %arg4: memref<4x1xf32, #tpu.memory_space<vmem>>) attributes {dimension_semantics = [#tpu.dimension_semantics<arbitrary>, #tpu.dimension_semantics<arbitrary>], iteration_bounds = array<i64: 2, 1>, scalar_prefetch = 0 : i64, scratch_operands = 0 : i64, tpu.core_type = #tpu.core_type<tc>, window_params = [{transform_indices = @transform_0, window_bounds = array<i64: 1, 4, 256>}, {pipeline_mode = #tpu.pipeline_mode<synchronous>, transform_indices = @transform_1, window_bounds = array<i64: 4, 1>}, {pipeline_mode = #tpu.pipeline_mode<synchronous>, transform_indices = @transform_2, window_bounds = array<i64: 4, 1>}]} {
    %c0_i32 = arith.constant 0 : i32
    %0 = arith.cmpi eq, %arg0, %c0_i32 : i32
    %c0_i32_0 = arith.constant 0 : i32
    %1 = arith.cmpi eq, %arg1, %c0_i32_0 : i32
    %2 = arith.andi %0, %1 : i1
    %3 = arith.extui %2 : i1 to i32
    %c0_i32_1 = arith.constant 0 : i32
    %4 = arith.cmpi ne, %3, %c0_i32_1 : i32
    scf.if %4 {
      %cst_14 = arith.constant 0.000000e+00 : f32
      %20 = vector.broadcast %cst_14 : f32 to vector<4x1xf32>
      %c0_15 = arith.constant 0 : index
      %c0_16 = arith.constant 0 : index
      %21 = vector.load %arg3[%c0_15, %c0_16] : memref<4x1xf32, #tpu.memory_space<vmem>>, vector<4x1xf32>
      tpu.vector_store %arg3[%c0_15, %c0_16], %20 {strides = array<i32>} : memref<4x1xf32, #tpu.memory_space<vmem>>, vector<4x1xf32>,
      %cst_17 = arith.constant 0.000000e+00 : f32
      %22 = vector.broadcast %cst_17 : f32 to vector<4x1xf32>
      %c0_18 = arith.constant 0 : index
      %c0_19 = arith.constant 0 : index
      %23 = vector.load %arg4[%c0_18, %c0_19] : memref<4x1xf32, #tpu.memory_space<vmem>>, vector<4x1xf32>
      tpu.vector_store %arg4[%c0_18, %c0_19], %22 {strides = array<i32>} : memref<4x1xf32, #tpu.memory_space<vmem>>, vector<4x1xf32>,
    } else {
    }
    %c0 = arith.constant 0 : index
    %c0_2 = arith.constant 0 : index
    %c0_3 = arith.constant 0 : index
    %5 = vector.load %arg2[%c0, %c0_2, %c0_3] : memref<1x4x256xf32, #tpu.memory_space<vmem>>, vector<1x4x256xf32>
    %6 = vector.shape_cast %5 : vector<1x4x256xf32> to vector<4x256xf32>
    %cst = arith.constant 0.000000e+00 : f32
    %7 = vector.broadcast %cst : f32 to vector<4x256xf32>
    %8 = arith.maximumf %6, %7 : vector<4x256xf32>
    %c0_4 = arith.constant 0 : index
    %c0_5 = arith.constant 0 : index
    %9 = vector.load %arg3[%c0_4, %c0_5] : memref<4x1xf32, #tpu.memory_space<vmem>>, vector<4x1xf32>
    %cst_6 = arith.constant dense<0.000000e+00> : vector<4xf32>
    %10 = vector.multi_reduction <add>, %8, %cst_6 [1] : vector<4x256xf32> to vector<4xf32>
    %11 = vector.shape_cast %10 : vector<4xf32> to vector<4x1xf32>
    %12 = arith.addf %9, %11 : vector<4x1xf32>
    %c0_7 = arith.constant 0 : index
    %c0_8 = arith.constant 0 : index
    %13 = vector.load %arg3[%c0_7, %c0_8] : memref<4x1xf32, #tpu.memory_space<vmem>>, vector<4x1xf32>
    tpu.vector_store %arg3[%c0_7, %c0_8], %12 {strides = array<i32>} : memref<4x1xf32, #tpu.memory_space<vmem>>, vector<4x1xf32>,
    %c0_9 = arith.constant 0 : index
    %c0_10 = arith.constant 0 : index
    %14 = vector.load %arg4[%c0_9, %c0_10] : memref<4x1xf32, #tpu.memory_space<vmem>>, vector<4x1xf32>
    %15 = arith.mulf %8, %8 : vector<4x256xf32>
    %cst_11 = arith.constant dense<0.000000e+00> : vector<4xf32>
    %16 = vector.multi_reduction <add>, %15, %cst_11 [1] : vector<4x256xf32> to vector<4xf32>
    %17 = vector.shape_cast %16 : vector<4xf32> to vector<4x1xf32>
    %18 = arith.addf %14, %17 : vector<4x1xf32>
    %c0_12 = arith.constant 0 : index
    %c0_13 = arith.constant 0 : index
    %19 = vector.load %arg4[%c0_12, %c0_13] : memref<4x1xf32, #tpu.memory_space<vmem>>, vector<4x1xf32>
    tpu.vector_store %arg4[%c0_12, %c0_13], %18 {strides = array<i32>} : memref<4x1xf32, #tpu.memory_space<vmem>>, vector<4x1xf32>,
    return
  }
  func.func @transform_0(%arg0: i32, %arg1: i32) -> (i32, i32, i32) {
    %c0_i32 = arith.constant 0 : i32
    %c0_i32_0 = arith.constant 0 : i32
    return %arg0, %c0_i32, %arg1 : i32, i32, i32
  }
  func.func @transform_1(%arg0: i32, %arg1: i32) -> (i32, i32) {
    %c0_i32 = arith.constant 0 : i32
    %c0_i32_0 = arith.constant 0 : i32
    %c0_i32_1 = arith.constant 0 : i32
    return %c0_i32, %c0_i32_0 : i32, i32
  }
  func.func @transform_2(%arg0: i32, %arg1: i32) -> (i32, i32) {
    %c0_i32 = arith.constant 0 : i32
    %c0_i32_0 = arith.constant 0 : i32
    %c0_i32_1 = arith.constant 0 : i32
    return %c0_i32, %c0_i32_0 : i32, i32
  }
}

module attributes {stable_mosaic.version = 11 : i64} {
  func.func @_bn_apply_kernel(%arg0: i32, %arg1: i32, %arg2: memref<1x4x256xf32, #tpu.memory_space<vmem>>, %arg3: memref<1x4x256xf32, #tpu.memory_space<vmem>>, %arg4: memref<4x1xf32, #tpu.memory_space<vmem>>, %arg5: memref<4x1xf32, #tpu.memory_space<vmem>>, %arg6: memref<4x1xf32, #tpu.memory_space<vmem>>, %arg7: memref<4x1xf32, #tpu.memory_space<vmem>>, %arg8: memref<1x4x256xf32, #tpu.memory_space<vmem>>) attributes {dimension_semantics = [#tpu.dimension_semantics<parallel>, #tpu.dimension_semantics<parallel>], iteration_bounds = array<i64: 2, 1>, scalar_prefetch = 0 : i64, scratch_operands = 0 : i64, tpu.core_type = #tpu.core_type<tc>, window_params = [{transform_indices = @transform_0, window_bounds = array<i64: 1, 4, 256>}, {transform_indices = @transform_1, window_bounds = array<i64: 1, 4, 256>}, {pipeline_mode = #tpu.pipeline_mode<synchronous>, transform_indices = @transform_2, window_bounds = array<i64: 4, 1>}, {pipeline_mode = #tpu.pipeline_mode<synchronous>, transform_indices = @transform_3, window_bounds = array<i64: 4, 1>}, {pipeline_mode = #tpu.pipeline_mode<synchronous>, transform_indices = @transform_4, window_bounds = array<i64: 4, 1>}, {pipeline_mode = #tpu.pipeline_mode<synchronous>, transform_indices = @transform_5, window_bounds = array<i64: 4, 1>}, {transform_indices = @transform_6, window_bounds = array<i64: 1, 4, 256>}]} {
    %c0 = arith.constant 0 : index
    %c0_0 = arith.constant 0 : index
    %c0_1 = arith.constant 0 : index
    %0 = vector.load %arg2[%c0, %c0_0, %c0_1] : memref<1x4x256xf32, #tpu.memory_space<vmem>>, vector<1x4x256xf32>
    %1 = vector.shape_cast %0 : vector<1x4x256xf32> to vector<4x256xf32>
    %cst = arith.constant 0.000000e+00 : f32
    %2 = vector.broadcast %cst : f32 to vector<4x256xf32>
    %3 = arith.maximumf %1, %2 : vector<4x256xf32>
    %c0_2 = arith.constant 0 : index
    %c0_3 = arith.constant 0 : index
    %4 = vector.load %arg4[%c0_2, %c0_3] : memref<4x1xf32, #tpu.memory_space<vmem>>, vector<4x1xf32>
    %cst_4 = arith.constant 0.001953125 : f32
    %5 = vector.broadcast %cst_4 : f32 to vector<4x1xf32>
    %6 = arith.mulf %4, %5 : vector<4x1xf32>
    %c0_5 = arith.constant 0 : index
    %c0_6 = arith.constant 0 : index
    %7 = vector.load %arg5[%c0_5, %c0_6] : memref<4x1xf32, #tpu.memory_space<vmem>>, vector<4x1xf32>
    %cst_7 = arith.constant 0.001953125 : f32
    %8 = vector.broadcast %cst_7 : f32 to vector<4x1xf32>
    %9 = arith.mulf %7, %8 : vector<4x1xf32>
    %10 = arith.mulf %6, %6 : vector<4x1xf32>
    %11 = arith.subf %9, %10 : vector<4x1xf32>
    %cst_8 = arith.constant 9.99999974E-6 : f32
    %12 = vector.broadcast %cst_8 : f32 to vector<4x1xf32>
    %13 = arith.addf %11, %12 : vector<4x1xf32>
    %14 = math.rsqrt %13 : vector<4x1xf32>
    %c0_9 = arith.constant 0 : index
    %c0_10 = arith.constant 0 : index
    %c0_11 = arith.constant 0 : index
    %15 = vector.load %arg3[%c0_9, %c0_10, %c0_11] : memref<1x4x256xf32, #tpu.memory_space<vmem>>, vector<1x4x256xf32>
    %16 = vector.shape_cast %15 : vector<1x4x256xf32> to vector<4x256xf32>
    %c0_12 = arith.constant 0 : index
    %c0_13 = arith.constant 0 : index
    %17 = vector.load %arg6[%c0_12, %c0_13] : memref<4x1xf32, #tpu.memory_space<vmem>>, vector<4x1xf32>
    %18 = vector.broadcast %6 : vector<4x1xf32> to vector<4x256xf32>
    %19 = arith.subf %3, %18 : vector<4x256xf32>
    %20 = vector.broadcast %17 : vector<4x1xf32> to vector<4x256xf32>
    %21 = arith.mulf %20, %19 : vector<4x256xf32>
    %22 = vector.broadcast %14 : vector<4x1xf32> to vector<4x256xf32>
    %23 = arith.mulf %21, %22 : vector<4x256xf32>
    %24 = arith.addf %16, %23 : vector<4x256xf32>
    %c0_14 = arith.constant 0 : index
    %c0_15 = arith.constant 0 : index
    %25 = vector.load %arg7[%c0_14, %c0_15] : memref<4x1xf32, #tpu.memory_space<vmem>>, vector<4x1xf32>
    %26 = vector.broadcast %25 : vector<4x1xf32> to vector<4x256xf32>
    %27 = arith.addf %24, %26 : vector<4x256xf32>
    %c0_16 = arith.constant 0 : index
    %c0_17 = arith.constant 0 : index
    %c0_18 = arith.constant 0 : index
    %28 = vector.load %arg8[%c0_16, %c0_17, %c0_18] : memref<1x4x256xf32, #tpu.memory_space<vmem>>, vector<1x4x256xf32>
    %29 = vector.shape_cast %28 : vector<1x4x256xf32> to vector<4x256xf32>
    %30 = vector.shape_cast %27 : vector<4x256xf32> to vector<1x4x256xf32>
    tpu.vector_store %arg8[%c0_16, %c0_17, %c0_18], %30 {strides = array<i32>} : memref<1x4x256xf32, #tpu.memory_space<vmem>>, vector<1x4x256xf32>,
    return
  }
  func.func @transform_0(%arg0: i32, %arg1: i32) -> (i32, i32, i32) {
    %c0_i32 = arith.constant 0 : i32
    %c0_i32_0 = arith.constant 0 : i32
    return %arg0, %c0_i32, %arg1 : i32, i32, i32
  }
  func.func @transform_1(%arg0: i32, %arg1: i32) -> (i32, i32, i32) {
    %c0_i32 = arith.constant 0 : i32
    %c0_i32_0 = arith.constant 0 : i32
    return %arg0, %c0_i32, %arg1 : i32, i32, i32
  }
  func.func @transform_2(%arg0: i32, %arg1: i32) -> (i32, i32) {
    %c0_i32 = arith.constant 0 : i32
    %c0_i32_0 = arith.constant 0 : i32
    %c0_i32_1 = arith.constant 0 : i32
    return %c0_i32, %c0_i32_0 : i32, i32
  }
  func.func @transform_3(%arg0: i32, %arg1: i32) -> (i32, i32) {
    %c0_i32 = arith.constant 0 : i32
    %c0_i32_0 = arith.constant 0 : i32
    %c0_i32_1 = arith.constant 0 : i32
    return %c0_i32, %c0_i32_0 : i32, i32
  }
  func.func @transform_4(%arg0: i32, %arg1: i32) -> (i32, i32) {
    %c0_i32 = arith.constant 0 : i32
    %c0_i32_0 = arith.constant 0 : i32
    %c0_i32_1 = arith.constant 0 : i32
    return %c0_i32, %c0_i32_0 : i32, i32
  }
  func.func @transform_5(%arg0: i32, %arg1: i32) -> (i32, i32) {
    %c0_i32 = arith.constant 0 : i32
    %c0_i32_0 = arith.constant 0 : i32
    %c0_i32_1 = arith.constant 0 : i32
    return %c0_i32, %c0_i32_0 : i32, i32
  }
  func.func @transform_6(%arg0: i32, %arg1: i32) -> (i32, i32, i32) {
    %c0_i32 = arith.constant 0 : i32
    %c0_i32_0 = arith.constant 0 : i32
    return %arg0, %c0_i32, %arg1 : i32, i32, i32
  }
}

</mosaic_0001>

<bundles_post_ra>
// kernel: fct_forward.5
= control target key start
LH: loop header
LB: loop body
LE: loop exit
PB: predicated region body
PF: predicated region fallthrough
CT: control target
= control target key end

     0   :  { %10 = vsyncpa [#allocation5], 0  ;;  %s2362_s0 = inlined_call_operand.vmem [shape: f32[2,4,256], index: 0, kind: input, shape index: {}]   ;;  %s2363_s1 = inlined_call_operand.hbm [shape: bf16[256,256], index: 1, kind: input, shape index: {}]   ;;  %s2364_s2 = inlined_call_operand.hbm [shape: bf16[256,256], index: 2, kind: input, shape index: {}]   ;;  %s2365_s3 = inlined_call_operand.vmem [shape: f32[2,256,4], index: 3, kind: output, shape index: {0}]   ;;  %s2366_s4 = inlined_call_operand.vmem [shape: f32[2,256,4], index: 4, kind: output, shape index: {1}]  }
   0x1   :  { %11 = vsyncpa [#allocation7], 0  ;;  %s1949_s15 = smov 0   ;;  %s1951_s16 = smov 0  }
   0x2   :  { %s1953_s17 = smov 0  }
   0x3 LB: > { %s1606_s18 = sadd.s32 4294967295, %s1917_s17   ;;  %s36_s19 = sadd.s32 1, %s1913_s16  ;;  %s1917_s17 = sphi %s1953_s17, %s17_s17   ;;  %s1913_s16 = sphi %s1951_s16, %s2371_s16   ;;  %s1909_s15 = sphi %s1949_s15, %s2370_s15  }
   0x4   : > { %p38_p0 = scmp.ge.s32.totalorder %s36_s19, 2  ;;  %p1608_p1 = scmp.ge.s32.totalorder %s1917_s17, 1 }
   0x5   : > { %p181_p2 = scmp.lt.s32.totalorder %s1917_s17, 3  ;;  %p1974_p4 = scmp.eq.s32.totalorder %s1606_s18, 0 }
   0x6   : > { %s2373_s19 = smov (%p38_p0, %s36_s19), 0  ;;  %s1919_s22 = smov [#allocation4]  }
   0x7   : > { %p1970_p3 = pnand %p1608_p1, %p181_p2  ;;  %s199_s23 = sshll.u32 %s1919_s22, 4  ;;  %s200_s23 = int_to_ptr.vmem [resolvable:$true] %s199_s23 }
   0x8   : > { %s1920_s25 = smov [#allocation6]   ;;  %s1846_s27 = scalar_lea.vmem %s200_s23, 4096 }
   0x9   : > { %p1698_p5 = pneg %p1970_p3  ;;  %s218_s26 = sshll.u32 %s1920_s25, 4  ;;  %s219_s26 = int_to_ptr.vmem [resolvable:$true] %s218_s26 }
   0xa   : > { %p1847_p8 = scmp.ne.s32.totalorder %s200_s23, %s1846_s27  ;;  %p1854_p11 = scmp.lt.s32.totalorder %s200_s23, %s200_s23 }
   0xb   : > { %p1982_p6 = pnand %p1974_p4, %p1698_p5  ;;  %p1855_p12 = scmp.lt.s32.totalorder %s1846_s27, %s1846_s27 }
   0xd   : > { %p1837_p7 = pneg %p1982_p6  ;;  %p1856_p13 = por %p1855_p12, %p1854_p11 }
   0xf   : > { %p1849_p9 = pnand %p1847_p8, %p1837_p7 }
  0x11   : > { %p1850_p10 = pneg %p1849_p9 }
  0x13   : > { %p1857_p0 = pnand %p1856_p13, %p1850_p10 }
  0x15   : > { %1860 = shalt.err (!%p1857_p0)
}
  0x16   : > { %s1921_s28 = smov 128   ;;  %s1922_s29 = smov 8  }
  0x17   : > { %1701 = dma.hbm_to_vmem [thread:$0]  (!%p1982_p6), %s2363_s1, 4096, %s200_s23, [#allocation5], %s1921_s28, %s1921_s28, %s1922_s29  }
  0x18   : > { %s1872_s6 = scalar_lea.vmem %s219_s26, 4096  ;;  %p1880_p8 = scmp.lt.s32.totalorder %s219_s26, %s219_s26 }
  0x19   : > { %p1873_p1 = scmp.ne.s32.totalorder %s219_s26, %s1872_s6  ;;  %p1881_p9 = scmp.lt.s32.totalorder %s1872_s6, %s1872_s6 }
  0x1b   : > { %p1875_p2 = pnand %p1873_p1, %p1837_p7  ;;  %p1882_p11 = por %p1881_p9, %p1880_p8 }
  0x1d   : > { %p1876_p5 = pneg %p1875_p2 }
  0x1f   : > { %p1883_p10 = pnand %p1882_p11, %p1876_p5 }
  0x21   : > { %1886 = shalt.err (!%p1883_p10)
}
  0x22   : > { %1704 = dma.hbm_to_vmem [thread:$0]  (!%p1982_p6), %s2364_s2, 4096, %s219_s26, [#allocation7], %s1921_s28, %s1921_s28, %s1922_s29  }
  0x23   : > { %247 = sbr.rel (%p1970_p3) target bundleno = 390 (0x186), region = 32 }
  0x28   : > { %1900 = dma.done.wait (%p1974_p4), [#allocation5], 4096  }
  0x29   : > { %1902 = vsyncadd (%p1974_p4), [#allocation5], 4294963200 }
  0x2a   : > { %1904 = dma.done.wait (%p1974_p4), [#allocation7], 4096  }
  0x2b   : > { %1906 = vsyncadd (%p1974_p4), [#allocation7], 4294963200  ;;  %p295_p7 = scmp.lt.s32.totalorder %s1909_s15, 1  ;;  %v1741_v2 = vld [vmem:[#allocation4 + $0x4] ss:$8 sps:$4 sm:$0xff]   ;;  %vm333_vm0 = vcmask 31744  }
  0x2c   : > { %v1744_v4 = vld [vmem:[#allocation6 + $0x4] ss:$8 sps:$4 sm:$0xff]   ;;  %660 = vmatprep.mubr.bf16.mxu0 %v1741_v2  ;;  %v1923_v6 = vmov 0.0   ;;  %v1739_v7 = vld [vmem:[#allocation4] ss:$8 sps:$4 sm:$0xff]  }
  0x2d   : > { %s2375_s15 = smov (!%p295_p7, %s1909_s15), 1  ;;  %1110 = vmatprep.mubr.bf16.mxu1 %v1744_v4  ;;  %334 = vst.msk [vmem:[#allocation2] sm:$0xff] %vm333_vm0, %v1923_v6  ;;  %335 = vst.msk [vmem:[#allocation2 + $0x8] sm:$0xff] %vm333_vm0, %v1923_v6  ;;  %v1742_v8 = vld [vmem:[#allocation6] ss:$8 sps:$4 sm:$0xff]  }
  0x2e   : > { %s1687_s9 = sshll.u32 %s2375_s15, 3  ;;  %336 = vst.msk [vmem:[#allocation2 + $0x10] sm:$0xff] %vm333_vm0, %v1923_v6  ;;  %337 = vst.msk [vmem:[#allocation2 + $0x18] sm:$0xff] %vm333_vm0, %v1923_v6  ;;  %v1745_v9 = vld [vmem:[#allocation4 + $0x14] ss:$8 sps:$4 sm:$0xff]   ;;  %s1688_s13 = sshll.u32 %s2375_s15, 8 }
  0x2f   : > { %s302_s12 = scalar_lea.vmem %s2362_s0, %s1687_s9  ;;  %338 = vst.msk [vmem:[#allocation2 + $0x20] sm:$0xff] %vm333_vm0, %v1923_v6  ;;  %339 = vst.msk [vmem:[#allocation2 + $0x28] sm:$0xff] %vm333_vm0, %v1923_v6  ;;  %v1747_v10 = vld [vmem:[#allocation6 + $0x14] ss:$8 sps:$4 sm:$0xff]   ;;  %v1749_v11 = vld [vmem:[#allocation4 + $0x10] ss:$8 sps:$4 sm:$0xff]   ;;  %s2158_s20 = scalar_lea.vmem %s2365_s3, %s1688_s13 }
  0x30   : > { %v398_v0 = vld [vmem:[%s302_s12] sm:$0xff]  ;;  %340 = vst.msk [vmem:[#allocation2 + $0x30] sm:$0xff] %vm333_vm0, %v1923_v6  ;;  %341 = vst.msk [vmem:[#allocation2 + $0x38] sm:$0xff] %vm333_vm0, %v1923_v6  ;;  %v1750_v12 = vld [vmem:[#allocation6 + $0x10] ss:$8 sps:$4 sm:$0xff]   ;;  %s2163_s15 = scalar_lea.vmem %s2366_s4, %s1688_s13 }
  0x31   : > { %v400_v1 = vcombine.high %v398_v0, %v398_v0  ;;  %v402_v3 = vpack.c.bf16 %v398_v0, %v398_v0  ;;  %342 = vst.msk [vmem:[#allocation2 + $0x40] sm:$0xff] %vm333_vm0, %v1923_v6  ;;  %343 = vst.msk [vmem:[#allocation2 + $0x48] sm:$0xff] %vm333_vm0, %v1923_v6  ;;  %v1751_v13 = vld [vmem:[#allocation4 + $0x24] ss:$8 sps:$4 sm:$0xff]   ;;  %v1755_v15 = vld [vmem:[#allocation4 + $0x20] ss:$8 sps:$4 sm:$0xff]  }
  0x32   : > { %344 = vst.msk [vmem:[#allocation2 + $0x50] sm:$0xff] %vm333_vm0, %v1923_v6  ;;  %345 = vst.msk [vmem:[#allocation2 + $0x58] sm:$0xff] %vm333_vm0, %v1923_v6  ;;  %v1753_v14 = vld [vmem:[#allocation6 + $0x24] ss:$8 sps:$4 sm:$0xff]   ;;  %v1756_v16 = vld [vmem:[#allocation6 + $0x20] ss:$8 sps:$4 sm:$0xff]  }
  0x33   : > { %v403_v5 = vpack.c.bf16 %v400_v1, %v400_v1  ;;  %346 = vst.msk [vmem:[#allocation2 + $0x60] sm:$0xff] %vm333_vm0, %v1923_v6  ;;  %347 = vst.msk [vmem:[#allocation2 + $0x68] sm:$0xff] %vm333_vm0, %v1923_v6  ;;  %v1757_v17 = vld [vmem:[#allocation4 + $0x34] ss:$8 sps:$4 sm:$0xff]   ;;  %v1761_v19 = vld [vmem:[#allocation4 + $0x30] ss:$8 sps:$4 sm:$0xff]  }
  0x34   : > { %348 = vst.msk [vmem:[#allocation2 + $0x70] sm:$0xff] %vm333_vm0, %v1923_v6  ;;  %349 = vst.msk [vmem:[#allocation2 + $0x78] sm:$0xff] %vm333_vm0, %v1923_v6  ;;  %v1759_v18 = vld [vmem:[#allocation6 + $0x34] ss:$8 sps:$4 sm:$0xff]   ;;  %v1762_v20 = vld [vmem:[#allocation6 + $0x30] ss:$8 sps:$4 sm:$0xff]  }
  0x35   : > { %642 = vmatprep.subr.bf16.mxu0 %v403_v5  ;;  %1092 = vmatprep.subr.bf16.mxu1 %v403_v5  ;;  %350 = vst.msk [vmem:[#allocation2 + $0x80] sm:$0xff] %vm333_vm0, %v1923_v6  ;;  %351 = vst.msk [vmem:[#allocation2 + $0x88] sm:$0xff] %vm333_vm0, %v1923_v6  ;;  %v1763_v21 = vld [vmem:[#allocation4 + $0x44] ss:$8 sps:$4 sm:$0xff]   ;;  %v1767_v23 = vld [vmem:[#allocation4 + $0x40] ss:$8 sps:$4 sm:$0xff]  }
  0x36   : > { %643 = vmatpush1.bf16.xpose.msra.mxu0 %v402_v3  ;;  %1093 = vmatpush1.bf16.xpose.msra.mxu1 %v402_v3  ;;  %352 = vst.msk [vmem:[#allocation2 + $0x90] sm:$0xff] %vm333_vm0, %v1923_v6  ;;  %353 = vst.msk [vmem:[#allocation2 + $0x98] sm:$0xff] %vm333_vm0, %v1923_v6  ;;  %v1765_v22 = vld [vmem:[#allocation6 + $0x44] ss:$8 sps:$4 sm:$0xff]   ;;  %v1768_v24 = vld [vmem:[#allocation6 + $0x40] ss:$8 sps:$4 sm:$0xff]  }
  0x37   : > { %354 = vst.msk [vmem:[#allocation2 + $0xa0] sm:$0xff] %vm333_vm0, %v1923_v6  ;;  %355 = vst.msk [vmem:[#allocation2 + $0xa8] sm:$0xff] %vm333_vm0, %v1923_v6  ;;  %v1769_v25 = vld [vmem:[#allocation4 + $0x54] ss:$8 sps:$4 sm:$0xff]   ;;  %v1773_v27 = vld [vmem:[#allocation4 + $0x50] ss:$8 sps:$4 sm:$0xff]  }
  0x38   : > { %356 = vst.msk [vmem:[#allocation2 + $0xb0] sm:$0xff] %vm333_vm0, %v1923_v6  ;;  %357 = vst.msk [vmem:[#allocation2 + $0xb8] sm:$0xff] %vm333_vm0, %v1923_v6  ;;  %v1771_v26 = vld [vmem:[#allocation6 + $0x54] ss:$8 sps:$4 sm:$0xff]   ;;  %v1774_v28 = vld [vmem:[#allocation6 + $0x50] ss:$8 sps:$4 sm:$0xff]  }
  0x39   : > { %358 = vst.msk [vmem:[#allocation2 + $0xc0] sm:$0xff] %vm333_vm0, %v1923_v6  ;;  %359 = vst.msk [vmem:[#allocation2 + $0xc8] sm:$0xff] %vm333_vm0, %v1923_v6  ;;  %v1775_v29 = vld [vmem:[#allocation4 + $0x64] ss:$8 sps:$4 sm:$0xff]   ;;  %v1779_v31 = vld [vmem:[#allocation4 + $0x60] ss:$8 sps:$4 sm:$0xff]  }
  0x3a   : > { %360 = vst.msk [vmem:[#allocation2 + $0xd0] sm:$0xff] %vm333_vm0, %v1923_v6  ;;  %361 = vst.msk [vmem:[#allocation2 + $0xd8] sm:$0xff] %vm333_vm0, %v1923_v6  ;;  %v1777_v30 = vld [vmem:[#allocation6 + $0x64] ss:$8 sps:$4 sm:$0xff]   ;;  %v1780_v32 = vld [vmem:[#allocation6 + $0x60] ss:$8 sps:$4 sm:$0xff]  }
  0x3b   : > { %362 = vst.msk [vmem:[#allocation2 + $0xe0] sm:$0xff] %vm333_vm0, %v1923_v6  ;;  %363 = vst.msk [vmem:[#allocation2 + $0xe8] sm:$0xff] %vm333_vm0, %v1923_v6  ;;  %v1781_v33 = vld [vmem:[#allocation4 + $0x74] ss:$8 sps:$4 sm:$0xff]   ;;  %v1785_v35 = vld [vmem:[#allocation4 + $0x70] ss:$8 sps:$4 sm:$0xff]  }
  0x3c   : > { %364 = vst.msk [vmem:[#allocation2 + $0xf0] sm:$0xff] %vm333_vm0, %v1923_v6  ;;  %365 = vst.msk [vmem:[#allocation2 + $0xf8] sm:$0xff] %vm333_vm0, %v1923_v6  ;;  %v1783_v34 = vld [vmem:[#allocation6 + $0x74] ss:$8 sps:$4 sm:$0xff]   ;;  %v1786_v36 = vld [vmem:[#allocation6 + $0x70] ss:$8 sps:$4 sm:$0xff]  }
  0x3d   : > { %366 = vst.msk [vmem:[#allocation3] sm:$0xff] %vm333_vm0, %v1923_v6  ;;  %367 = vst.msk [vmem:[#allocation3 + $0x8] sm:$0xff] %vm333_vm0, %v1923_v6  ;;  %661 = vmatmul.mubr.bf16.vlgmr.msra.gmra.mxu0 %v1739_v7  ;;  %1111 = vmatmul.mubr.bf16.vlgmr.msra.gmra.mxu1 %v1742_v8  ;;  %v1787_v37 = vld [vmem:[#allocation4 + $0x84] ss:$8 sps:$4 sm:$0xff]   ;;  %v1791_v39 = vld [vmem:[#allocation4 + $0x80] ss:$8 sps:$4 sm:$0xff]  }
  0x3e   : > { %368 = vst.msk [vmem:[#allocation3 + $0x10] sm:$0xff] %vm333_vm0, %v1923_v6  ;;  %369 = vst.msk [vmem:[#allocation3 + $0x18] sm:$0xff] %vm333_vm0, %v1923_v6  ;;  %668 = vmatprep.mubr.bf16.mxu0 %v1745_v9  ;;  %1118 = vmatprep.mubr.bf16.mxu1 %v1747_v10  ;;  %v1789_v38 = vld [vmem:[#allocation6 + $0x84] ss:$8 sps:$4 sm:$0xff]   ;;  %v1792_v40 = vld [vmem:[#allocation6 + $0x80] ss:$8 sps:$4 sm:$0xff]  }
  0x3f   : > { %370 = vst.msk [vmem:[#allocation3 + $0x20] sm:$0xff] %vm333_vm0, %v1923_v6  ;;  %371 = vst.msk [vmem:[#allocation3 + $0x28] sm:$0xff] %vm333_vm0, %v1923_v6  ;;  %v1793_v41 = vld [vmem:[#allocation4 + $0x94] ss:$8 sps:$4 sm:$0xff]   ;;  %v1797_v43 = vld [vmem:[#allocation4 + $0x90] ss:$8 sps:$4 sm:$0xff]  }
  0x40   : > { %372 = vst.msk [vmem:[#allocation3 + $0x30] sm:$0xff] %vm333_vm0, %v1923_v6  ;;  %373 = vst.msk [vmem:[#allocation3 + $0x38] sm:$0xff] %vm333_vm0, %v1923_v6  ;;  %v1795_v42 = vld [vmem:[#allocation6 + $0x94] ss:$8 sps:$4 sm:$0xff]   ;;  %v1798_v44 = vld [vmem:[#allocation6 + $0x90] ss:$8 sps:$4 sm:$0xff]  }
  0x41   : > { %374 = vst.msk [vmem:[#allocation3 + $0x40] sm:$0xff] %vm333_vm0, %v1923_v6  ;;  %375 = vst.msk [vmem:[#allocation3 + $0x48] sm:$0xff] %vm333_vm0, %v1923_v6  ;;  %v1799_v45 = vld [vmem:[#allocation4 + $0xa4] ss:$8 sps:$4 sm:$0xff]   ;;  %v1803_v47 = vld [vmem:[#allocation4 + $0xa0] ss:$8 sps:$4 sm:$0xff]  }
  0x42   : > { %376 = vst.msk [vmem:[#allocation3 + $0x50] sm:$0xff] %vm333_vm0, %v1923_v6  ;;  %377 = vst.msk [vmem:[#allocation3 + $0x58] sm:$0xff] %vm333_vm0, %v1923_v6  ;;  %v1801_v46 = vld [vmem:[#allocation6 + $0xa4] ss:$8 sps:$4 sm:$0xff]   ;;  %v1804_v48 = vld [vmem:[#allocation6 + $0xa0] ss:$8 sps:$4 sm:$0xff]  }
  0x43   : > { %378 = vst.msk [vmem:[#allocation3 + $0x60] sm:$0xff] %vm333_vm0, %v1923_v6  ;;  %379 = vst.msk [vmem:[#allocation3 + $0x68] sm:$0xff] %vm333_vm0, %v1923_v6  ;;  %v1805_v49 = vld [vmem:[#allocation4 + $0xb4] ss:$8 sps:$4 sm:$0xff]   ;;  %v1809_v51 = vld [vmem:[#allocation4 + $0xb0] ss:$8 sps:$4 sm:$0xff]  }
  0x44   : > { %380 = vst.msk [vmem:[#allocation3 + $0x70] sm:$0xff] %vm333_vm0, %v1923_v6  ;;  %381 = vst.msk [vmem:[#allocation3 + $0x78] sm:$0xff] %vm333_vm0, %v1923_v6  ;;  %v1807_v50 = vld [vmem:[#allocation6 + $0xb4] ss:$8 sps:$4 sm:$0xff]   ;;  %v1810_v52 = vld [vmem:[#allocation6 + $0xb0] ss:$8 sps:$4 sm:$0xff]  }
  0x45   : > { %382 = vst.msk [vmem:[#allocation3 + $0x80] sm:$0xff] %vm333_vm0, %v1923_v6  ;;  %383 = vst.msk [vmem:[#allocation3 + $0x88] sm:$0xff] %vm333_vm0, %v1923_v6  ;;  %669 = vmatmul.mubr.bf16.gmra.mxu0 %v1749_v11  ;;  %1119 = vmatmul.mubr.bf16.gmra.mxu1 %v1750_v12  ;;  %v1811_v53 = vld [vmem:[#allocation4 + $0xc4] ss:$8 sps:$4 sm:$0xff]   ;;  %v1815_v55 = vld [vmem:[#allocation4 + $0xc0] ss:$8 sps:$4 sm:$0xff]  }
  0x46   : > { %384 = vst.msk [vmem:[#allocation3 + $0x90] sm:$0xff] %vm333_vm0, %v1923_v6  ;;  %385 = vst.msk [vmem:[#allocation3 + $0x98] sm:$0xff] %vm333_vm0, %v1923_v6  ;;  %676 = vmatprep.mubr.bf16.mxu0 %v1751_v13  ;;  %1126 = vmatprep.mubr.bf16.mxu1 %v1753_v14  ;;  %v1813_v54 = vld [vmem:[#allocation6 + $0xc4] ss:$8 sps:$4 sm:$0xff]   ;;  %v1816_v56 = vld [vmem:[#allocation6 + $0xc0] ss:$8 sps:$4 sm:$0xff]  }
  0x47   : > { %386 = vst.msk [vmem:[#allocation3 + $0xa0] sm:$0xff] %vm333_vm0, %v1923_v6  ;;  %387 = vst.msk [vmem:[#allocation3 + $0xa8] sm:$0xff] %vm333_vm0, %v1923_v6  ;;  %v1817_v57 = vld [vmem:[#allocation4 + $0xd4] ss:$8 sps:$4 sm:$0xff]   ;;  %v1821_v59 = vld [vmem:[#allocation4 + $0xd0] ss:$8 sps:$4 sm:$0xff]  }
  0x48   : > { %388 = vst.msk [vmem:[#allocation3 + $0xb0] sm:$0xff] %vm333_vm0, %v1923_v6  ;;  %389 = vst.msk [vmem:[#allocation3 + $0xb8] sm:$0xff] %vm333_vm0, %v1923_v6  ;;  %v1819_v58 = vld [vmem:[#allocation6 + $0xd4] ss:$8 sps:$4 sm:$0xff]   ;;  %v1822_v60 = vld [vmem:[#allocation6 + $0xd0] ss:$8 sps:$4 sm:$0xff]  }
  0x49   : > { %390 = vst.msk [vmem:[#allocation3 + $0xc0] sm:$0xff] %vm333_vm0, %v1923_v6  ;;  %391 = vst.msk [vmem:[#allocation3 + $0xc8] sm:$0xff] %vm333_vm0, %v1923_v6  ;;  %v1823_v61 = vld [vmem:[#allocation4 + $0xe4] ss:$8 sps:$4 sm:$0xff]   ;;  %v1827_v63 = vld [vmem:[#allocation4 + $0xe0] ss:$8 sps:$4 sm:$0xff]  }
  0x4a   : > { %392 = vst.msk [vmem:[#allocation3 + $0xd0] sm:$0xff] %vm333_vm0, %v1923_v6  ;;  %393 = vst.msk [vmem:[#allocation3 + $0xd8] sm:$0xff] %vm333_vm0, %v1923_v6  ;;  %v1825_v62 = vld [vmem:[#allocation6 + $0xe4] ss:$8 sps:$4 sm:$0xff]   ;;  %v1828_v0 = vld [vmem:[#allocation6 + $0xe0] ss:$8 sps:$4 sm:$0xff]  }
  0x4b   : > { %394 = vst.msk [vmem:[#allocation3 + $0xe0] sm:$0xff] %vm333_vm0, %v1923_v6  ;;  %395 = vst.msk [vmem:[#allocation3 + $0xe8] sm:$0xff] %vm333_vm0, %v1923_v6  ;;  %v1829_v1 = vld [vmem:[#allocation4 + $0xf4] ss:$8 sps:$4 sm:$0xff]   ;;  %v1833_v3 = vld [vmem:[#allocation4 + $0xf0] ss:$8 sps:$4 sm:$0xff]  }
  0x4c   : > { %396 = vst.msk [vmem:[#allocation3 + $0xf0] sm:$0xff] %vm333_vm0, %v1923_v6  ;;  %397 = vst.msk [vmem:[#allocation3 + $0xf8] sm:$0xff] %vm333_vm0, %v1923_v6  ;;  %v1831_v2 = vld [vmem:[#allocation6 + $0xf4] ss:$8 sps:$4 sm:$0xff]   ;;  %v1834_v4 = vld [vmem:[#allocation6 + $0xf0] ss:$8 sps:$4 sm:$0xff]  }
  0x4d   : > { %677 = vmatmul.mubr.bf16.gmra.mxu0 %v1755_v15  ;;  %1127 = vmatmul.mubr.bf16.gmra.mxu1 %v1756_v16  ;;  %v404_v5 = vld [vmem:[#allocation2] sm:$0xff]  ;;  %v405_v13 = vld [vmem:[#allocation2 + $0x8] sm:$0xff] }
  0x4e   : > { %684 = vmatprep.mubr.bf16.mxu0 %v1757_v17  ;;  %1134 = vmatprep.mubr.bf16.mxu1 %v1759_v18  ;;  %v854_v6 = vld [vmem:[#allocation3] sm:$0xff]  ;;  %v855_v14 = vld [vmem:[#allocation3 + $0x8] sm:$0xff] }
  0x55   : > { %685 = vmatmul.mubr.bf16.gmra.mxu0 %v1761_v19  ;;  %1135 = vmatmul.mubr.bf16.gmra.mxu1 %v1762_v20 }
  0x56   : > { %692 = vmatprep.mubr.bf16.mxu0 %v1763_v21  ;;  %1142 = vmatprep.mubr.bf16.mxu1 %v1765_v22  ;;  %v406_v21 = vld [vmem:[#allocation2 + $0x10] sm:$0xff] }
  0x57   : > { %v856_v22 = vld [vmem:[#allocation3 + $0x10] sm:$0xff] }
  0x5d   : > { %693 = vmatmul.mubr.bf16.gmra.mxu0 %v1767_v23  ;;  %1143 = vmatmul.mubr.bf16.gmra.mxu1 %v1768_v24 }
  0x5e   : > { %700 = vmatprep.mubr.bf16.mxu0 %v1769_v25  ;;  %1150 = vmatprep.mubr.bf16.mxu1 %v1771_v26 }
  0x65   : > { %701 = vmatmul.mubr.bf16.gmra.mxu0 %v1773_v27  ;;  %1151 = vmatmul.mubr.bf16.gmra.mxu1 %v1774_v28  ;;  %v407_v27 = vld [vmem:[#allocation2 + $0x18] sm:$0xff] }
  0x66   : > { %708 = vmatprep.mubr.bf16.mxu0 %v1775_v29  ;;  %1158 = vmatprep.mubr.bf16.mxu1 %v1777_v30 }
  0x6d   : > { %709 = vmatmul.mubr.bf16.gmra.mxu0 %v1779_v31  ;;  %1159 = vmatmul.mubr.bf16.gmra.mxu1 %v1780_v32  ;;  %v857_v32 = vld [vmem:[#allocation3 + $0x18] sm:$0xff] }
  0x6e   : > { %716 = vmatprep.mubr.bf16.mxu0 %v1781_v33  ;;  %1166 = vmatprep.mubr.bf16.mxu1 %v1783_v34 }
  0x75   : > { %717 = vmatmul.mubr.bf16.gmra.mxu0 %v1785_v35  ;;  %1167 = vmatmul.mubr.bf16.gmra.mxu1 %v1786_v36 }
  0x76   : > { %724 = vmatprep.mubr.bf16.mxu0 %v1787_v37  ;;  %1174 = vmatprep.mubr.bf16.mxu1 %v1789_v38  ;;  %v408_v37 = vld [vmem:[#allocation2 + $0x20] sm:$0xff] }
  0x7d   : > { %725 = vmatmul.mubr.bf16.gmra.mxu0 %v1791_v39  ;;  %1175 = vmatmul.mubr.bf16.gmra.mxu1 %v1792_v40 }
  0x7e   : > { %732 = vmatprep.mubr.bf16.mxu0 %v1793_v41  ;;  %1182 = vmatprep.mubr.bf16.mxu1 %v1795_v42  ;;  %v858_v42 = vld [vmem:[#allocation3 + $0x20] sm:$0xff] }
  0x85   : > { %733 = vmatmul.mubr.bf16.gmra.mxu0 %v1797_v43  ;;  %1183 = vmatmul.mubr.bf16.gmra.mxu1 %v1798_v44 }
  0x86   : > { %740 = vmatprep.mubr.bf16.mxu0 %v1799_v45  ;;  %1190 = vmatprep.mubr.bf16.mxu1 %v1801_v46 }
  0x8d   : > { %741 = vmatmul.mubr.bf16.gmra.mxu0 %v1803_v47  ;;  %1191 = vmatmul.mubr.bf16.gmra.mxu1 %v1804_v48  ;;  %v409_v47 = vld [vmem:[#allocation2 + $0x28] sm:$0xff] }
  0x8e   : > { %748 = vmatprep.mubr.bf16.mxu0 %v1805_v49  ;;  %1198 = vmatprep.mubr.bf16.mxu1 %v1807_v50 }
  0x95   : > { %749 = vmatmul.mubr.bf16.gmra.mxu0 %v1809_v51  ;;  %1199 = vmatmul.mubr.bf16.gmra.mxu1 %v1810_v52  ;;  %v859_v52 = vld [vmem:[#allocation3 + $0x28] sm:$0xff] }
  0x96   : > { %756 = vmatprep.mubr.bf16.mxu0 %v1811_v53  ;;  %1206 = vmatprep.mubr.bf16.mxu1 %v1813_v54 }
  0x9d   : > { %757 = vmatmul.mubr.bf16.gmra.mxu0 %v1815_v55  ;;  %1207 = vmatmul.mubr.bf16.gmra.mxu1 %v1816_v56 }
  0x9e   : > { %764 = vmatprep.mubr.bf16.mxu0 %v1817_v57  ;;  %1214 = vmatprep.mubr.bf16.mxu1 %v1819_v58  ;;  %v410_v57 = vld [vmem:[#allocation2 + $0x30] sm:$0xff] }
  0xa5   : > { %765 = vmatmul.mubr.bf16.gmra.mxu0 %v1821_v59  ;;  %1215 = vmatmul.mubr.bf16.gmra.mxu1 %v1822_v60 }
  0xa6   : > { %772 = vmatprep.mubr.bf16.mxu0 %v1823_v61  ;;  %1222 = vmatprep.mubr.bf16.mxu1 %v1825_v62  ;;  %v860_v62 = vld [vmem:[#allocation3 + $0x30] sm:$0xff] }
  0xad   : > { %773 = vmatmul.mubr.bf16.gmra.mxu0 %v1827_v63  ;;  %1223 = vmatmul.mubr.bf16.gmra.mxu1 %v1828_v0 }
  0xae   : > { %780 = vmatprep.mubr.bf16.mxu0 %v1829_v1  ;;  %1230 = vmatprep.mubr.bf16.mxu1 %v1831_v2 }
  0xb5   : > { %781 = vmatmul.mubr.bf16.gmra.mxu0 %v1833_v3  ;;  %1231 = vmatmul.mubr.bf16.gmra.mxu1 %v1834_v4  ;;  %v411_v3 = vld [vmem:[#allocation2 + $0x38] sm:$0xff] }
  0xfd   : > { %v662_v7 = vpop.f32.mrf.mxu0  ;;  %v1112_v8 = vpop.f32.mrf.mxu1 }
  0xfe   : > { %v789_v9 = vadd.f32 %v662_v7, %v404_v5  ;;  %v1239_v10 = vadd.f32 %v1112_v8, %v854_v6  ;;  %v861_v8 = vld [vmem:[#allocation3 + $0x38] sm:$0xff] }
  0xff   : > { %v664_v11 = vpop.f32.mrf.mxu0  ;;  %v1114_v12 = vpop.f32.mrf.mxu1 }
 0x100   : > { %822 = vst.msk [vmem:[#allocation2] sm:$0xff] %vm333_vm0, %v789_v9  ;;  %1271 = vst.msk [vmem:[#allocation3] sm:$0xff] %vm333_vm0, %v1239_v10 }
 0x101   : > { %v665_v15 = vpop.f32.mrf.mxu0  ;;  %v1115_v16 = vpop.f32.mrf.mxu1 }
 0x102   : > { %v790_v17 = vadd.f32 %v665_v15, %v405_v13  ;;  %v1240_v18 = vadd.f32 %v1115_v16, %v855_v14  ;;  %v412_v13 = vld [vmem:[#allocation2 + $0x40] sm:$0xff] }
 0x103   : > { %v667_v19 = vpop.f32.mrf.mxu0  ;;  %v1117_v20 = vpop.f32.mrf.mxu1 }
 0x104   : > { %823 = vst.msk [vmem:[#allocation2 + $0x8] sm:$0xff] %vm333_vm0, %v790_v17  ;;  %1272 = vst.msk [vmem:[#allocation3 + $0x8] sm:$0xff] %vm333_vm0, %v1240_v18  ;;  %v862_v18 = vld [vmem:[#allocation3 + $0x40] sm:$0xff] }
 0x105   : > { %v670_v23 = vpop.f32.mrf.mxu0  ;;  %v1120_v24 = vpop.f32.mrf.mxu1 }
 0x106   : > { %v791_v25 = vadd.f32 %v670_v23, %v406_v21  ;;  %v1241_v26 = vadd.f32 %v1120_v24, %v856_v22  ;;  %v413_v23 = vld [vmem:[#allocation2 + $0x48] sm:$0xff] }
 0x107   : > { %v1306_v28 = vld [vmem:[#allocation2] sm:$0xff]  ;;  %v672_v30 = vpop.f32.mrf.mxu0  ;;  %v1122_v31 = vpop.f32.mrf.mxu1 }
 0x108   : > { %v1370_v29 = vld [vmem:[#allocation3] sm:$0xff]  ;;  %1338 = vst.msk [vmem:[%s2158_s20] sm:$0xff] %vm333_vm0, %v1306_v28  ;;  %824 = vst.msk [vmem:[#allocation2 + $0x10] sm:$0xff] %vm333_vm0, %v791_v25  ;;  %v863_v28 = vld [vmem:[#allocation3 + $0x48] sm:$0xff] }
 0x109   : > { %1402 = vst.msk [vmem:[%s2163_s15] sm:$0xff] %vm333_vm0, %v1370_v29  ;;  %1273 = vst.msk [vmem:[#allocation3 + $0x10] sm:$0xff] %vm333_vm0, %v1241_v26  ;;  %v673_v33 = vpop.f32.mrf.mxu0  ;;  %v1123_v34 = vpop.f32.mrf.mxu1 }
 0x10a   : > { %v792_v35 = vadd.f32 %v673_v33, %v407_v27  ;;  %v1242_v36 = vadd.f32 %v1123_v34, %v857_v32  ;;  %v414_v33 = vld [vmem:[#allocation2 + $0x50] sm:$0xff] }
 0x10b   : > { %v1307_v38 = vld [vmem:[#allocation2 + $0x8] sm:$0xff]  ;;  %v675_v40 = vpop.f32.mrf.mxu0  ;;  %v1125_v41 = vpop.f32.mrf.mxu1 }
 0x10c   : > { %v1371_v39 = vld [vmem:[#allocation3 + $0x8] sm:$0xff]  ;;  %1339 = vst.msk [vmem:[%s2158_s20 + $0x8] sm:$0xff] %vm333_vm0, %v1307_v38  ;;  %825 = vst.msk [vmem:[#allocation2 + $0x18] sm:$0xff] %vm333_vm0, %v792_v35  ;;  %v864_v38 = vld [vmem:[#allocation3 + $0x50] sm:$0xff] }
 0x10d   : > { %1403 = vst.msk [vmem:[%s2163_s15 + $0x8] sm:$0xff] %vm333_vm0, %v1371_v39  ;;  %1274 = vst.msk [vmem:[#allocation3 + $0x18] sm:$0xff] %vm333_vm0, %v1242_v36  ;;  %v678_v43 = vpop.f32.mrf.mxu0  ;;  %v1128_v44 = vpop.f32.mrf.mxu1 }
 0x10e   : > { %v793_v45 = vadd.f32 %v678_v43, %v408_v37  ;;  %v1243_v46 = vadd.f32 %v1128_v44, %v858_v42  ;;  %v415_v43 = vld [vmem:[#allocation2 + $0x58] sm:$0xff] }
 0x10f   : > { %v1308_v48 = vld [vmem:[#allocation2 + $0x10] sm:$0xff]  ;;  %v680_v50 = vpop.f32.mrf.mxu0  ;;  %v1130_v51 = vpop.f32.mrf.mxu1 }
 0x110   : > { %v1372_v49 = vld [vmem:[#allocation3 + $0x10] sm:$0xff]  ;;  %1340 = vst.msk [vmem:[%s2158_s20 + $0x10] sm:$0xff] %vm333_vm0, %v1308_v48  ;;  %826 = vst.msk [vmem:[#allocation2 + $0x20] sm:$0xff] %vm333_vm0, %v793_v45  ;;  %v865_v48 = vld [vmem:[#allocation3 + $0x58] sm:$0xff] }
 0x111   : > { %1404 = vst.msk [vmem:[%s2163_s15 + $0x10] sm:$0xff] %vm333_vm0, %v1372_v49  ;;  %1275 = vst.msk [vmem:[#allocation3 + $0x20] sm:$0xff] %vm333_vm0, %v1243_v46  ;;  %v681_v53 = vpop.f32.mrf.mxu0  ;;  %v1131_v54 = vpop.f32.mrf.mxu1 }
 0x112   : > { %v794_v55 = vadd.f32 %v681_v53, %v409_v47  ;;  %v1244_v56 = vadd.f32 %v1131_v54, %v859_v52  ;;  %v416_v53 = vld [vmem:[#allocation2 + $0x60] sm:$0xff] }
 0x113   : > { %v1309_v58 = vld [vmem:[#allocation2 + $0x18] sm:$0xff]  ;;  %v683_v60 = vpop.f32.mrf.mxu0  ;;  %v1133_v61 = vpop.f32.mrf.mxu1 }
 0x114   : > { %v1373_v59 = vld [vmem:[#allocation3 + $0x18] sm:$0xff]  ;;  %1341 = vst.msk [vmem:[%s2158_s20 + $0x18] sm:$0xff] %vm333_vm0, %v1309_v58  ;;  %827 = vst.msk [vmem:[#allocation2 + $0x28] sm:$0xff] %vm333_vm0, %v794_v55  ;;  %v866_v58 = vld [vmem:[#allocation3 + $0x60] sm:$0xff] }
 0x115   : > { %1405 = vst.msk [vmem:[%s2163_s15 + $0x18] sm:$0xff] %vm333_vm0, %v1373_v59  ;;  %1276 = vst.msk [vmem:[#allocation3 + $0x28] sm:$0xff] %vm333_vm0, %v1244_v56  ;;  %v686_v63 = vpop.f32.mrf.mxu0  ;;  %v1136_v0 = vpop.f32.mrf.mxu1 }
 0x116   : > { %v795_v1 = vadd.f32 %v686_v63, %v410_v57  ;;  %v1245_v2 = vadd.f32 %v1136_v0, %v860_v62  ;;  %v417_v63 = vld [vmem:[#allocation2 + $0x68] sm:$0xff] }
 0x117   : > { %v1310_v4 = vld [vmem:[#allocation2 + $0x20] sm:$0xff]  ;;  %v688_v6 = vpop.f32.mrf.mxu0  ;;  %v1138_v7 = vpop.f32.mrf.mxu1 }
 0x118   : > { %v1374_v5 = vld [vmem:[#allocation3 + $0x20] sm:$0xff]  ;;  %1342 = vst.msk [vmem:[%s2158_s20 + $0x20] sm:$0xff] %vm333_vm0, %v1310_v4  ;;  %828 = vst.msk [vmem:[#allocation2 + $0x30] sm:$0xff] %vm333_vm0, %v795_v1  ;;  %v867_v4 = vld [vmem:[#allocation3 + $0x68] sm:$0xff] }
 0x119   : > { %1406 = vst.msk [vmem:[%s2163_s15 + $0x20] sm:$0xff] %vm333_vm0, %v1374_v5  ;;  %1277 = vst.msk [vmem:[#allocation3 + $0x30] sm:$0xff] %vm333_vm0, %v1245_v2  ;;  %v689_v9 = vpop.f32.mrf.mxu0  ;;  %v1139_v10 = vpop.f32.mrf.mxu1 }
 0x11a   : > { %v796_v11 = vadd.f32 %v689_v9, %v411_v3  ;;  %v1246_v12 = vadd.f32 %v1139_v10, %v861_v8  ;;  %v418_v9 = vld [vmem:[#allocation2 + $0x70] sm:$0xff] }
 0x11b   : > { %v1311_v14 = vld [vmem:[#allocation2 + $0x28] sm:$0xff]  ;;  %v691_v16 = vpop.f32.mrf.mxu0  ;;  %v1141_v17 = vpop.f32.mrf.mxu1 }
 0x11c   : > { %v1375_v15 = vld [vmem:[#allocation3 + $0x28] sm:$0xff]  ;;  %1343 = vst.msk [vmem:[%s2158_s20 + $0x28] sm:$0xff] %vm333_vm0, %v1311_v14  ;;  %829 = vst.msk [vmem:[#allocation2 + $0x38] sm:$0xff] %vm333_vm0, %v796_v11  ;;  %v868_v14 = vld [vmem:[#allocation3 + $0x70] sm:$0xff] }
 0x11d   : > { %1407 = vst.msk [vmem:[%s2163_s15 + $0x28] sm:$0xff] %vm333_vm0, %v1375_v15  ;;  %1278 = vst.msk [vmem:[#allocation3 + $0x38] sm:$0xff] %vm333_vm0, %v1246_v12  ;;  %v694_v19 = vpop.f32.mrf.mxu0  ;;  %v1144_v20 = vpop.f32.mrf.mxu1 }
 0x11e   : > { %v797_v21 = vadd.f32 %v694_v19, %v412_v13  ;;  %v1247_v22 = vadd.f32 %v1144_v20, %v862_v18  ;;  %v419_v19 = vld [vmem:[#allocation2 + $0x78] sm:$0xff] }
 0x11f   : > { %v1312_v24 = vld [vmem:[#allocation2 + $0x30] sm:$0xff]  ;;  %v696_v26 = vpop.f32.mrf.mxu0  ;;  %v1146_v27 = vpop.f32.mrf.mxu1 }
 0x120   : > { %v1376_v25 = vld [vmem:[#allocation3 + $0x30] sm:$0xff]  ;;  %1344 = vst.msk [vmem:[%s2158_s20 + $0x30] sm:$0xff] %vm333_vm0, %v1312_v24  ;;  %830 = vst.msk [vmem:[#allocation2 + $0x40] sm:$0xff] %vm333_vm0, %v797_v21  ;;  %v869_v24 = vld [vmem:[#allocation3 + $0x78] sm:$0xff] }
 0x121   : > { %1408 = vst.msk [vmem:[%s2163_s15 + $0x30] sm:$0xff] %vm333_vm0, %v1376_v25  ;;  %1279 = vst.msk [vmem:[#allocation3 + $0x40] sm:$0xff] %vm333_vm0, %v1247_v22  ;;  %v697_v29 = vpop.f32.mrf.mxu0  ;;  %v1147_v30 = vpop.f32.mrf.mxu1 }
 0x122   : > { %v798_v31 = vadd.f32 %v697_v29, %v413_v23  ;;  %v1248_v32 = vadd.f32 %v1147_v30, %v863_v28  ;;  %v420_v29 = vld [vmem:[#allocation2 + $0x80] sm:$0xff] }
 0x123   : > { %v1313_v34 = vld [vmem:[#allocation2 + $0x38] sm:$0xff]  ;;  %v699_v36 = vpop.f32.mrf.mxu0  ;;  %v1149_v37 = vpop.f32.mrf.mxu1 }
 0x124   : > { %v1377_v35 = vld [vmem:[#allocation3 + $0x38] sm:$0xff]  ;;  %1345 = vst.msk [vmem:[%s2158_s20 + $0x38] sm:$0xff] %vm333_vm0, %v1313_v34  ;;  %831 = vst.msk [vmem:[#allocation2 + $0x48] sm:$0xff] %vm333_vm0, %v798_v31  ;;  %v870_v34 = vld [vmem:[#allocation3 + $0x80] sm:$0xff] }
 0x125   : > { %1409 = vst.msk [vmem:[%s2163_s15 + $0x38] sm:$0xff] %vm333_vm0, %v1377_v35  ;;  %1280 = vst.msk [vmem:[#allocation3 + $0x48] sm:$0xff] %vm333_vm0, %v1248_v32  ;;  %v702_v39 = vpop.f32.mrf.mxu0  ;;  %v1152_v40 = vpop.f32.mrf.mxu1 }
 0x126   : > { %v799_v41 = vadd.f32 %v702_v39, %v414_v33  ;;  %v1249_v42 = vadd.f32 %v1152_v40, %v864_v38  ;;  %v421_v39 = vld [vmem:[#allocation2 + $0x88] sm:$0xff] }
 0x127   : > { %v1314_v44 = vld [vmem:[#allocation2 + $0x40] sm:$0xff]  ;;  %v704_v46 = vpop.f32.mrf.mxu0  ;;  %v1154_v47 = vpop.f32.mrf.mxu1 }
 0x128   : > { %v1378_v45 = vld [vmem:[#allocation3 + $0x40] sm:$0xff]  ;;  %1346 = vst.msk [vmem:[%s2158_s20 + $0x40] sm:$0xff] %vm333_vm0, %v1314_v44  ;;  %832 = vst.msk [vmem:[#allocation2 + $0x50] sm:$0xff] %vm333_vm0, %v799_v41  ;;  %v871_v44 = vld [vmem:[#allocation3 + $0x88] sm:$0xff] }
 0x129   : > { %1410 = vst.msk [vmem:[%s2163_s15 + $0x40] sm:$0xff] %vm333_vm0, %v1378_v45  ;;  %1281 = vst.msk [vmem:[#allocation3 + $0x50] sm:$0xff] %vm333_vm0, %v1249_v42  ;;  %v705_v49 = vpop.f32.mrf.mxu0  ;;  %v1155_v50 = vpop.f32.mrf.mxu1 }
 0x12a   : > { %v800_v51 = vadd.f32 %v705_v49, %v415_v43  ;;  %v1250_v52 = vadd.f32 %v1155_v50, %v865_v48  ;;  %v422_v49 = vld [vmem:[#allocation2 + $0x90] sm:$0xff] }
 0x12b   : > { %v1315_v54 = vld [vmem:[#allocation2 + $0x48] sm:$0xff]  ;;  %v707_v56 = vpop.f32.mrf.mxu0  ;;  %v1157_v57 = vpop.f32.mrf.mxu1 }
 0x12c   : > { %v1379_v55 = vld [vmem:[#allocation3 + $0x48] sm:$0xff]  ;;  %1347 = vst.msk [vmem:[%s2158_s20 + $0x48] sm:$0xff] %vm333_vm0, %v1315_v54  ;;  %833 = vst.msk [vmem:[#allocation2 + $0x58] sm:$0xff] %vm333_vm0, %v800_v51  ;;  %v872_v54 = vld [vmem:[#allocation3 + $0x90] sm:$0xff] }
 0x12d   : > { %1411 = vst.msk [vmem:[%s2163_s15 + $0x48] sm:$0xff] %vm333_vm0, %v1379_v55  ;;  %1282 = vst.msk [vmem:[#allocation3 + $0x58] sm:$0xff] %vm333_vm0, %v1250_v52  ;;  %v710_v59 = vpop.f32.mrf.mxu0  ;;  %v1160_v60 = vpop.f32.mrf.mxu1 }
 0x12e   : > { %v801_v61 = vadd.f32 %v710_v59, %v416_v53  ;;  %v1251_v62 = vadd.f32 %v1160_v60, %v866_v58  ;;  %v423_v59 = vld [vmem:[#allocation2 + $0x98] sm:$0xff] }
 0x12f   : > { %v1316_v0 = vld [vmem:[#allocation2 + $0x50] sm:$0xff]  ;;  %v712_v2 = vpop.f32.mrf.mxu0  ;;  %v1162_v3 = vpop.f32.mrf.mxu1 }
 0x130   : > { %v1380_v1 = vld [vmem:[#allocation3 + $0x50] sm:$0xff]  ;;  %1348 = vst.msk [vmem:[%s2158_s20 + $0x50] sm:$0xff] %vm333_vm0, %v1316_v0  ;;  %834 = vst.msk [vmem:[#allocation2 + $0x60] sm:$0xff] %vm333_vm0, %v801_v61  ;;  %v873_v0 = vld [vmem:[#allocation3 + $0x98] sm:$0xff] }
 0x131   : > { %1412 = vst.msk [vmem:[%s2163_s15 + $0x50] sm:$0xff] %vm333_vm0, %v1380_v1  ;;  %1283 = vst.msk [vmem:[#allocation3 + $0x60] sm:$0xff] %vm333_vm0, %v1251_v62  ;;  %v713_v5 = vpop.f32.mrf.mxu0  ;;  %v1163_v6 = vpop.f32.mrf.mxu1 }
 0x132   : > { %v802_v7 = vadd.f32 %v713_v5, %v417_v63  ;;  %v1252_v8 = vadd.f32 %v1163_v6, %v867_v4  ;;  %v424_v5 = vld [vmem:[#allocation2 + $0xa0] sm:$0xff] }
 0x133   : > { %v1317_v10 = vld [vmem:[#allocation2 + $0x58] sm:$0xff]  ;;  %v715_v12 = vpop.f32.mrf.mxu0  ;;  %v1165_v13 = vpop.f32.mrf.mxu1 }
 0x134   : > { %v1381_v11 = vld [vmem:[#allocation3 + $0x58] sm:$0xff]  ;;  %1349 = vst.msk [vmem:[%s2158_s20 + $0x58] sm:$0xff] %vm333_vm0, %v1317_v10  ;;  %835 = vst.msk [vmem:[#allocation2 + $0x68] sm:$0xff] %vm333_vm0, %v802_v7  ;;  %v874_v10 = vld [vmem:[#allocation3 + $0xa0] sm:$0xff] }
 0x135   : > { %1413 = vst.msk [vmem:[%s2163_s15 + $0x58] sm:$0xff] %vm333_vm0, %v1381_v11  ;;  %1284 = vst.msk [vmem:[#allocation3 + $0x68] sm:$0xff] %vm333_vm0, %v1252_v8  ;;  %v718_v15 = vpop.f32.mrf.mxu0  ;;  %v1168_v16 = vpop.f32.mrf.mxu1 }
 0x136   : > { %v803_v17 = vadd.f32 %v718_v15, %v418_v9  ;;  %v1253_v18 = vadd.f32 %v1168_v16, %v868_v14  ;;  %v425_v15 = vld [vmem:[#allocation2 + $0xa8] sm:$0xff] }
 0x137   : > { %v1318_v20 = vld [vmem:[#allocation2 + $0x60] sm:$0xff]  ;;  %v720_v22 = vpop.f32.mrf.mxu0  ;;  %v1170_v23 = vpop.f32.mrf.mxu1 }
 0x138   : > { %v1382_v21 = vld [vmem:[#allocation3 + $0x60] sm:$0xff]  ;;  %1350 = vst.msk [vmem:[%s2158_s20 + $0x60] sm:$0xff] %vm333_vm0, %v1318_v20  ;;  %836 = vst.msk [vmem:[#allocation2 + $0x70] sm:$0xff] %vm333_vm0, %v803_v17  ;;  %v875_v20 = vld [vmem:[#allocation3 + $0xa8] sm:$0xff] }
 0x139   : > { %1414 = vst.msk [vmem:[%s2163_s15 + $0x60] sm:$0xff] %vm333_vm0, %v1382_v21  ;;  %1285 = vst.msk [vmem:[#allocation3 + $0x70] sm:$0xff] %vm333_vm0, %v1253_v18  ;;  %v721_v25 = vpop.f32.mrf.mxu0  ;;  %v1171_v26 = vpop.f32.mrf.mxu1 }
 0x13a   : > { %v804_v27 = vadd.f32 %v721_v25, %v419_v19  ;;  %v1254_v28 = vadd.f32 %v1171_v26, %v869_v24  ;;  %v426_v25 = vld [vmem:[#allocation2 + $0xb0] sm:$0xff] }
 0x13b   : > { %v1319_v30 = vld [vmem:[#allocation2 + $0x68] sm:$0xff]  ;;  %v723_v32 = vpop.f32.mrf.mxu0  ;;  %v1173_v33 = vpop.f32.mrf.mxu1 }
 0x13c   : > { %v1383_v31 = vld [vmem:[#allocation3 + $0x68] sm:$0xff]  ;;  %1351 = vst.msk [vmem:[%s2158_s20 + $0x68] sm:$0xff] %vm333_vm0, %v1319_v30  ;;  %837 = vst.msk [vmem:[#allocation2 + $0x78] sm:$0xff] %vm333_vm0, %v804_v27  ;;  %v876_v30 = vld [vmem:[#allocation3 + $0xb0] sm:$0xff] }
 0x13d   : > { %1415 = vst.msk [vmem:[%s2163_s15 + $0x68] sm:$0xff] %vm333_vm0, %v1383_v31  ;;  %1286 = vst.msk [vmem:[#allocation3 + $0x78] sm:$0xff] %vm333_vm0, %v1254_v28  ;;  %v726_v35 = vpop.f32.mrf.mxu0  ;;  %v1176_v36 = vpop.f32.mrf.mxu1 }
 0x13e   : > { %v805_v37 = vadd.f32 %v726_v35, %v420_v29  ;;  %v1255_v38 = vadd.f32 %v1176_v36, %v870_v34  ;;  %v427_v35 = vld [vmem:[#allocation2 + $0xb8] sm:$0xff] }
 0x13f   : > { %v1320_v40 = vld [vmem:[#allocation2 + $0x70] sm:$0xff]  ;;  %v728_v42 = vpop.f32.mrf.mxu0  ;;  %v1178_v43 = vpop.f32.mrf.mxu1 }
 0x140   : > { %v1384_v41 = vld [vmem:[#allocation3 + $0x70] sm:$0xff]  ;;  %1352 = vst.msk [vmem:[%s2158_s20 + $0x70] sm:$0xff] %vm333_vm0, %v1320_v40  ;;  %838 = vst.msk [vmem:[#allocation2 + $0x80] sm:$0xff] %vm333_vm0, %v805_v37  ;;  %v877_v40 = vld [vmem:[#allocation3 + $0xb8] sm:$0xff] }
 0x141   : > { %1416 = vst.msk [vmem:[%s2163_s15 + $0x70] sm:$0xff] %vm333_vm0, %v1384_v41  ;;  %1287 = vst.msk [vmem:[#allocation3 + $0x80] sm:$0xff] %vm333_vm0, %v1255_v38  ;;  %v729_v45 = vpop.f32.mrf.mxu0  ;;  %v1179_v46 = vpop.f32.mrf.mxu1 }
 0x142   : > { %v806_v47 = vadd.f32 %v729_v45, %v421_v39  ;;  %v1256_v48 = vadd.f32 %v1179_v46, %v871_v44  ;;  %v428_v45 = vld [vmem:[#allocation2 + $0xc0] sm:$0xff] }
 0x143   : > { %v1321_v50 = vld [vmem:[#allocation2 + $0x78] sm:$0xff]  ;;  %v731_v52 = vpop.f32.mrf.mxu0  ;;  %v1181_v53 = vpop.f32.mrf.mxu1 }
 0x144   : > { %v1385_v51 = vld [vmem:[#allocation3 + $0x78] sm:$0xff]  ;;  %1353 = vst.msk [vmem:[%s2158_s20 + $0x78] sm:$0xff] %vm333_vm0, %v1321_v50  ;;  %839 = vst.msk [vmem:[#allocation2 + $0x88] sm:$0xff] %vm333_vm0, %v806_v47  ;;  %v878_v50 = vld [vmem:[#allocation3 + $0xc0] sm:$0xff] }
 0x145   : > { %1417 = vst.msk [vmem:[%s2163_s15 + $0x78] sm:$0xff] %vm333_vm0, %v1385_v51  ;;  %1288 = vst.msk [vmem:[#allocation3 + $0x88] sm:$0xff] %vm333_vm0, %v1256_v48  ;;  %v734_v55 = vpop.f32.mrf.mxu0  ;;  %v1184_v56 = vpop.f32.mrf.mxu1 }
 0x146   : > { %v807_v57 = vadd.f32 %v734_v55, %v422_v49  ;;  %v1257_v58 = vadd.f32 %v1184_v56, %v872_v54  ;;  %v429_v55 = vld [vmem:[#allocation2 + $0xc8] sm:$0xff] }
 0x147   : > { %v1322_v60 = vld [vmem:[#allocation2 + $0x80] sm:$0xff]  ;;  %v736_v62 = vpop.f32.mrf.mxu0  ;;  %v1186_v63 = vpop.f32.mrf.mxu1 }
 0x148   : > { %v1386_v61 = vld [vmem:[#allocation3 + $0x80] sm:$0xff]  ;;  %1354 = vst.msk [vmem:[%s2158_s20 + $0x80] sm:$0xff] %vm333_vm0, %v1322_v60  ;;  %840 = vst.msk [vmem:[#allocation2 + $0x90] sm:$0xff] %vm333_vm0, %v807_v57  ;;  %v879_v60 = vld [vmem:[#allocation3 + $0xc8] sm:$0xff] }
 0x149   : > { %1418 = vst.msk [vmem:[%s2163_s15 + $0x80] sm:$0xff] %vm333_vm0, %v1386_v61  ;;  %1289 = vst.msk [vmem:[#allocation3 + $0x90] sm:$0xff] %vm333_vm0, %v1257_v58  ;;  %v737_v1 = vpop.f32.mrf.mxu0  ;;  %v1187_v2 = vpop.f32.mrf.mxu1 }
 0x14a   : > { %v808_v3 = vadd.f32 %v737_v1, %v423_v59  ;;  %v1258_v4 = vadd.f32 %v1187_v2, %v873_v0  ;;  %v430_v1 = vld [vmem:[#allocation2 + $0xd0] sm:$0xff] }
 0x14b   : > { %v1323_v6 = vld [vmem:[#allocation2 + $0x88] sm:$0xff]  ;;  %v739_v8 = vpop.f32.mrf.mxu0  ;;  %v1189_v9 = vpop.f32.mrf.mxu1 }
 0x14c   : > { %v1387_v7 = vld [vmem:[#allocation3 + $0x88] sm:$0xff]  ;;  %1355 = vst.msk [vmem:[%s2158_s20 + $0x88] sm:$0xff] %vm333_vm0, %v1323_v6  ;;  %841 = vst.msk [vmem:[#allocation2 + $0x98] sm:$0xff] %vm333_vm0, %v808_v3  ;;  %v880_v6 = vld [vmem:[#allocation3 + $0xd0] sm:$0xff] }
 0x14d   : > { %1419 = vst.msk [vmem:[%s2163_s15 + $0x88] sm:$0xff] %vm333_vm0, %v1387_v7  ;;  %1290 = vst.msk [vmem:[#allocation3 + $0x98] sm:$0xff] %vm333_vm0, %v1258_v4  ;;  %v742_v11 = vpop.f32.mrf.mxu0  ;;  %v1192_v12 = vpop.f32.mrf.mxu1 }
 0x14e   : > { %v809_v13 = vadd.f32 %v742_v11, %v424_v5  ;;  %v1259_v14 = vadd.f32 %v1192_v12, %v874_v10  ;;  %v431_v11 = vld [vmem:[#allocation2 + $0xd8] sm:$0xff] }
 0x14f   : > { %v1324_v16 = vld [vmem:[#allocation2 + $0x90] sm:$0xff]  ;;  %v744_v18 = vpop.f32.mrf.mxu0  ;;  %v1194_v19 = vpop.f32.mrf.mxu1 }
 0x150   : > { %v1388_v17 = vld [vmem:[#allocation3 + $0x90] sm:$0xff]  ;;  %1356 = vst.msk [vmem:[%s2158_s20 + $0x90] sm:$0xff] %vm333_vm0, %v1324_v16  ;;  %842 = vst.msk [vmem:[#allocation2 + $0xa0] sm:$0xff] %vm333_vm0, %v809_v13  ;;  %v881_v16 = vld [vmem:[#allocation3 + $0xd8] sm:$0xff] }
 0x151   : > { %1420 = vst.msk [vmem:[%s2163_s15 + $0x90] sm:$0xff] %vm333_vm0, %v1388_v17  ;;  %1291 = vst.msk [vmem:[#allocation3 + $0xa0] sm:$0xff] %vm333_vm0, %v1259_v14  ;;  %v745_v21 = vpop.f32.mrf.mxu0  ;;  %v1195_v22 = vpop.f32.mrf.mxu1 }
 0x152   : > { %v810_v23 = vadd.f32 %v745_v21, %v425_v15  ;;  %v1260_v24 = vadd.f32 %v1195_v22, %v875_v20  ;;  %v432_v21 = vld [vmem:[#allocation2 + $0xe0] sm:$0xff] }
 0x153   : > { %v1325_v26 = vld [vmem:[#allocation2 + $0x98] sm:$0xff]  ;;  %v747_v28 = vpop.f32.mrf.mxu0  ;;  %v1197_v29 = vpop.f32.mrf.mxu1 }
 0x154   : > { %v1389_v27 = vld [vmem:[#allocation3 + $0x98] sm:$0xff]  ;;  %1357 = vst.msk [vmem:[%s2158_s20 + $0x98] sm:$0xff] %vm333_vm0, %v1325_v26  ;;  %843 = vst.msk [vmem:[#allocation2 + $0xa8] sm:$0xff] %vm333_vm0, %v810_v23  ;;  %v882_v26 = vld [vmem:[#allocation3 + $0xe0] sm:$0xff] }
 0x155   : > { %1421 = vst.msk [vmem:[%s2163_s15 + $0x98] sm:$0xff] %vm333_vm0, %v1389_v27  ;;  %1292 = vst.msk [vmem:[#allocation3 + $0xa8] sm:$0xff] %vm333_vm0, %v1260_v24  ;;  %v750_v31 = vpop.f32.mrf.mxu0  ;;  %v1200_v32 = vpop.f32.mrf.mxu1 }
 0x156   : > { %v811_v33 = vadd.f32 %v750_v31, %v426_v25  ;;  %v1261_v34 = vadd.f32 %v1200_v32, %v876_v30  ;;  %v433_v31 = vld [vmem:[#allocation2 + $0xe8] sm:$0xff] }
 0x157   : > { %v1326_v36 = vld [vmem:[#allocation2 + $0xa0] sm:$0xff]  ;;  %v752_v38 = vpop.f32.mrf.mxu0  ;;  %v1202_v39 = vpop.f32.mrf.mxu1 }
 0x158   : > { %v1390_v37 = vld [vmem:[#allocation3 + $0xa0] sm:$0xff]  ;;  %1358 = vst.msk [vmem:[%s2158_s20 + $0xa0] sm:$0xff] %vm333_vm0, %v1326_v36  ;;  %844 = vst.msk [vmem:[#allocation2 + $0xb0] sm:$0xff] %vm333_vm0, %v811_v33  ;;  %v883_v36 = vld [vmem:[#allocation3 + $0xe8] sm:$0xff] }
 0x159   : > { %1422 = vst.msk [vmem:[%s2163_s15 + $0xa0] sm:$0xff] %vm333_vm0, %v1390_v37  ;;  %1293 = vst.msk [vmem:[#allocation3 + $0xb0] sm:$0xff] %vm333_vm0, %v1261_v34  ;;  %v753_v41 = vpop.f32.mrf.mxu0  ;;  %v1203_v42 = vpop.f32.mrf.mxu1 }
 0x15a   : > { %v812_v43 = vadd.f32 %v753_v41, %v427_v35  ;;  %v1262_v44 = vadd.f32 %v1203_v42, %v877_v40  ;;  %v434_v41 = vld [vmem:[#allocation2 + $0xf0] sm:$0xff] }
 0x15b   : > { %v1327_v46 = vld [vmem:[#allocation2 + $0xa8] sm:$0xff]  ;;  %v755_v48 = vpop.f32.mrf.mxu0  ;;  %v1205_v49 = vpop.f32.mrf.mxu1 }
 0x15c   : > { %v1391_v47 = vld [vmem:[#allocation3 + $0xa8] sm:$0xff]  ;;  %1359 = vst.msk [vmem:[%s2158_s20 + $0xa8] sm:$0xff] %vm333_vm0, %v1327_v46  ;;  %845 = vst.msk [vmem:[#allocation2 + $0xb8] sm:$0xff] %vm333_vm0, %v812_v43  ;;  %v884_v46 = vld [vmem:[#allocation3 + $0xf0] sm:$0xff] }
 0x15d   : > { %1423 = vst.msk [vmem:[%s2163_s15 + $0xa8] sm:$0xff] %vm333_vm0, %v1391_v47  ;;  %1294 = vst.msk [vmem:[#allocation3 + $0xb8] sm:$0xff] %vm333_vm0, %v1262_v44  ;;  %v758_v51 = vpop.f32.mrf.mxu0  ;;  %v1208_v52 = vpop.f32.mrf.mxu1 }
 0x15e   : > { %v813_v53 = vadd.f32 %v758_v51, %v428_v45  ;;  %v1263_v54 = vadd.f32 %v1208_v52, %v878_v50  ;;  %v435_v51 = vld [vmem:[#allocation2 + $0xf8] sm:$0xff] }
 0x15f   : > { %v1328_v56 = vld [vmem:[#allocation2 + $0xb0] sm:$0xff]  ;;  %v760_v58 = vpop.f32.mrf.mxu0  ;;  %v1210_v59 = vpop.f32.mrf.mxu1 }
 0x160   : > { %v1392_v57 = vld [vmem:[#allocation3 + $0xb0] sm:$0xff]  ;;  %1360 = vst.msk [vmem:[%s2158_s20 + $0xb0] sm:$0xff] %vm333_vm0, %v1328_v56  ;;  %846 = vst.msk [vmem:[#allocation2 + $0xc0] sm:$0xff] %vm333_vm0, %v813_v53  ;;  %v885_v56 = vld [vmem:[#allocation3 + $0xf8] sm:$0xff] }
 0x161   : > { %1424 = vst.msk [vmem:[%s2163_s15 + $0xb0] sm:$0xff] %vm333_vm0, %v1392_v57  ;;  %1295 = vst.msk [vmem:[#allocation3 + $0xc0] sm:$0xff] %vm333_vm0, %v1263_v54  ;;  %v761_v61 = vpop.f32.mrf.mxu0  ;;  %v1211_v62 = vpop.f32.mrf.mxu1 }
 0x162   : > { %v814_v63 = vadd.f32 %v761_v61, %v429_v55  ;;  %v1264_v0 = vadd.f32 %v1211_v62, %v879_v60 }
 0x163   : > { %v1329_v2 = vld [vmem:[#allocation2 + $0xb8] sm:$0xff]  ;;  %v763_v4 = vpop.f32.mrf.mxu0  ;;  %v1213_v5 = vpop.f32.mrf.mxu1 }
 0x164   : > { %v1393_v3 = vld [vmem:[#allocation3 + $0xb8] sm:$0xff]  ;;  %1361 = vst.msk [vmem:[%s2158_s20 + $0xb8] sm:$0xff] %vm333_vm0, %v1329_v2  ;;  %847 = vst.msk [vmem:[#allocation2 + $0xc8] sm:$0xff] %vm333_vm0, %v814_v63 }
 0x165   : > { %1425 = vst.msk [vmem:[%s2163_s15 + $0xb8] sm:$0xff] %vm333_vm0, %v1393_v3  ;;  %1296 = vst.msk [vmem:[#allocation3 + $0xc8] sm:$0xff] %vm333_vm0, %v1264_v0  ;;  %v766_v7 = vpop.f32.mrf.mxu0  ;;  %v1216_v8 = vpop.f32.mrf.mxu1 }
 0x166   : > { %v815_v9 = vadd.f32 %v766_v7, %v430_v1  ;;  %v1265_v10 = vadd.f32 %v1216_v8, %v880_v6 }
 0x167   : > { %v1330_v12 = vld [vmem:[#allocation2 + $0xc0] sm:$0xff]  ;;  %v768_v14 = vpop.f32.mrf.mxu0  ;;  %v1218_v15 = vpop.f32.mrf.mxu1 }
 0x168   : > { %v1394_v13 = vld [vmem:[#allocation3 + $0xc0] sm:$0xff]  ;;  %1362 = vst.msk [vmem:[%s2158_s20 + $0xc0] sm:$0xff] %vm333_vm0, %v1330_v12  ;;  %848 = vst.msk [vmem:[#allocation2 + $0xd0] sm:$0xff] %vm333_vm0, %v815_v9 }
 0x169   : > { %1426 = vst.msk [vmem:[%s2163_s15 + $0xc0] sm:$0xff] %vm333_vm0, %v1394_v13  ;;  %1297 = vst.msk [vmem:[#allocation3 + $0xd0] sm:$0xff] %vm333_vm0, %v1265_v10  ;;  %v769_v17 = vpop.f32.mrf.mxu0  ;;  %v1219_v18 = vpop.f32.mrf.mxu1 }
 0x16a   : > { %v816_v19 = vadd.f32 %v769_v17, %v431_v11  ;;  %v1266_v20 = vadd.f32 %v1219_v18, %v881_v16 }
 0x16b   : > { %v1331_v22 = vld [vmem:[#allocation2 + $0xc8] sm:$0xff]  ;;  %v771_v24 = vpop.f32.mrf.mxu0  ;;  %v1221_v25 = vpop.f32.mrf.mxu1 }
 0x16c   : > { %v1395_v23 = vld [vmem:[#allocation3 + $0xc8] sm:$0xff]  ;;  %1363 = vst.msk [vmem:[%s2158_s20 + $0xc8] sm:$0xff] %vm333_vm0, %v1331_v22  ;;  %849 = vst.msk [vmem:[#allocation2 + $0xd8] sm:$0xff] %vm333_vm0, %v816_v19 }
 0x16d   : > { %1427 = vst.msk [vmem:[%s2163_s15 + $0xc8] sm:$0xff] %vm333_vm0, %v1395_v23  ;;  %1298 = vst.msk [vmem:[#allocation3 + $0xd8] sm:$0xff] %vm333_vm0, %v1266_v20  ;;  %v774_v27 = vpop.f32.mrf.mxu0  ;;  %v1224_v28 = vpop.f32.mrf.mxu1 }
 0x16e   : > { %v817_v29 = vadd.f32 %v774_v27, %v432_v21  ;;  %v1267_v30 = vadd.f32 %v1224_v28, %v882_v26 }
 0x16f   : > { %v1332_v32 = vld [vmem:[#allocation2 + $0xd0] sm:$0xff]  ;;  %v776_v34 = vpop.f32.mrf.mxu0  ;;  %v1226_v35 = vpop.f32.mrf.mxu1 }
 0x170   : > { %v1396_v33 = vld [vmem:[#allocation3 + $0xd0] sm:$0xff]  ;;  %1364 = vst.msk [vmem:[%s2158_s20 + $0xd0] sm:$0xff] %vm333_vm0, %v1332_v32  ;;  %850 = vst.msk [vmem:[#allocation2 + $0xe0] sm:$0xff] %vm333_vm0, %v817_v29 }
 0x171   : > { %1428 = vst.msk [vmem:[%s2163_s15 + $0xd0] sm:$0xff] %vm333_vm0, %v1396_v33  ;;  %1299 = vst.msk [vmem:[#allocation3 + $0xe0] sm:$0xff] %vm333_vm0, %v1267_v30  ;;  %v777_v37 = vpop.f32.mrf.mxu0  ;;  %v1227_v38 = vpop.f32.mrf.mxu1 }
 0x172   : > { %v818_v39 = vadd.f32 %v777_v37, %v433_v31  ;;  %v1268_v40 = vadd.f32 %v1227_v38, %v883_v36 }
 0x173   : > { %v1333_v42 = vld [vmem:[#allocation2 + $0xd8] sm:$0xff]  ;;  %v779_v44 = vpop.f32.mrf.mxu0  ;;  %v1229_v45 = vpop.f32.mrf.mxu1 }
 0x174   : > { %v1397_v43 = vld [vmem:[#allocation3 + $0xd8] sm:$0xff]  ;;  %1365 = vst.msk [vmem:[%s2158_s20 + $0xd8] sm:$0xff] %vm333_vm0, %v1333_v42  ;;  %851 = vst.msk [vmem:[#allocation2 + $0xe8] sm:$0xff] %vm333_vm0, %v818_v39 }
 0x175   : > { %1429 = vst.msk [vmem:[%s2163_s15 + $0xd8] sm:$0xff] %vm333_vm0, %v1397_v43  ;;  %1300 = vst.msk [vmem:[#allocation3 + $0xe8] sm:$0xff] %vm333_vm0, %v1268_v40  ;;  %v782_v47 = vpop.f32.mrf.mxu0  ;;  %v1232_v48 = vpop.f32.mrf.mxu1 }
 0x176   : > { %v819_v49 = vadd.f32 %v782_v47, %v434_v41  ;;  %v1269_v50 = vadd.f32 %v1232_v48, %v884_v46 }
 0x177   : > { %v1334_v52 = vld [vmem:[#allocation2 + $0xe0] sm:$0xff]  ;;  %v784_v54 = vpop.f32.mrf.mxu0  ;;  %v1234_v55 = vpop.f32.mrf.mxu1 }
 0x178   : > { %v1398_v53 = vld [vmem:[#allocation3 + $0xe0] sm:$0xff]  ;;  %1366 = vst.msk [vmem:[%s2158_s20 + $0xe0] sm:$0xff] %vm333_vm0, %v1334_v52  ;;  %852 = vst.msk [vmem:[#allocation2 + $0xf0] sm:$0xff] %vm333_vm0, %v819_v49 }
 0x179   : > { %1430 = vst.msk [vmem:[%s2163_s15 + $0xe0] sm:$0xff] %vm333_vm0, %v1398_v53  ;;  %1301 = vst.msk [vmem:[#allocation3 + $0xf0] sm:$0xff] %vm333_vm0, %v1269_v50  ;;  %v785_v57 = vpop.f32.mrf.mxu0  ;;  %v1235_v58 = vpop.f32.mrf.mxu1 }
 0x17a   : > { %v820_v59 = vadd.f32 %v785_v57, %v435_v51  ;;  %v1270_v60 = vadd.f32 %v1235_v58, %v885_v56 }
 0x17b   : > { %v1335_v61 = vld [vmem:[#allocation2 + $0xe8] sm:$0xff]  ;;  %v787_v63 = vpop.f32.mrf.mxu0  ;;  %v1237_v0 = vpop.f32.mrf.mxu1 }
 0x17c   : > { %v1399_v62 = vld [vmem:[#allocation3 + $0xe8] sm:$0xff]  ;;  %1367 = vst.msk [vmem:[%s2158_s20 + $0xe8] sm:$0xff] %vm333_vm0, %v1335_v61  ;;  %853 = vst.msk [vmem:[#allocation2 + $0xf8] sm:$0xff] %vm333_vm0, %v820_v59 }
 0x17d   : > { %1431 = vst.msk [vmem:[%s2163_s15 + $0xe8] sm:$0xff] %vm333_vm0, %v1399_v62  ;;  %1302 = vst.msk [vmem:[#allocation3 + $0xf8] sm:$0xff] %vm333_vm0, %v1270_v60 }
 0x17f   : > { %v1336_v1 = vld [vmem:[#allocation2 + $0xf0] sm:$0xff] }
 0x180   : > { %v1400_v2 = vld [vmem:[#allocation3 + $0xf0] sm:$0xff]  ;;  %1368 = vst.msk [vmem:[%s2158_s20 + $0xf0] sm:$0xff] %vm333_vm0, %v1336_v1 }
 0x181   : > { %1432 = vst.msk [vmem:[%s2163_s15 + $0xf0] sm:$0xff] %vm333_vm0, %v1400_v2 }
 0x183   : > { %v1337_v3 = vld [vmem:[#allocation2 + $0xf8] sm:$0xff] }
 0x184   : > { %v1401_v4 = vld [vmem:[#allocation3 + $0xf8] sm:$0xff]  ;;  %1369 = vst.msk [vmem:[%s2158_s20 + $0xf8] sm:$0xff] %vm333_vm0, %v1337_v3 }
 0x185   : > { %1433 = vst.msk [vmem:[%s2163_s15 + $0xf8] sm:$0xff] %vm333_vm0, %v1401_v4 }
 0x186 PF: > { %s17_s17 = sadd.s32 1, %s1917_s17   ;;  %s2370_s15 = smov %s1913_s16 }
 0x187   : > { %p14_p3 = scmp.ge.s32.totalorder %s17_s17, 4   ;;  %s2371_s16 = smov %s2373_s19 }
 0x189   :  { %16 = sbr.rel (!%p14_p3) target bundleno = 3 (0x3), region = 93 }
 0x18e   :  { %1489 = vsyncpa [#allocation5], 1 }
 0x18f   :  { %1491 = vsyncpa [#allocation5 + $0x1], 1 }
 0x190   :  { %1492 = vsyncpa [#allocation7], 1 }

// kernel: fct_forward.6
= control target key start
LH: loop header
LB: loop body
LE: loop exit
PB: predicated region body
PF: predicated region fallthrough
CT: control target
= control target key end

     0   :  { %s2036_s21 = smov 0   ;;  %s2668_s0 = inlined_call_operand.vmem [shape: f32[3,3], index: 0, kind: input, shape index: {}]   ;;  %s2669_s1 = inlined_call_operand.vmem [shape: f32[2,256,3], index: 1, kind: input, shape index: {}]   ;;  %s2670_s2 = inlined_call_operand.vmem [shape: f32[2,256,3], index: 2, kind: input, shape index: {}]   ;;  %s2671_s3 = inlined_call_operand.vmem [shape: f32[2,256,3], index: 3, kind: input, shape index: {}]   ;;  %s2672_s4 = inlined_call_operand.vmem [shape: f32[2,256,3], index: 4, kind: input, shape index: {}]   ;;  %s2673_s5 = inlined_call_operand.vmem [shape: f32[2,256,3], index: 5, kind: output, shape index: {0}]   ;;  %s2674_s6 = inlined_call_operand.vmem [shape: f32[2,256,3], index: 6, kind: output, shape index: {1}]  }
   0x1 LB: > { %s1576_s22 = sadd.s32 4294967295, %s1999_s21   ;;  %p1580_p0 = scmp.ge.s32.totalorder %s1999_s21, 1  ;;  %s1999_s21 = sphi %s2036_s21, %s17_s21  }
   0x2   : > { %p245_p1 = scmp.lt.s32.totalorder %s1999_s21, 3 }
   0x4   : > { %p246_p2 = pnand %p1580_p0, %p245_p1 }
   0x6   : > { %249 = sbr.rel (%p246_p2) target bundleno = 780 (0x30c), region = 40 }
   0xb   : > { %p295_p3 = scmp.lt.s32.totalorder %s1576_s22, 1  ;;  %vm726_vm0 = vcmask 18432   ;;  %vm739_vm1 = vcmask 23552  }
   0xd   : > { %s2721_s22 = smov (!%p295_p3, %s1576_s22), 1 }
   0xe   : > { %s2044_s23 = sshll.u32 %s2721_s22, 8 }
   0xf   : > { %s2050_s26 = scalar_lea.vmem %s2669_s1, %s2044_s23  ;;  %s2056_s29 = scalar_lea.vmem %s2670_s2, %s2044_s23 }
  0x10   : > { %v2059_v0 = vld [vmem:[%s2050_s26 + $0x80] sm:$0xff]  ;;  %v2073_v5 = vld [vmem:[%s2050_s26 + $0x88] sm:$0xff]  ;;  %v2091_v12 = vld [vmem:[%s2050_s26 + $0x90] sm:$0xff]  ;;  %s2154_s8 = scalar_lea.vmem %s2671_s3, %s2044_s23  ;;  %s2160_s11 = scalar_lea.vmem %s2672_s4, %s2044_s23 }
  0x11   : > { %v2062_v1 = vld [vmem:[%s2056_s29 + $0x80] sm:$0xff]  ;;  %v2076_v6 = vld [vmem:[%s2056_s29 + $0x88] sm:$0xff]  ;;  %v2094_v13 = vld [vmem:[%s2056_s29 + $0x90] sm:$0xff]  ;;  %s2529_s16 = scalar_lea.vmem %s2673_s5, %s2044_s23  ;;  %s2535_s19 = scalar_lea.vmem %s2674_s6, %s2044_s23 }
  0x12   : > { %v2065_v2 = vld [vmem:[%s2050_s26] sm:$0xff]  ;;  %v1911_v3 = vpack.i.bf16 %v2062_v1, %v2059_v0  ;;  %v2081_v8 = vld [vmem:[%s2050_s26 + $0x8] sm:$0xff]  ;;  %v1913_v10 = vpack.i.bf16 %v2076_v6, %v2073_v5  ;;  %v2097_v14 = vld [vmem:[%s2050_s26 + $0x10] sm:$0xff]  ;;  %v1915_v16 = vpack.i.bf16 %v2094_v13, %v2091_v12 }
  0x13   : > { %v2070_v4 = vld [vmem:[%s2056_s29] sm:$0xff]  ;;  %v2084_v9 = vld [vmem:[%s2056_s29 + $0x8] sm:$0xff]  ;;  %v2100_v15 = vld [vmem:[%s2056_s29 + $0x10] sm:$0xff] }
  0x14   : > { %v1948_v7 = vpack.i.bf16 %v2070_v4, %v2065_v2  ;;  %1912 = vxpose.xlu0.b32.start [1/16] (narrow) %v1911_v3, 8  ;;  %v1950_v11 = vpack.i.bf16 %v2084_v9, %v2081_v8  ;;  %v1952_v17 = vpack.i.bf16 %v2100_v15, %v2097_v14  ;;  %v2107_v18 = vld [vmem:[%s2050_s26 + $0x98] sm:$0xff]  ;;  %v2123_v24 = vld [vmem:[%s2050_s26 + $0xa0] sm:$0xff]  ;;  %v2139_v30 = vld [vmem:[%s2050_s26 + $0xa8] sm:$0xff] }
  0x15   : > { %v2110_v19 = vld [vmem:[%s2056_s29 + $0x98] sm:$0xff]  ;;  %v2126_v25 = vld [vmem:[%s2056_s29 + $0xa0] sm:$0xff]  ;;  %v2142_v31 = vld [vmem:[%s2056_s29 + $0xa8] sm:$0xff] }
  0x16   : > { %1949 = vxpose.xlu1.b32.start [1/16] (narrow) %v1948_v7, 8  ;;  %v2113_v20 = vld [vmem:[%s2050_s26 + $0x18] sm:$0xff]  ;;  %v1917_v22 = vpack.i.bf16 %v2110_v19, %v2107_v18  ;;  %v2129_v26 = vld [vmem:[%s2050_s26 + $0x20] sm:$0xff]  ;;  %v1919_v28 = vpack.i.bf16 %v2126_v25, %v2123_v24  ;;  %v2145_v32 = vld [vmem:[%s2050_s26 + $0x28] sm:$0xff]  ;;  %v1921_v34 = vpack.i.bf16 %v2142_v31, %v2139_v30 }
  0x17   : > { %v2116_v21 = vld [vmem:[%s2056_s29 + $0x18] sm:$0xff]  ;;  %v2132_v27 = vld [vmem:[%s2056_s29 + $0x20] sm:$0xff]  ;;  %v2148_v33 = vld [vmem:[%s2056_s29 + $0x28] sm:$0xff] }
  0x18   : > { %1914 = vxpose.xlu0.b32.cont [2/16] (narrow) %v1913_v10, 8  ;;  %v1954_v23 = vpack.i.bf16 %v2116_v21, %v2113_v20  ;;  %v1956_v29 = vpack.i.bf16 %v2132_v27, %v2129_v26  ;;  %v1958_v35 = vpack.i.bf16 %v2148_v33, %v2145_v32  ;;  %v2167_v36 = vld [vmem:[%s2050_s26 + $0xb0] sm:$0xff]  ;;  %v421_v40 = vld [vmem:[%s2154_s8 + $0xf8] sm:$0xff]  ;;  %v419_v52 = vld [vmem:[%s2154_s8 + $0xe8] sm:$0xff] }
  0x19   : > { %v2170_v37 = vld [vmem:[%s2056_s29 + $0xb0] sm:$0xff]  ;;  %v453_v41 = vld [vmem:[%s2160_s11 + $0xf8] sm:$0xff]  ;;  %1667 = vmatprep.subr.mxu0 %v421_v40  ;;  %v451_v55 = vld [vmem:[%s2160_s11 + $0xe8] sm:$0xff] }
  0x1a   : > { %1951 = vxpose.xlu1.b32.cont [2/16] (narrow) %v1950_v11, 8  ;;  %v2173_v38 = vld [vmem:[%s2050_s26 + $0x30] sm:$0xff]  ;;  %1702 = vmatprep.subr.mxu1 %v453_v41  ;;  %v405_v42 = vld [vmem:[%s2154_s8 + $0x78] sm:$0xff]  ;;  %v1923_v45 = vpack.i.bf16 %v2170_v37, %v2167_v36  ;;  %v403_v56 = vld [vmem:[%s2154_s8 + $0x68] sm:$0xff] }
  0x1b   : > { %v2176_v39 = vld [vmem:[%s2056_s29 + $0x30] sm:$0xff]  ;;  %v437_v43 = vld [vmem:[%s2160_s11 + $0x78] sm:$0xff]  ;;  %1668 = vmatpush3.msra.mxu0 %v405_v42  ;;  %v435_v57 = vld [vmem:[%s2160_s11 + $0x68] sm:$0xff] }
  0x1c   : > { %1916 = vxpose.xlu0.b32.cont [3/16] (narrow) %v1915_v16, 8  ;;  %v420_v44 = vld [vmem:[%s2154_s8 + $0xf0] sm:$0xff]  ;;  %v1960_v49 = vpack.i.bf16 %v2176_v39, %v2173_v38  ;;  %v2191_v50 = vld [vmem:[%s2050_s26 + $0xb8] sm:$0xff]  ;;  %1703 = vmatpush3.msra.mxu1 %v437_v43  ;;  %v418_v59 = vld [vmem:[%s2154_s8 + $0xe0] sm:$0xff] }
  0x1d   : > { %v452_v46 = vld [vmem:[%s2160_s11 + $0xf0] sm:$0xff]  ;;  %v2194_v51 = vld [vmem:[%s2056_s29 + $0xb8] sm:$0xff]  ;;  %1669 = vmatprep.subr.mxu0 %v420_v44  ;;  %v450_v60 = vld [vmem:[%s2160_s11 + $0xe0] sm:$0xff] }
  0x1e   : > { %1953 = vxpose.xlu1.b32.cont [3/16] (narrow) %v1952_v17, 8  ;;  %v404_v47 = vld [vmem:[%s2154_s8 + $0x70] sm:$0xff]  ;;  %v2198_v53 = vld [vmem:[%s2050_s26 + $0x38] sm:$0xff]  ;;  %1704 = vmatprep.subr.mxu1 %v452_v46  ;;  %v1925_v58 = vpack.i.bf16 %v2194_v51, %v2191_v50  ;;  %v2213_v62 = vld [vmem:[%s2050_s26 + $0xc0] sm:$0xff] }
  0x1f   : > { %v436_v48 = vld [vmem:[%s2160_s11 + $0x70] sm:$0xff]  ;;  %v2201_v54 = vld [vmem:[%s2056_s29 + $0x38] sm:$0xff]  ;;  %1670 = vmatpush3.msra.mxu0 %v404_v47  ;;  %2690 = vst [vmem:[#allocation2_spill] sm:$0xff] %v2213_v62  ;;  %v2216_v63 = vld [vmem:[%s2056_s29 + $0xc0] sm:$0xff] }
  0x20   : > { %1918 = vxpose.xlu0.b32.cont [4/16] (narrow) %v1917_v22, 8  ;;  %1705 = vmatpush3.msra.mxu1 %v436_v48  ;;  %v1962_v61 = vpack.i.bf16 %v2201_v54, %v2198_v53  ;;  %2691 = vst [vmem:[#allocation3_spill] sm:$0xff] %v2216_v63  ;;  %v402_v3 = vld [vmem:[%s2154_s8 + $0x60] sm:$0xff]  ;;  %v417_v16 = vld [vmem:[%s2154_s8 + $0xd8] sm:$0xff]  ;;  %v1927_v22 = vpack.i.bf16 %v2216_v63, %v2213_v62  ;;  %v416_v40 = vld [vmem:[%s2154_s8 + $0xd0] sm:$0xff] }
  0x21   : > { %1671 = vmatprep.subr.mxu0 %v419_v52  ;;  %1706 = vmatprep.subr.mxu1 %v451_v55  ;;  %v2220_v7 = vld [vmem:[%s2050_s26 + $0x40] sm:$0xff]  ;;  %v449_v17 = vld [vmem:[%s2160_s11 + $0xd8] sm:$0xff]  ;;  %v2242_v41 = vld [vmem:[%s2050_s26 + $0x48] sm:$0xff] }
  0x22   : > { %1955 = vxpose.xlu1.b32.cont [4/16] (narrow) %v1954_v23, 8  ;;  %v2223_v10 = vld [vmem:[%s2056_s29 + $0x40] sm:$0xff]  ;;  %1672 = vmatpush3.msra.mxu0 %v403_v56  ;;  %v401_v23 = vld [vmem:[%s2154_s8 + $0x58] sm:$0xff]  ;;  %v2245_v42 = vld [vmem:[%s2056_s29 + $0x48] sm:$0xff] }
  0x23   : > { %1707 = vmatpush3.msra.mxu1 %v435_v57  ;;  %v434_v11 = vld [vmem:[%s2160_s11 + $0x60] sm:$0xff]  ;;  %1673 = vmatprep.subr.mxu0 %v418_v59  ;;  %v448_v43 = vld [vmem:[%s2160_s11 + $0xd0] sm:$0xff]  ;;  %v415_v47 = vld [vmem:[%s2154_s8 + $0xc8] sm:$0xff] }
  0x24   : > { %1920 = vxpose.xlu0.b32.cont [5/16] (narrow) %v1919_v28, 8  ;;  %1708 = vmatprep.subr.mxu1 %v450_v60  ;;  %v433_v28 = vld [vmem:[%s2160_s11 + $0x58] sm:$0xff]  ;;  %v400_v44 = vld [vmem:[%s2154_s8 + $0x50] sm:$0xff]  ;;  %v447_v48 = vld [vmem:[%s2160_s11 + $0xc8] sm:$0xff] }
  0x25   : > { %1674 = vmatpush3.msra.mxu0 %v402_v3  ;;  %1709 = vmatpush3.msra.mxu1 %v434_v11  ;;  %v2257_v52 = vld [vmem:[%s2050_s26 + $0xd0] sm:$0xff]  ;;  %v399_v56 = vld [vmem:[%s2154_s8 + $0x48] sm:$0xff]  ;;  %v414_v60 = vld [vmem:[%s2154_s8 + $0xc0] sm:$0xff] }
  0x26   : > { %1957 = vxpose.xlu1.b32.cont [5/16] (narrow) %v1956_v29, 8  ;;  %v1964_v29 = vpack.i.bf16 %v2223_v10, %v2220_v7  ;;  %1675 = vmatprep.subr.mxu0 %v417_v16  ;;  %2694 = vst [vmem:[#allocation6_spill] sm:$0xff] %v2257_v52  ;;  %v2260_v55 = vld [vmem:[%s2056_s29 + $0xd0] sm:$0xff]  ;;  %v431_v59 = vld [vmem:[%s2160_s11 + $0x48] sm:$0xff]  ;;  %v398_v11 = vld [vmem:[%s2154_s8 + $0x40] sm:$0xff] }
  0x27   : > { %1710 = vmatprep.subr.mxu1 %v449_v17  ;;  %1676 = vmatpush3.msra.mxu0 %v401_v23  ;;  %2695 = vst [vmem:[#allocation7_spill] sm:$0xff] %v2260_v55  ;;  %v2264_v57 = vld [vmem:[%s2050_s26 + $0x50] sm:$0xff]  ;;  %v1931_v3 = vpack.i.bf16 %v2260_v55, %v2257_v52  ;;  %v430_v16 = vld [vmem:[%s2160_s11 + $0x40] sm:$0xff]  ;;  %v2282_v23 = vld [vmem:[%s2056_s29 + $0xd8] sm:$0xff] }
  0x28   : > { %1922 = vxpose.xlu0.b32.cont [6/16] (narrow) %v1921_v34, 8  ;;  %v2235_v34 = vld [vmem:[%s2050_s26 + $0xc8] sm:$0xff]  ;;  %1711 = vmatpush3.msra.mxu1 %v433_v28  ;;  %2697 = vst [vmem:[#allocation9_spill] sm:$0xff] %v2282_v23  ;;  %v413_v28 = vld [vmem:[%s2154_s8 + $0xb8] sm:$0xff]  ;;  %v392_v55 = vld [vmem:[%s2154_s8 + $0x10] sm:$0xff] }
  0x29   : > { %2692 = vst [vmem:[#allocation4_spill] sm:$0xff] %v2235_v34  ;;  %1677 = vmatprep.subr.mxu0 %v416_v40  ;;  %1712 = vmatprep.subr.mxu1 %v448_v43  ;;  %v2289_v40 = vld [vmem:[%s2056_s29 + $0x58] sm:$0xff]  ;;  %v438_v62 = vld [vmem:[%s2160_s11 + $0x80] sm:$0xff] }
  0x2a   : > { %1959 = vxpose.xlu1.b32.cont [6/16] (narrow) %v1958_v35, 8  ;;  %v2238_v35 = vld [vmem:[%s2056_s29 + $0xc8] sm:$0xff]  ;;  %1678 = vmatpush3.msra.mxu0 %v400_v44  ;;  %v445_v43 = vld [vmem:[%s2160_s11 + $0xb8] sm:$0xff] }
  0x2b   : > { %2693 = vst [vmem:[#allocation5_spill] sm:$0xff] %v2238_v35  ;;  %v1929_v46 = vpack.i.bf16 %v2238_v35, %v2235_v34  ;;  %1679 = vmatprep.subr.mxu0 %v415_v47  ;;  %v397_v44 = vld [vmem:[%s2154_s8 + $0x38] sm:$0xff]  ;;  %v412_v47 = vld [vmem:[%s2154_s8 + $0xb0] sm:$0xff] }
  0x2c   : > { %1924 = vxpose.xlu0.b32.cont [7/16] (narrow) %v1923_v45, 8  ;;  %v432_v45 = vld [vmem:[%s2160_s11 + $0x50] sm:$0xff]  ;;  %1680 = vmatpush3.msra.mxu0 %v399_v56  ;;  %v2301_v56 = vld [vmem:[%s2050_s26 + $0xe0] sm:$0xff]  ;;  %v441_v52 = vld [vmem:[%s2160_s11 + $0x98] sm:$0xff] }
  0x2d   : > { %1713 = vmatpush3.msra.mxu1 %v432_v45  ;;  %1681 = vmatprep.subr.mxu0 %v414_v60  ;;  %v429_v45 = vld [vmem:[%s2160_s11 + $0x38] sm:$0xff]  ;;  %2698 = vst [vmem:[#allocation10_spill] sm:$0xff] %v2301_v56  ;;  %v396_v60 = vld [vmem:[%s2154_s8 + $0x30] sm:$0xff] }
  0x2e   : > { %1961 = vxpose.xlu1.b32.cont [7/16] (narrow) %v1960_v49, 8  ;;  %v1966_v49 = vpack.i.bf16 %v2245_v42, %v2242_v41  ;;  %1714 = vmatprep.subr.mxu1 %v447_v48  ;;  %v444_v48 = vld [vmem:[%s2160_s11 + $0xb0] sm:$0xff] }
  0x2f   : > { %1715 = vmatpush3.msra.mxu1 %v431_v59  ;;  %1682 = vmatpush3.msra.mxu0 %v398_v11  ;;  %v2304_v59 = vld [vmem:[%s2056_s29 + $0xe0] sm:$0xff]  ;;  %v428_v11 = vld [vmem:[%s2160_s11 + $0x30] sm:$0xff] }
  0x30   : > { %1926 = vxpose.xlu0.b32.cont [8/16] (narrow) %v1925_v58, 8  ;;  %v2267_v58 = vld [vmem:[%s2056_s29 + $0x50] sm:$0xff]  ;;  %1683 = vmatprep.subr.mxu0 %v413_v28  ;;  %2699 = vst [vmem:[#allocation11_spill] sm:$0xff] %v2304_v59  ;;  %v1935_v28 = vpack.i.bf16 %v2304_v59, %v2301_v56  ;;  %v394_v56 = vld [vmem:[%s2154_s8 + $0x20] sm:$0xff] }
  0x31   : > { %v1968_v17 = vpack.i.bf16 %v2267_v58, %v2264_v57  ;;  %1684 = vmatpush3.msra.mxu0 %v397_v44  ;;  %v426_v59 = vld [vmem:[%s2160_s11 + $0x20] sm:$0xff]  ;;  %v424_v34 = vld [vmem:[%s2160_s11 + $0x10] sm:$0xff] }
  0x32   : > { %1963 = vxpose.xlu1.b32.cont [8/16] (narrow) %v1962_v61, 8  ;;  %v446_v61 = vld [vmem:[%s2160_s11 + $0xc0] sm:$0xff]  ;;  %1685 = vmatprep.subr.mxu0 %v412_v47  ;;  %v2326_v47 = vld [vmem:[%s2056_s29 + $0xe8] sm:$0xff] }
  0x33   : > { %1716 = vmatprep.subr.mxu1 %v446_v61  ;;  %v2308_v61 = vld [vmem:[%s2050_s26 + $0x60] sm:$0xff]  ;;  %1686 = vmatpush3.msra.mxu0 %v396_v60  ;;  %2701 = vst [vmem:[#allocation13_spill] sm:$0xff] %v2326_v47  ;;  %v2333_v60 = vld [vmem:[%s2056_s29 + $0x68] sm:$0xff] }
  0x34   : > { %1928 = vxpose.xlu0.b32.cont [9/16] (narrow) %v1927_v22, 8  ;;  %v2279_v22 = vld [vmem:[%s2050_s26 + $0xd8] sm:$0xff]  ;;  %1717 = vmatpush3.msra.mxu1 %v430_v16  ;;  %v411_v16 = vld [vmem:[%s2154_s8 + $0xa8] sm:$0xff] }
  0x35   : > { %2696 = vst [vmem:[#allocation8_spill] sm:$0xff] %v2279_v22  ;;  %1718 = vmatprep.subr.mxu1 %v445_v43  ;;  %v395_v43 = vld [vmem:[%s2154_s8 + $0x28] sm:$0xff]  ;;  %1687 = vmatprep.subr.mxu0 %v411_v16 }
  0x36   : > { %1965 = vxpose.xlu1.b32.cont [9/16] (narrow) %v1964_v29, 8  ;;  %v2286_v29 = vld [vmem:[%s2050_s26 + $0x58] sm:$0xff]  ;;  %1719 = vmatpush3.msra.mxu1 %v429_v45  ;;  %v2323_v45 = vld [vmem:[%s2050_s26 + $0xe8] sm:$0xff] }
  0x37   : > { %1720 = vmatprep.subr.mxu1 %v444_v48  ;;  %2700 = vst [vmem:[#allocation12_spill] sm:$0xff] %v2323_v45  ;;  %v2330_v48 = vld [vmem:[%s2050_s26 + $0x68] sm:$0xff]  ;;  %1688 = vmatpush3.msra.mxu0 %v395_v43  ;;  %v2352_v43 = vld [vmem:[%s2050_s26 + $0x70] sm:$0xff] }
  0x38   : > { %1930 = vxpose.xlu0.b32.cont [10/16] (narrow) %v1929_v46, 8  ;;  %v1933_v46 = vpack.i.bf16 %v2282_v23, %v2279_v22  ;;  %v427_v22 = vld [vmem:[%s2160_s11 + $0x28] sm:$0xff]  ;;  %1721 = vmatpush3.msra.mxu1 %v428_v11  ;;  %v1937_v11 = vpack.i.bf16 %v2326_v47, %v2323_v45  ;;  %v409_v23 = vld [vmem:[%s2154_s8 + $0x98] sm:$0xff]  ;;  %v1974_v16 = vpack.i.bf16 %v2333_v60, %v2330_v48  ;;  %v408_v45 = vld [vmem:[%s2154_s8 + $0x90] sm:$0xff] }
  0x39   : > { %v440_v47 = vld [vmem:[%s2160_s11 + $0x90] sm:$0xff] }
  0x3a   : > { %1967 = vxpose.xlu1.b32.cont [10/16] (narrow) %v1966_v49, 8  ;;  %v1970_v49 = vpack.i.bf16 %v2289_v40, %v2286_v29 }
  0x3c   : > { %1932 = vxpose.xlu0.b32.cont [11/16] (narrow) %v1931_v3, 8  ;;  %v2311_v3 = vld [vmem:[%s2056_s29 + $0x60] sm:$0xff] }
  0x3d   : > { %v1972_v44 = vpack.i.bf16 %v2311_v3, %v2308_v61 }
  0x3e   : > { %1969 = vxpose.xlu1.b32.cont [11/16] (narrow) %v1968_v17, 8  ;;  %v443_v17 = vld [vmem:[%s2160_s11 + $0xa8] sm:$0xff] }
  0x3f   : > { %1722 = vmatprep.subr.mxu1 %v443_v17  ;;  %v2345_v17 = vld [vmem:[%s2050_s26 + $0xf0] sm:$0xff] }
  0x40   : > { %1934 = vxpose.xlu0.b32.cont [12/16] (narrow) %v1933_v46, 8  ;;  %v410_v46 = vld [vmem:[%s2154_s8 + $0xa0] sm:$0xff]  ;;  %1723 = vmatpush3.msra.mxu1 %v427_v22  ;;  %2702 = vst [vmem:[#allocation14_spill] sm:$0xff] %v2345_v17  ;;  %v2348_v22 = vld [vmem:[%s2056_s29 + $0xf0] sm:$0xff] }
  0x41   : > { %1689 = vmatprep.subr.mxu0 %v410_v46  ;;  %2703 = vst [vmem:[#allocation15_spill] sm:$0xff] %v2348_v22  ;;  %v2355_v46 = vld [vmem:[%s2056_s29 + $0x70] sm:$0xff] }
  0x42   : > { %1971 = vxpose.xlu1.b32.cont [12/16] (narrow) %v1970_v49, 8  ;;  %v442_v49 = vld [vmem:[%s2160_s11 + $0xa0] sm:$0xff]  ;;  %1690 = vmatpush3.msra.mxu0 %v394_v56  ;;  %v1976_v56 = vpack.i.bf16 %v2355_v46, %v2352_v43 }
  0x43   : > { %1724 = vmatprep.subr.mxu1 %v442_v49  ;;  %1691 = vmatprep.subr.mxu0 %v409_v23  ;;  %v1939_v49 = vpack.i.bf16 %v2348_v22, %v2345_v17  ;;  %v407_v23 = vld [vmem:[%s2154_s8 + $0x88] sm:$0xff]  ;;  %v2377_v17 = vld [vmem:[%s2056_s29 + $0x78] sm:$0xff] }
  0x44   : > { %1936 = vxpose.xlu0.b32.cont [13/16] (narrow) %v1935_v28, 8  ;;  %v393_v28 = vld [vmem:[%s2154_s8 + $0x18] sm:$0xff]  ;;  %1725 = vmatpush3.msra.mxu1 %v426_v59  ;;  %v423_v22 = vld [vmem:[%s2160_s11 + $0x8] sm:$0xff] }
  0x45   : > { %1726 = vmatprep.subr.mxu1 %v441_v52  ;;  %1692 = vmatpush3.msra.mxu0 %v393_v28  ;;  %v2367_v59 = vld [vmem:[%s2050_s26 + $0xf8] sm:$0xff]  ;;  %v439_v28 = vld [vmem:[%s2160_s11 + $0x88] sm:$0xff] }
  0x46   : > { %1973 = vxpose.xlu1.b32.cont [13/16] (narrow) %v1972_v44, 8  ;;  %v425_v44 = vld [vmem:[%s2160_s11 + $0x18] sm:$0xff]  ;;  %2704 = vst [vmem:[#allocation16_spill] sm:$0xff] %v2367_v59  ;;  %1693 = vmatprep.subr.mxu0 %v408_v45  ;;  %v390_v45 = vld [vmem:[%s2154_s8] sm:$0xff] }
  0x47   : > { %v2370_v52 = vld [vmem:[%s2056_s29 + $0xf8] sm:$0xff]  ;;  %1727 = vmatpush3.msra.mxu1 %v425_v44  ;;  %1694 = vmatpush3.msra.mxu0 %v392_v55  ;;  %v406_v44 = vld [vmem:[%s2154_s8 + $0x80] sm:$0xff] }
  0x48   : > { %1938 = vxpose.xlu0.b32.cont [14/16] (narrow) %v1937_v11, 8  ;;  %v2374_v11 = vld [vmem:[%s2050_s26 + $0x78] sm:$0xff]  ;;  %1728 = vmatprep.subr.mxu1 %v440_v47  ;;  %v1941_v35 = vpack.i.bf16 %v2370_v52, %v2367_v59  ;;  %v422_v47 = vld [vmem:[%s2160_s11] sm:$0xff] }
  0x49   : > { %1729 = vmatpush3.msra.mxu1 %v424_v34  ;;  %1695 = vmatprep.subr.mxu0 %v407_v23  ;;  %v1978_v63 = vpack.i.bf16 %v2377_v17, %v2374_v11 }
  0x4a   : > { %1975 = vxpose.xlu1.b32.cont [14/16] (narrow) %v1974_v16, 8  ;;  %v391_v16 = vld [vmem:[%s2154_s8 + $0x8] sm:$0xff]  ;;  %1730 = vmatprep.subr.mxu1 %v439_v28 }
  0x4b   : > { %1696 = vmatpush3.msra.mxu0 %v391_v16  ;;  %1731 = vmatpush3.msra.mxu1 %v423_v22 }
  0x4c   : > { %1940 = vxpose.xlu0.b32.cont [15/16] (narrow) %v1939_v49, 8  ;;  %1697 = vmatprep.subr.mxu0 %v406_v44 }
  0x4d   : > { %1732 = vmatprep.subr.mxu1 %v438_v62  ;;  %1698 = vmatpush3.msra.mxu0 %v390_v45  ;;  %v325_v62 = vld [vmem:[%s2668_s0] sm:$0x7] }
  0x4e   : > { %1977 = vxpose.xlu1.b32.cont [15/16] (narrow) %v1976_v56, 8  ;;  %1733 = vmatpush3.msra.mxu1 %v422_v47 }
  0x50   : > { %1942 = vxpose.xlu0.b32.end [16/16] (narrow) %v1941_v35, 8 }
  0x52   : > { %1979 = vxpose.xlu1.b32.end [16/16] (narrow) %v1978_v63, 8 }
  0x90   : > { %v1943_v34 = vpop.trf.xlu0 }
  0x91   : > { %v1944_v49 = vunpack.i.l.bf16 %v1943_v34  ;;  %v1947_v23 = vunpack.i.h.bf16 %v1943_v34 }
  0x92   : > { %v1980_v55 = vpop.trf.xlu1 }
  0x93   : > { %v1981_v59 = vunpack.i.l.bf16 %v1980_v55  ;;  %v1984_v56 = vunpack.i.h.bf16 %v1980_v55  ;;  %582 = vmatprep.mubr.f32.mxu0 %v1944_v49  ;;  %717 = vmatprep.mubr.f32.mxu1 %v1947_v23 }
  0x95   : > { %583 = vmatmul.mubr.f32.vlgmr.msra.gmra.mxu0 %v1981_v59  ;;  %718 = vmatmul.mubr.f32.vlgmr.msra.gmra.mxu1 %v1984_v56 }
  0x96   : > { %1805 = vmatprep.mubr.msk.f32.mxu0 %vm739_vm1, %v2070_v4  ;;  %1855 = vmatprep.mubr.msk.f32.mxu1 %vm739_vm1, %v2065_v2  ;;  %v2707_v2 = vld [vmem:[#allocation5_spill] sm:$0xff]  ;;  %v2708_v4 = vld [vmem:[#allocation4_spill] sm:$0xff] }
 0x155   : > { %v1699_v28 = vpop.f32.mrf.mxu0  ;;  %v1734_v16 = vpop.f32.mrf.mxu1 }
 0x157   : > { %v1700_v35 = vpop.f32.mrf.mxu0  ;;  %v1735_v22 = vpop.f32.mrf.mxu1 }
 0x158   : > { %v1701_v63 = vadd.f32 %v1700_v35, %v1699_v28  ;;  %v1736_v44 = vadd.f32 %v1735_v22, %v1734_v16 }
 0x15a   : > { %v588_v45 = vmul.f32 %v1701_v63, %v325_v62  ;;  %v723_v47 = vmul.f32 %v1736_v44, %v325_v62 }
 0x15c   : > { %1985 = vlog2.f32 %v588_v45 }
 0x15d   : > { %1987 = vlog2.f32 %v723_v47 }
 0x169   : > { %v1986_v34 = vpop.eup %1985 }
 0x16a   : > { %v1988_v55 = vpop.eup %1987  ;;  %v725_v49 = vmul.f32 0.6931472, %v1986_v34 }
 0x16b   : > { %v733_v59 = vmul.f32 0.6931472, %v1988_v55 }
 0x16c   : > { %v727_v23 = vsel %vm726_vm0, %v725_v49, 0.0 }
 0x16d   : > { %v734_v56 = vsel %vm726_vm0, %v733_v59, 0.0  ;;  %728 = vadd.xlane.f32.xlu0 %v727_v23 }
 0x16e   : > { %735 = vadd.xlane.f32.xlu1 %v734_v56 }
 0x1f6   : > { %v729_v28 = vpop.xlane.xlu0 %728 }
 0x1f7   : > { %v736_v16 = vpop.xlane.xlu1 %735  ;;  %1989 = vrcp.f32 %v729_v28 }
 0x1f8   : > { %1991 = vrcp.f32 %v736_v16 }
 0x204   : > { %v1990_v62 = vpop.eup %1989 }
 0x205   : > { %v1992_v35 = vpop.eup %1991  ;;  %v731_v22 = vmul.f32 %v1990_v62, %v725_v49 }
 0x206   : > { %v738_v63 = vmul.f32 %v1992_v35, %v733_v59 }
 0x207   : > { %1803 = vmatprep.subr.msk.mxu0 %vm739_vm1, %v731_v22 }
 0x208   : > { %1853 = vmatprep.subr.msk.mxu1 %vm739_vm1, %v738_v63  ;;  %1804 = vmatpush3.xpose.msk.msra.mxu0 %vm739_vm1, %v731_v22 }
 0x209   : > { %1854 = vmatpush3.xpose.msk.msra.mxu1 %vm739_vm1, %v738_v63 }
 0x20b   : > { %1806 = vmatmul.mubr.msk.f32.vlgmr.msra.gmra.mxu0 %vm739_vm1, %v2084_v9  ;;  %v2712_v9 = vld [vmem:[#allocation8_spill] sm:$0xff] }
 0x20c   : > { %1856 = vmatmul.mubr.msk.f32.vlgmr.msra.gmra.mxu1 %vm739_vm1, %v2081_v8  ;;  %1808 = vmatprep.mubr.msk.f32.mxu0 %vm739_vm1, %v2100_v15  ;;  %v2711_v8 = vld [vmem:[#allocation9_spill] sm:$0xff]  ;;  %v2716_v15 = vld [vmem:[#allocation12_spill] sm:$0xff] }
 0x20d   : > { %1858 = vmatprep.mubr.msk.f32.mxu1 %vm739_vm1, %v2097_v14  ;;  %v2715_v14 = vld [vmem:[#allocation13_spill] sm:$0xff] }
 0x20f   : > { %1809 = vmatmul.mubr.msk.f32.gmra.mxu0 %vm739_vm1, %v2116_v21 }
 0x210   : > { %1859 = vmatmul.mubr.msk.f32.gmra.mxu1 %vm739_vm1, %v2113_v20  ;;  %1811 = vmatprep.mubr.msk.f32.mxu0 %vm739_vm1, %v2132_v27  ;;  %v2719_v20 = vld [vmem:[#allocation16_spill] sm:$0xff] }
 0x211   : > { %1861 = vmatprep.mubr.msk.f32.mxu1 %vm739_vm1, %v2129_v26 }
 0x213   : > { %1812 = vmatmul.mubr.msk.f32.gmra.mxu0 %vm739_vm1, %v2148_v33 }
 0x214   : > { %1862 = vmatmul.mubr.msk.f32.gmra.mxu1 %vm739_vm1, %v2145_v32  ;;  %1814 = vmatprep.mubr.msk.f32.mxu0 %vm739_vm1, %v2176_v39 }
 0x215   : > { %1864 = vmatprep.mubr.msk.f32.mxu1 %vm739_vm1, %v2173_v38 }
 0x217   : > { %1815 = vmatmul.mubr.msk.f32.gmra.mxu0 %vm739_vm1, %v2201_v54 }
 0x218   : > { %1865 = vmatmul.mubr.msk.f32.gmra.mxu1 %vm739_vm1, %v2198_v53  ;;  %1817 = vmatprep.mubr.msk.f32.mxu0 %vm739_vm1, %v2223_v10 }
 0x219   : > { %1867 = vmatprep.mubr.msk.f32.mxu1 %vm739_vm1, %v2220_v7 }
 0x21b   : > { %1818 = vmatmul.mubr.msk.f32.gmra.mxu0 %vm739_vm1, %v2245_v42 }
 0x21c   : > { %1868 = vmatmul.mubr.msk.f32.gmra.mxu1 %vm739_vm1, %v2242_v41  ;;  %1820 = vmatprep.mubr.msk.f32.mxu0 %vm739_vm1, %v2267_v58 }
 0x21d   : > { %1870 = vmatprep.mubr.msk.f32.mxu1 %vm739_vm1, %v2264_v57 }
 0x21f   : > { %1821 = vmatmul.mubr.msk.f32.gmra.mxu0 %vm739_vm1, %v2289_v40 }
 0x220   : > { %1871 = vmatmul.mubr.msk.f32.gmra.mxu1 %vm739_vm1, %v2286_v29  ;;  %1823 = vmatprep.mubr.msk.f32.mxu0 %vm739_vm1, %v2311_v3 }
 0x221   : > { %1873 = vmatprep.mubr.msk.f32.mxu1 %vm739_vm1, %v2308_v61 }
 0x223   : > { %1824 = vmatmul.mubr.msk.f32.gmra.mxu0 %vm739_vm1, %v2333_v60 }
 0x224   : > { %1874 = vmatmul.mubr.msk.f32.gmra.mxu1 %vm739_vm1, %v2330_v48  ;;  %1826 = vmatprep.mubr.msk.f32.mxu0 %vm739_vm1, %v2355_v46 }
 0x225   : > { %1876 = vmatprep.mubr.msk.f32.mxu1 %vm739_vm1, %v2352_v43 }
 0x227   : > { %1827 = vmatmul.mubr.msk.f32.gmra.mxu0 %vm739_vm1, %v2377_v17 }
 0x228   : > { %1877 = vmatmul.mubr.msk.f32.gmra.mxu1 %vm739_vm1, %v2374_v11  ;;  %1829 = vmatprep.mubr.msk.f32.mxu0 %vm739_vm1, %v2062_v1  ;;  %v2706_v1 = vld [vmem:[#allocation2_spill] sm:$0xff] }
 0x229   : > { %1879 = vmatprep.mubr.msk.f32.mxu1 %vm739_vm1, %v2059_v0  ;;  %v2705_v0 = vld [vmem:[#allocation3_spill] sm:$0xff] }
 0x22b   : > { %1830 = vmatmul.mubr.msk.f32.gmra.mxu0 %vm739_vm1, %v2076_v6  ;;  %v2710_v6 = vld [vmem:[#allocation6_spill] sm:$0xff] }
 0x22c   : > { %1880 = vmatmul.mubr.msk.f32.gmra.mxu1 %vm739_vm1, %v2073_v5  ;;  %1832 = vmatprep.mubr.msk.f32.mxu0 %vm739_vm1, %v2094_v13  ;;  %v2709_v5 = vld [vmem:[#allocation7_spill] sm:$0xff]  ;;  %v2714_v13 = vld [vmem:[#allocation10_spill] sm:$0xff] }
 0x22d   : > { %1882 = vmatprep.mubr.msk.f32.mxu1 %vm739_vm1, %v2091_v12  ;;  %v2713_v12 = vld [vmem:[#allocation11_spill] sm:$0xff] }
 0x22f   : > { %1833 = vmatmul.mubr.msk.f32.gmra.mxu0 %vm739_vm1, %v2110_v19  ;;  %v2718_v19 = vld [vmem:[#allocation14_spill] sm:$0xff] }
 0x230   : > { %1883 = vmatmul.mubr.msk.f32.gmra.mxu1 %vm739_vm1, %v2107_v18  ;;  %1835 = vmatprep.mubr.msk.f32.mxu0 %vm739_vm1, %v2126_v25  ;;  %v2717_v18 = vld [vmem:[#allocation15_spill] sm:$0xff] }
 0x231   : > { %1885 = vmatprep.mubr.msk.f32.mxu1 %vm739_vm1, %v2123_v24 }
 0x233   : > { %1836 = vmatmul.mubr.msk.f32.gmra.mxu0 %vm739_vm1, %v2142_v31 }
 0x234   : > { %1886 = vmatmul.mubr.msk.f32.gmra.mxu1 %vm739_vm1, %v2139_v30  ;;  %1838 = vmatprep.mubr.msk.f32.mxu0 %vm739_vm1, %v2170_v37 }
 0x235   : > { %1888 = vmatprep.mubr.msk.f32.mxu1 %vm739_vm1, %v2167_v36 }
 0x237   : > { %1839 = vmatmul.mubr.msk.f32.gmra.mxu0 %vm739_vm1, %v2194_v51 }
 0x238   : > { %1889 = vmatmul.mubr.msk.f32.gmra.mxu1 %vm739_vm1, %v2191_v50  ;;  %1841 = vmatprep.mubr.msk.f32.mxu0 %vm739_vm1, %v2705_v0 }
 0x239   : > { %1891 = vmatprep.mubr.msk.f32.mxu1 %vm739_vm1, %v2706_v1 }
 0x23b   : > { %1842 = vmatmul.mubr.msk.f32.gmra.mxu0 %vm739_vm1, %v2707_v2 }
 0x23c   : > { %1892 = vmatmul.mubr.msk.f32.gmra.mxu1 %vm739_vm1, %v2708_v4  ;;  %1844 = vmatprep.mubr.msk.f32.mxu0 %vm739_vm1, %v2709_v5 }
 0x23d   : > { %1894 = vmatprep.mubr.msk.f32.mxu1 %vm739_vm1, %v2710_v6 }
 0x23f   : > { %1845 = vmatmul.mubr.msk.f32.gmra.mxu0 %vm739_vm1, %v2711_v8 }
 0x240   : > { %1895 = vmatmul.mubr.msk.f32.gmra.mxu1 %vm739_vm1, %v2712_v9  ;;  %1847 = vmatprep.mubr.msk.f32.mxu0 %vm739_vm1, %v2713_v12 }
 0x241   : > { %1897 = vmatprep.mubr.msk.f32.mxu1 %vm739_vm1, %v2714_v13 }
 0x243   : > { %1848 = vmatmul.mubr.msk.f32.gmra.mxu0 %vm739_vm1, %v2715_v14 }
 0x244   : > { %1898 = vmatmul.mubr.msk.f32.gmra.mxu1 %vm739_vm1, %v2716_v15  ;;  %1850 = vmatprep.mubr.msk.f32.mxu0 %vm739_vm1, %v2717_v18 }
 0x245   : > { %1900 = vmatprep.mubr.msk.f32.mxu1 %vm739_vm1, %v2718_v19 }
 0x247   : > { %1851 = vmatmul.mubr.msk.f32.gmra.mxu0 %vm739_vm1, %v2370_v52 }
 0x248   : > { %1901 = vmatmul.mubr.msk.f32.gmra.mxu1 %vm739_vm1, %v2719_v20 }
 0x2cb   : > { %v1807_v21 = vpop.f32.mrf.mxu0 }
 0x2cc   : > { %1065 = vst.msk [vmem:[%s2529_s16 + $0x8] sm:$0xff] %vm739_vm1, %v1807_v21  ;;  %v1857_v24 = vpop.f32.mrf.mxu1 }
 0x2cd   : > { %1421 = vst.msk [vmem:[%s2535_s19 + $0x8] sm:$0xff] %vm739_vm1, %v1857_v24  ;;  %v905_v25 = vpop.f32.mrf.mxu0 }
 0x2ce   : > { %1064 = vst.msk [vmem:[%s2529_s16] sm:$0xff] %vm739_vm1, %v905_v25  ;;  %v1261_v26 = vpop.f32.mrf.mxu1 }
 0x2cf   : > { %1420 = vst.msk [vmem:[%s2535_s19] sm:$0xff] %vm739_vm1, %v1261_v26  ;;  %v1810_v27 = vpop.f32.mrf.mxu0 }
 0x2d0   : > { %1067 = vst.msk [vmem:[%s2529_s16 + $0x18] sm:$0xff] %vm739_vm1, %v1810_v27  ;;  %v1860_v30 = vpop.f32.mrf.mxu1 }
 0x2d1   : > { %1423 = vst.msk [vmem:[%s2535_s19 + $0x18] sm:$0xff] %vm739_vm1, %v1860_v30  ;;  %v915_v31 = vpop.f32.mrf.mxu0 }
 0x2d2   : > { %1066 = vst.msk [vmem:[%s2529_s16 + $0x10] sm:$0xff] %vm739_vm1, %v915_v31  ;;  %v1271_v32 = vpop.f32.mrf.mxu1 }
 0x2d3   : > { %1422 = vst.msk [vmem:[%s2535_s19 + $0x10] sm:$0xff] %vm739_vm1, %v1271_v32  ;;  %v1813_v33 = vpop.f32.mrf.mxu0 }
 0x2d4   : > { %1069 = vst.msk [vmem:[%s2529_s16 + $0x28] sm:$0xff] %vm739_vm1, %v1813_v33  ;;  %v1863_v36 = vpop.f32.mrf.mxu1 }
 0x2d5   : > { %1425 = vst.msk [vmem:[%s2535_s19 + $0x28] sm:$0xff] %vm739_vm1, %v1863_v36  ;;  %v925_v37 = vpop.f32.mrf.mxu0 }
 0x2d6   : > { %1068 = vst.msk [vmem:[%s2529_s16 + $0x20] sm:$0xff] %vm739_vm1, %v925_v37  ;;  %v1281_v38 = vpop.f32.mrf.mxu1 }
 0x2d7   : > { %1424 = vst.msk [vmem:[%s2535_s19 + $0x20] sm:$0xff] %vm739_vm1, %v1281_v38  ;;  %v1816_v39 = vpop.f32.mrf.mxu0 }
 0x2d8   : > { %1071 = vst.msk [vmem:[%s2529_s16 + $0x38] sm:$0xff] %vm739_vm1, %v1816_v39  ;;  %v1866_v50 = vpop.f32.mrf.mxu1 }
 0x2d9   : > { %1427 = vst.msk [vmem:[%s2535_s19 + $0x38] sm:$0xff] %vm739_vm1, %v1866_v50  ;;  %v935_v51 = vpop.f32.mrf.mxu0 }
 0x2da   : > { %1070 = vst.msk [vmem:[%s2529_s16 + $0x30] sm:$0xff] %vm739_vm1, %v935_v51  ;;  %v1291_v53 = vpop.f32.mrf.mxu1 }
 0x2db   : > { %1426 = vst.msk [vmem:[%s2535_s19 + $0x30] sm:$0xff] %vm739_vm1, %v1291_v53  ;;  %v1819_v54 = vpop.f32.mrf.mxu0 }
 0x2dc   : > { %1073 = vst.msk [vmem:[%s2529_s16 + $0x48] sm:$0xff] %vm739_vm1, %v1819_v54  ;;  %v1869_v7 = vpop.f32.mrf.mxu1 }
 0x2dd   : > { %1429 = vst.msk [vmem:[%s2535_s19 + $0x48] sm:$0xff] %vm739_vm1, %v1869_v7  ;;  %v945_v10 = vpop.f32.mrf.mxu0 }
 0x2de   : > { %1072 = vst.msk [vmem:[%s2529_s16 + $0x40] sm:$0xff] %vm739_vm1, %v945_v10  ;;  %v1301_v41 = vpop.f32.mrf.mxu1 }
 0x2df   : > { %1428 = vst.msk [vmem:[%s2535_s19 + $0x40] sm:$0xff] %vm739_vm1, %v1301_v41  ;;  %v1822_v42 = vpop.f32.mrf.mxu0 }
 0x2e0   : > { %1075 = vst.msk [vmem:[%s2529_s16 + $0x58] sm:$0xff] %vm739_vm1, %v1822_v42  ;;  %v1872_v57 = vpop.f32.mrf.mxu1 }
 0x2e1   : > { %1431 = vst.msk [vmem:[%s2535_s19 + $0x58] sm:$0xff] %vm739_vm1, %v1872_v57  ;;  %v955_v58 = vpop.f32.mrf.mxu0 }
 0x2e2   : > { %1074 = vst.msk [vmem:[%s2529_s16 + $0x50] sm:$0xff] %vm739_vm1, %v955_v58  ;;  %v1311_v29 = vpop.f32.mrf.mxu1 }
 0x2e3   : > { %1430 = vst.msk [vmem:[%s2535_s19 + $0x50] sm:$0xff] %vm739_vm1, %v1311_v29  ;;  %v1825_v40 = vpop.f32.mrf.mxu0 }
 0x2e4   : > { %1077 = vst.msk [vmem:[%s2529_s16 + $0x68] sm:$0xff] %vm739_vm1, %v1825_v40  ;;  %v1875_v61 = vpop.f32.mrf.mxu1 }
 0x2e5   : > { %1433 = vst.msk [vmem:[%s2535_s19 + $0x68] sm:$0xff] %vm739_vm1, %v1875_v61  ;;  %v965_v3 = vpop.f32.mrf.mxu0 }
 0x2e6   : > { %1076 = vst.msk [vmem:[%s2529_s16 + $0x60] sm:$0xff] %vm739_vm1, %v965_v3  ;;  %v1321_v48 = vpop.f32.mrf.mxu1 }
 0x2e7   : > { %1432 = vst.msk [vmem:[%s2535_s19 + $0x60] sm:$0xff] %vm739_vm1, %v1321_v48  ;;  %v1828_v60 = vpop.f32.mrf.mxu0 }
 0x2e8   : > { %1079 = vst.msk [vmem:[%s2529_s16 + $0x78] sm:$0xff] %vm739_vm1, %v1828_v60  ;;  %v1878_v17 = vpop.f32.mrf.mxu1 }
 0x2e9   : > { %1435 = vst.msk [vmem:[%s2535_s19 + $0x78] sm:$0xff] %vm739_vm1, %v1878_v17  ;;  %v975_v43 = vpop.f32.mrf.mxu0 }
 0x2ea   : > { %1078 = vst.msk [vmem:[%s2529_s16 + $0x70] sm:$0xff] %vm739_vm1, %v975_v43  ;;  %v1331_v46 = vpop.f32.mrf.mxu1 }
 0x2eb   : > { %1434 = vst.msk [vmem:[%s2535_s19 + $0x70] sm:$0xff] %vm739_vm1, %v1331_v46  ;;  %v1831_v52 = vpop.f32.mrf.mxu0 }
 0x2ec   : > { %1081 = vst.msk [vmem:[%s2529_s16 + $0x88] sm:$0xff] %vm739_vm1, %v1831_v52  ;;  %v1881_v11 = vpop.f32.mrf.mxu1 }
 0x2ed   : > { %1437 = vst.msk [vmem:[%s2535_s19 + $0x88] sm:$0xff] %vm739_vm1, %v1881_v11  ;;  %v985_v44 = vpop.f32.mrf.mxu0 }
 0x2ee   : > { %1080 = vst.msk [vmem:[%s2529_s16 + $0x80] sm:$0xff] %vm739_vm1, %v985_v44  ;;  %v1341_v45 = vpop.f32.mrf.mxu1 }
 0x2ef   : > { %1436 = vst.msk [vmem:[%s2535_s19 + $0x80] sm:$0xff] %vm739_vm1, %v1341_v45  ;;  %v1834_v47 = vpop.f32.mrf.mxu0 }
 0x2f0   : > { %1083 = vst.msk [vmem:[%s2529_s16 + $0x98] sm:$0xff] %vm739_vm1, %v1834_v47  ;;  %v1884_v34 = vpop.f32.mrf.mxu1 }
 0x2f1   : > { %1439 = vst.msk [vmem:[%s2535_s19 + $0x98] sm:$0xff] %vm739_vm1, %v1884_v34  ;;  %v995_v55 = vpop.f32.mrf.mxu0 }
 0x2f2   : > { %1082 = vst.msk [vmem:[%s2529_s16 + $0x90] sm:$0xff] %vm739_vm1, %v995_v55  ;;  %v1351_v49 = vpop.f32.mrf.mxu1 }
 0x2f3   : > { %1438 = vst.msk [vmem:[%s2535_s19 + $0x90] sm:$0xff] %vm739_vm1, %v1351_v49  ;;  %v1837_v59 = vpop.f32.mrf.mxu0 }
 0x2f4   : > { %1085 = vst.msk [vmem:[%s2529_s16 + $0xa8] sm:$0xff] %vm739_vm1, %v1837_v59  ;;  %v1887_v23 = vpop.f32.mrf.mxu1 }
 0x2f5   : > { %1441 = vst.msk [vmem:[%s2535_s19 + $0xa8] sm:$0xff] %vm739_vm1, %v1887_v23  ;;  %v1005_v56 = vpop.f32.mrf.mxu0 }
 0x2f6   : > { %1084 = vst.msk [vmem:[%s2529_s16 + $0xa0] sm:$0xff] %vm739_vm1, %v1005_v56  ;;  %v1361_v28 = vpop.f32.mrf.mxu1 }
 0x2f7   : > { %1440 = vst.msk [vmem:[%s2535_s19 + $0xa0] sm:$0xff] %vm739_vm1, %v1361_v28  ;;  %v1840_v16 = vpop.f32.mrf.mxu0 }
 0x2f8   : > { %1087 = vst.msk [vmem:[%s2529_s16 + $0xb8] sm:$0xff] %vm739_vm1, %v1840_v16  ;;  %v1890_v62 = vpop.f32.mrf.mxu1 }
 0x2f9   : > { %1443 = vst.msk [vmem:[%s2535_s19 + $0xb8] sm:$0xff] %vm739_vm1, %v1890_v62  ;;  %v1015_v35 = vpop.f32.mrf.mxu0 }
 0x2fa   : > { %1086 = vst.msk [vmem:[%s2529_s16 + $0xb0] sm:$0xff] %vm739_vm1, %v1015_v35  ;;  %v1371_v22 = vpop.f32.mrf.mxu1 }
 0x2fb   : > { %1442 = vst.msk [vmem:[%s2535_s19 + $0xb0] sm:$0xff] %vm739_vm1, %v1371_v22  ;;  %v1843_v63 = vpop.f32.mrf.mxu0 }
 0x2fc   : > { %1089 = vst.msk [vmem:[%s2529_s16 + $0xc8] sm:$0xff] %vm739_vm1, %v1843_v63  ;;  %v1893_v0 = vpop.f32.mrf.mxu1 }
 0x2fd   : > { %1445 = vst.msk [vmem:[%s2535_s19 + $0xc8] sm:$0xff] %vm739_vm1, %v1893_v0  ;;  %v1025_v1 = vpop.f32.mrf.mxu0 }
 0x2fe   : > { %1088 = vst.msk [vmem:[%s2529_s16 + $0xc0] sm:$0xff] %vm739_vm1, %v1025_v1  ;;  %v1381_v2 = vpop.f32.mrf.mxu1 }
 0x2ff   : > { %1444 = vst.msk [vmem:[%s2535_s19 + $0xc0] sm:$0xff] %vm739_vm1, %v1381_v2  ;;  %v1846_v4 = vpop.f32.mrf.mxu0 }
 0x300   : > { %1091 = vst.msk [vmem:[%s2529_s16 + $0xd8] sm:$0xff] %vm739_vm1, %v1846_v4  ;;  %v1896_v5 = vpop.f32.mrf.mxu1 }
 0x301   : > { %1447 = vst.msk [vmem:[%s2535_s19 + $0xd8] sm:$0xff] %vm739_vm1, %v1896_v5  ;;  %v1035_v6 = vpop.f32.mrf.mxu0 }
 0x302   : > { %1090 = vst.msk [vmem:[%s2529_s16 + $0xd0] sm:$0xff] %vm739_vm1, %v1035_v6  ;;  %v1391_v8 = vpop.f32.mrf.mxu1 }
 0x303   : > { %1446 = vst.msk [vmem:[%s2535_s19 + $0xd0] sm:$0xff] %vm739_vm1, %v1391_v8  ;;  %v1849_v9 = vpop.f32.mrf.mxu0 }
 0x304   : > { %1093 = vst.msk [vmem:[%s2529_s16 + $0xe8] sm:$0xff] %vm739_vm1, %v1849_v9  ;;  %v1899_v12 = vpop.f32.mrf.mxu1 }
 0x305   : > { %1449 = vst.msk [vmem:[%s2535_s19 + $0xe8] sm:$0xff] %vm739_vm1, %v1899_v12  ;;  %v1045_v13 = vpop.f32.mrf.mxu0 }
 0x306   : > { %1092 = vst.msk [vmem:[%s2529_s16 + $0xe0] sm:$0xff] %vm739_vm1, %v1045_v13  ;;  %v1401_v14 = vpop.f32.mrf.mxu1 }
 0x307   : > { %1448 = vst.msk [vmem:[%s2535_s19 + $0xe0] sm:$0xff] %vm739_vm1, %v1401_v14  ;;  %v1852_v15 = vpop.f32.mrf.mxu0 }
 0x308   : > { %1095 = vst.msk [vmem:[%s2529_s16 + $0xf8] sm:$0xff] %vm739_vm1, %v1852_v15  ;;  %v1902_v18 = vpop.f32.mrf.mxu1 }
 0x309   : > { %1451 = vst.msk [vmem:[%s2535_s19 + $0xf8] sm:$0xff] %vm739_vm1, %v1902_v18  ;;  %v1055_v19 = vpop.f32.mrf.mxu0 }
 0x30a   : > { %1094 = vst.msk [vmem:[%s2529_s16 + $0xf0] sm:$0xff] %vm739_vm1, %v1055_v19  ;;  %v1411_v20 = vpop.f32.mrf.mxu1 }
 0x30b   : > { %1450 = vst.msk [vmem:[%s2535_s19 + $0xf0] sm:$0xff] %vm739_vm1, %v1411_v20 }
 0x30c PF: > { %s17_s21 = sadd.s32 1, %s1999_s21  }
 0x30d   : > { %p14_p4 = scmp.ge.s32.totalorder %s17_s21, 4  }
 0x30f   :  { %16 = sbr.rel (!%p14_p4) target bundleno = 1 (0x1), region = 91 }

// kernel: fct_forward.7
= control target key start
LH: loop header
LB: loop body
LE: loop exit
PB: predicated region body
PF: predicated region fallthrough
CT: control target
= control target key end

     0   :  { %s651_s12 = smov 0   ;;  %s834_s0 = inlined_call_operand.vmem [shape: f32[512,4], index: 0, kind: input, shape index: {}]   ;;  %s835_s1 = inlined_call_operand.vmem [shape: bf16[4,4], index: 1, kind: input, shape index: {}]   ;;  %s836_s2 = inlined_call_operand.vmem [shape: f32[1,4], index: 2, kind: input, shape index: {}]   ;;  %s837_s3 = inlined_call_operand.vmem [shape: f32[512,4], index: 3, kind: output, shape index: {}]  }
   0x1 LB: > { %s532_s13 = sadd.s32 4294967295, %s629_s12   ;;  %p536_p0 = scmp.ge.s32.totalorder %s629_s12, 1  ;;  %s629_s12 = sphi %s651_s12, %s13_s12  }
   0x2   : > { %p138_p1 = scmp.lt.s32.totalorder %s629_s12, 3 }
   0x4   : > { %p139_p2 = pnand %p536_p0, %p138_p1 }
   0x5   : > { %s537_s16 = sshll.u32 (!%p139_p2), %s532_s13, 5 }
   0x6   : > { %142 = sbr.rel (%p139_p2) target bundleno = 246 (0xf6), region = 32  ;;  %p163_p3 = scmp.lt.s32.totalorder (!%p139_p2), %s537_s16, 63 }
   0xb   : > { %v223_v0 = vld [vmem:[%s835_s1] sm:$0x3]  ;;  %vm231_vm0 = vcmask 31744   ;;  %s839_s16 = smov (!%p163_p3, %s537_s16), 63 }
   0xc   : > { %613 = vmatprep.subr.msk.bf16.mxu0 %vm231_vm0, %v223_v0  ;;  %614 = vmatprep.subr.msk.bf16.mxu1 %vm231_vm0, %v223_v0  ;;  %v281_v1 = vsel %vm231_vm0, %v223_v0, 0  ;;  %s538_s17 = sshll.u32 %s839_s16, 3  ;;  %v726_v50 = vld [vmem:[%s836_s2] ss:$0 sm:$0xff] }
   0xd   : > { %578 = vmatpush3.bf16.xpose.msra.mxu0 %v281_v1  ;;  %612 = vmatpush3.bf16.xpose.msra.mxu1 %v281_v1  ;;  %s673_s20 = scalar_lea.vmem %s834_s0, %s538_s17  ;;  %s733_s25 = scalar_lea.vmem %s837_s3, %s538_s17 }
   0xe   : > { %v175_v2 = vld [vmem:[%s673_s20] sm:$0xff]  ;;  %v176_v3 = vld [vmem:[%s673_s20 + $0x8] sm:$0xff]  ;;  %v177_v7 = vld [vmem:[%s673_s20 + $0x10] sm:$0xff] }
   0xf   : > { %v191_v4 = vld [vmem:[%s673_s20 + $0x80] sm:$0xff]  ;;  %v207_v5 = vpack.c.bf16 %v176_v3, %v175_v2  ;;  %v192_v6 = vld [vmem:[%s673_s20 + $0x88] sm:$0xff]  ;;  %v178_v8 = vld [vmem:[%s673_s20 + $0x18] sm:$0xff] }
  0x10   : > { %v215_v9 = vpack.c.bf16 %v192_v6, %v191_v4  ;;  %v208_v10 = vpack.c.bf16 %v178_v8, %v177_v7  ;;  %v193_v11 = vld [vmem:[%s673_s20 + $0x90] sm:$0xff]  ;;  %v194_v12 = vld [vmem:[%s673_s20 + $0x98] sm:$0xff]  ;;  %v179_v13 = vld [vmem:[%s673_s20 + $0x20] sm:$0xff] }
  0x11   : > { %579 = vmatprep.mubr.msk.bf16.mxu0 %vm231_vm0, %v207_v5  ;;  %v216_v14 = vpack.c.bf16 %v194_v12, %v193_v11  ;;  %v180_v15 = vld [vmem:[%s673_s20 + $0x28] sm:$0xff]  ;;  %v195_v16 = vld [vmem:[%s673_s20 + $0xa0] sm:$0xff]  ;;  %v181_v20 = vld [vmem:[%s673_s20 + $0x30] sm:$0xff] }
  0x12   : > { %v196_v17 = vld [vmem:[%s673_s20 + $0xa8] sm:$0xff]  ;;  %595 = vmatprep.mubr.msk.bf16.mxu1 %vm231_vm0, %v215_v9  ;;  %v209_v18 = vpack.c.bf16 %v180_v15, %v179_v13  ;;  %v182_v21 = vld [vmem:[%s673_s20 + $0x38] sm:$0xff]  ;;  %v197_v22 = vld [vmem:[%s673_s20 + $0xb0] sm:$0xff] }
  0x13   : > { %v217_v19 = vpack.c.bf16 %v196_v17, %v195_v16  ;;  %v198_v23 = vld [vmem:[%s673_s20 + $0xb8] sm:$0xff]  ;;  %v183_v24 = vld [vmem:[%s673_s20 + $0x40] sm:$0xff]  ;;  %v184_v25 = vld [vmem:[%s673_s20 + $0x48] sm:$0xff]  ;;  %v210_v28 = vpack.c.bf16 %v182_v21, %v181_v20 }
  0x14   : > { %580 = vmatmul.mubr.msk.bf16.vlgmr.msra.gmra.mxu0 %vm231_vm0, %v208_v10  ;;  %596 = vmatmul.mubr.msk.bf16.vlgmr.msra.gmra.mxu1 %vm231_vm0, %v216_v14  ;;  %v199_v26 = vld [vmem:[%s673_s20 + $0xc0] sm:$0xff]  ;;  %v200_v27 = vld [vmem:[%s673_s20 + $0xc8] sm:$0xff]  ;;  %v218_v29 = vpack.c.bf16 %v198_v23, %v197_v22  ;;  %v211_v30 = vpack.c.bf16 %v184_v25, %v183_v24  ;;  %v185_v32 = vld [vmem:[%s673_s20 + $0x50] sm:$0xff] }
  0x15   : > { %583 = vmatprep.mubr.msk.bf16.mxu0 %vm231_vm0, %v209_v18  ;;  %599 = vmatprep.mubr.msk.bf16.mxu1 %vm231_vm0, %v217_v19  ;;  %v219_v31 = vpack.c.bf16 %v200_v27, %v199_v26  ;;  %v186_v33 = vld [vmem:[%s673_s20 + $0x58] sm:$0xff]  ;;  %v201_v34 = vld [vmem:[%s673_s20 + $0xd0] sm:$0xff]  ;;  %v187_v36 = vld [vmem:[%s673_s20 + $0x60] sm:$0xff] }
  0x16   : > { %v202_v35 = vld [vmem:[%s673_s20 + $0xd8] sm:$0xff]  ;;  %v188_v37 = vld [vmem:[%s673_s20 + $0x68] sm:$0xff]  ;;  %v203_v38 = vld [vmem:[%s673_s20 + $0xe0] sm:$0xff]  ;;  %v212_v40 = vpack.c.bf16 %v186_v33, %v185_v32 }
  0x17   : > { %v204_v39 = vld [vmem:[%s673_s20 + $0xe8] sm:$0xff]  ;;  %v220_v41 = vpack.c.bf16 %v202_v35, %v201_v34  ;;  %v213_v42 = vpack.c.bf16 %v188_v37, %v187_v36  ;;  %v189_v44 = vld [vmem:[%s673_s20 + $0x70] sm:$0xff]  ;;  %v190_v45 = vld [vmem:[%s673_s20 + $0x78] sm:$0xff] }
  0x18   : > { %v221_v43 = vpack.c.bf16 %v204_v39, %v203_v38  ;;  %v205_v46 = vld [vmem:[%s673_s20 + $0xf0] sm:$0xff]  ;;  %v206_v47 = vld [vmem:[%s673_s20 + $0xf8] sm:$0xff]  ;;  %v214_v48 = vpack.c.bf16 %v190_v45, %v189_v44 }
  0x19   : > { %v222_v49 = vpack.c.bf16 %v206_v47, %v205_v46 }
  0x1c   : > { %584 = vmatmul.mubr.msk.bf16.gmra.mxu0 %vm231_vm0, %v210_v28  ;;  %600 = vmatmul.mubr.msk.bf16.gmra.mxu1 %vm231_vm0, %v218_v29 }
  0x1d   : > { %587 = vmatprep.mubr.msk.bf16.mxu0 %vm231_vm0, %v211_v30  ;;  %603 = vmatprep.mubr.msk.bf16.mxu1 %vm231_vm0, %v219_v31 }
  0x24   : > { %588 = vmatmul.mubr.msk.bf16.gmra.mxu0 %vm231_vm0, %v212_v40  ;;  %604 = vmatmul.mubr.msk.bf16.gmra.mxu1 %vm231_vm0, %v220_v41 }
  0x25   : > { %591 = vmatprep.mubr.msk.bf16.mxu0 %vm231_vm0, %v213_v42  ;;  %607 = vmatprep.mubr.msk.bf16.mxu1 %vm231_vm0, %v221_v43 }
  0x2c   : > { %592 = vmatmul.mubr.msk.bf16.gmra.mxu0 %vm231_vm0, %v214_v48  ;;  %608 = vmatmul.mubr.msk.bf16.gmra.mxu1 %vm231_vm0, %v222_v49 }
  0xd4   : > { %v581_v51 = vpop.f32.mrf.mxu0  ;;  %v597_v53 = vpop.f32.mrf.mxu1 }
  0xd5   : > { %v326_v52 = vadd.f32 %v581_v51, %v726_v50  ;;  %v390_v54 = vadd.f32 %v597_v53, %v726_v50 }
  0xd6   : > { %v317_v55 = vpop.f32.mrf.mxu0  ;;  %v381_v57 = vpop.f32.mrf.mxu1 }
  0xd7   : > { %446 = vst.msk [vmem:[%s733_s25 + $0x10] sm:$0xff] %vm231_vm0, %v326_v52  ;;  %v318_v56 = vadd.f32 %v726_v50, %v317_v55  ;;  %462 = vst.msk [vmem:[%s733_s25 + $0x90] sm:$0xff] %vm231_vm0, %v390_v54  ;;  %v382_v58 = vadd.f32 %v726_v50, %v381_v57 }
  0xd8   : > { %v582_v59 = vpop.f32.mrf.mxu0  ;;  %v598_v61 = vpop.f32.mrf.mxu1 }
  0xd9   : > { %444 = vst.msk [vmem:[%s733_s25] sm:$0xff] %vm231_vm0, %v318_v56  ;;  %v329_v60 = vadd.f32 %v582_v59, %v726_v50  ;;  %460 = vst.msk [vmem:[%s733_s25 + $0x80] sm:$0xff] %vm231_vm0, %v382_v58  ;;  %v393_v62 = vadd.f32 %v598_v61, %v726_v50 }
  0xda   : > { %v320_v63 = vpop.f32.mrf.mxu0  ;;  %v384_v1 = vpop.f32.mrf.mxu1 }
  0xdb   : > { %447 = vst.msk [vmem:[%s733_s25 + $0x18] sm:$0xff] %vm231_vm0, %v329_v60  ;;  %v321_v0 = vadd.f32 %v726_v50, %v320_v63  ;;  %463 = vst.msk [vmem:[%s733_s25 + $0x98] sm:$0xff] %vm231_vm0, %v393_v62  ;;  %v385_v2 = vadd.f32 %v726_v50, %v384_v1 }
  0xdc   : > { %v585_v3 = vpop.f32.mrf.mxu0  ;;  %v601_v5 = vpop.f32.mrf.mxu1 }
  0xdd   : > { %445 = vst.msk [vmem:[%s733_s25 + $0x8] sm:$0xff] %vm231_vm0, %v321_v0  ;;  %v342_v4 = vadd.f32 %v585_v3, %v726_v50  ;;  %461 = vst.msk [vmem:[%s733_s25 + $0x88] sm:$0xff] %vm231_vm0, %v385_v2  ;;  %v406_v6 = vadd.f32 %v601_v5, %v726_v50 }
  0xde   : > { %v333_v7 = vpop.f32.mrf.mxu0  ;;  %v397_v9 = vpop.f32.mrf.mxu1 }
  0xdf   : > { %450 = vst.msk [vmem:[%s733_s25 + $0x30] sm:$0xff] %vm231_vm0, %v342_v4  ;;  %v334_v8 = vadd.f32 %v726_v50, %v333_v7  ;;  %466 = vst.msk [vmem:[%s733_s25 + $0xb0] sm:$0xff] %vm231_vm0, %v406_v6  ;;  %v398_v10 = vadd.f32 %v726_v50, %v397_v9 }
  0xe0   : > { %v586_v11 = vpop.f32.mrf.mxu0  ;;  %v602_v13 = vpop.f32.mrf.mxu1 }
  0xe1   : > { %448 = vst.msk [vmem:[%s733_s25 + $0x20] sm:$0xff] %vm231_vm0, %v334_v8  ;;  %v345_v12 = vadd.f32 %v586_v11, %v726_v50  ;;  %464 = vst.msk [vmem:[%s733_s25 + $0xa0] sm:$0xff] %vm231_vm0, %v398_v10  ;;  %v409_v14 = vadd.f32 %v602_v13, %v726_v50 }
  0xe2   : > { %v336_v15 = vpop.f32.mrf.mxu0  ;;  %v400_v17 = vpop.f32.mrf.mxu1 }
  0xe3   : > { %451 = vst.msk [vmem:[%s733_s25 + $0x38] sm:$0xff] %vm231_vm0, %v345_v12  ;;  %v337_v16 = vadd.f32 %v726_v50, %v336_v15  ;;  %467 = vst.msk [vmem:[%s733_s25 + $0xb8] sm:$0xff] %vm231_vm0, %v409_v14  ;;  %v401_v18 = vadd.f32 %v726_v50, %v400_v17 }
  0xe4   : > { %v589_v19 = vpop.f32.mrf.mxu0  ;;  %v605_v21 = vpop.f32.mrf.mxu1 }
  0xe5   : > { %449 = vst.msk [vmem:[%s733_s25 + $0x28] sm:$0xff] %vm231_vm0, %v337_v16  ;;  %v358_v20 = vadd.f32 %v589_v19, %v726_v50  ;;  %465 = vst.msk [vmem:[%s733_s25 + $0xa8] sm:$0xff] %vm231_vm0, %v401_v18  ;;  %v422_v22 = vadd.f32 %v605_v21, %v726_v50 }
  0xe6   : > { %v349_v23 = vpop.f32.mrf.mxu0  ;;  %v413_v25 = vpop.f32.mrf.mxu1 }
  0xe7   : > { %454 = vst.msk [vmem:[%s733_s25 + $0x50] sm:$0xff] %vm231_vm0, %v358_v20  ;;  %v350_v24 = vadd.f32 %v726_v50, %v349_v23  ;;  %470 = vst.msk [vmem:[%s733_s25 + $0xd0] sm:$0xff] %vm231_vm0, %v422_v22  ;;  %v414_v26 = vadd.f32 %v726_v50, %v413_v25 }
  0xe8   : > { %v590_v27 = vpop.f32.mrf.mxu0  ;;  %v606_v29 = vpop.f32.mrf.mxu1 }
  0xe9   : > { %452 = vst.msk [vmem:[%s733_s25 + $0x40] sm:$0xff] %vm231_vm0, %v350_v24  ;;  %v361_v28 = vadd.f32 %v590_v27, %v726_v50  ;;  %468 = vst.msk [vmem:[%s733_s25 + $0xc0] sm:$0xff] %vm231_vm0, %v414_v26  ;;  %v425_v30 = vadd.f32 %v606_v29, %v726_v50 }
  0xea   : > { %v352_v31 = vpop.f32.mrf.mxu0  ;;  %v416_v33 = vpop.f32.mrf.mxu1 }
  0xeb   : > { %455 = vst.msk [vmem:[%s733_s25 + $0x58] sm:$0xff] %vm231_vm0, %v361_v28  ;;  %v353_v32 = vadd.f32 %v726_v50, %v352_v31  ;;  %471 = vst.msk [vmem:[%s733_s25 + $0xd8] sm:$0xff] %vm231_vm0, %v425_v30  ;;  %v417_v34 = vadd.f32 %v726_v50, %v416_v33 }
  0xec   : > { %v593_v35 = vpop.f32.mrf.mxu0  ;;  %v609_v37 = vpop.f32.mrf.mxu1 }
  0xed   : > { %453 = vst.msk [vmem:[%s733_s25 + $0x48] sm:$0xff] %vm231_vm0, %v353_v32  ;;  %v374_v36 = vadd.f32 %v593_v35, %v726_v50  ;;  %469 = vst.msk [vmem:[%s733_s25 + $0xc8] sm:$0xff] %vm231_vm0, %v417_v34  ;;  %v438_v38 = vadd.f32 %v609_v37, %v726_v50 }
  0xee   : > { %v365_v39 = vpop.f32.mrf.mxu0  ;;  %v429_v41 = vpop.f32.mrf.mxu1 }
  0xef   : > { %458 = vst.msk [vmem:[%s733_s25 + $0x70] sm:$0xff] %vm231_vm0, %v374_v36  ;;  %v366_v40 = vadd.f32 %v726_v50, %v365_v39  ;;  %474 = vst.msk [vmem:[%s733_s25 + $0xf0] sm:$0xff] %vm231_vm0, %v438_v38  ;;  %v430_v42 = vadd.f32 %v726_v50, %v429_v41 }
  0xf0   : > { %v594_v43 = vpop.f32.mrf.mxu0  ;;  %v610_v45 = vpop.f32.mrf.mxu1 }
  0xf1   : > { %456 = vst.msk [vmem:[%s733_s25 + $0x60] sm:$0xff] %vm231_vm0, %v366_v40  ;;  %v377_v44 = vadd.f32 %v594_v43, %v726_v50  ;;  %472 = vst.msk [vmem:[%s733_s25 + $0xe0] sm:$0xff] %vm231_vm0, %v430_v42  ;;  %v441_v46 = vadd.f32 %v610_v45, %v726_v50 }
  0xf2   : > { %v368_v47 = vpop.f32.mrf.mxu0  ;;  %v432_v49 = vpop.f32.mrf.mxu1 }
  0xf3   : > { %459 = vst.msk [vmem:[%s733_s25 + $0x78] sm:$0xff] %vm231_vm0, %v377_v44  ;;  %v369_v48 = vadd.f32 %v726_v50, %v368_v47  ;;  %475 = vst.msk [vmem:[%s733_s25 + $0xf8] sm:$0xff] %vm231_vm0, %v441_v46  ;;  %v433_v51 = vadd.f32 %v726_v50, %v432_v49 }
  0xf5   : > { %457 = vst.msk [vmem:[%s733_s25 + $0x68] sm:$0xff] %vm231_vm0, %v369_v48  ;;  %473 = vst.msk [vmem:[%s733_s25 + $0xe8] sm:$0xff] %vm231_vm0, %v433_v51 }
  0xf6 PF: > { %s13_s12 = sadd.s32 1, %s629_s12  }
  0xf7   : > { %p10_p4 = scmp.ge.s32.totalorder %s13_s12, 4  }
  0xf9   :  { %12 = sbr.rel (!%p10_p4) target bundleno = 1 (0x1), region = 62 }

// kernel: fct_forward.8
= control target key start
LH: loop header
LB: loop body
LE: loop exit
PB: predicated region body
PF: predicated region fallthrough
CT: control target
= control target key end

     0   :  { %s315_s9 = smov 0   ;;  %s317_s10 = smov 0   ;;  %s363_s0 = inlined_call_operand.vmem [shape: f32[2,4,256], index: 0, kind: input, shape index: {}]   ;;  %s364_s1 = inlined_call_operand.vmem [shape: f32[4,1], index: 1, kind: output, shape index: {0}]   ;;  %s365_s2 = inlined_call_operand.vmem [shape: f32[4,1], index: 2, kind: output, shape index: {1}]  }
   0x1   :  { %s319_s11 = smov 0  }
   0x2 LB: > { %s25_s12 = sadd.s32 1, %s293_s10  ;;  %p242_p0 = scmp.ge.s32.totalorder %s297_s11, 1  ;;  %s297_s11 = sphi %s319_s11, %s13_s11   ;;  %s293_s10 = sphi %s317_s10, %s367_s10   ;;  %s289_s9 = sphi %s315_s9, %s366_s9  }
   0x3   : > { %p27_p1 = scmp.ge.s32.totalorder %s25_s12, 2  ;;  %p124_p2 = scmp.lt.s32.totalorder %s297_s11, 3 }
   0x5   : > { %s369_s12 = smov (%p27_p1, %s25_s12), 0  ;;  %p125_p3 = pnand %p242_p0, %p124_p2 }
   0x6   : > { %p146_p4 = scmp.lt.s32.totalorder (!%p125_p3), %s289_s9, 1  ;;  %p155_p5 = scmp.eq.s32.totalorder (!%p125_p3), %s289_s9, 0 }
   0x7   : > { %128 = sbr.rel (%p125_p3) target bundleno = 170 (0xaa), region = 24 }
   0xc   : > { %s371_s9 = smov (!%p146_p4, %s289_s9), 1  ;;  %160 = sbr.rel (!%p155_p5) target bundleno = 17 (0x11), region = 28  ;;  %vm161_vm0 = vcmask (%p155_p5), 3072   ;;  %v299_v0 = vmov (%p155_p5), 0.0  }
   0xd   : > { %s248_s13 = sshll.u32 %s371_s9, 3  ;;  %162 = vst.msk [vmem:[%s364_s1] sm:$0xf] (%p155_p5), %vm161_vm0, %v299_v0  ;;  %163 = vst.msk [vmem:[%s365_s2] sm:$0xf] (%p155_p5), %vm161_vm0, %v299_v0 }
   0xe   : > { %s153_s16 = scalar_lea.vmem %s363_s0, %s248_s13 }
  0x11 PF: > { %v164_v1 = vld [vmem:[%s153_s16] sm:$0xff]  ;;  %vm170_vm1 = vcmask 1043456   ;;  %vm177_vm2 = vcmask 3072  }
  0x12   : > { %v165_v2 = vmax.f32 %v164_v1, 0.0 }
  0x14   : > { %v168_v3 = vcombine.high %v165_v2, %v165_v2  ;;  %v171_v4 = vsel %vm170_vm1, %v165_v2, 0.0  ;;  %v180_v5 = vmul.f32 %v165_v2, %v165_v2  ;;  %v166_v12 = vld [vmem:[%s364_s1] sm:$0xf] }
  0x15   : > { %v179_v15 = vld [vmem:[%s365_s2] sm:$0xf] }
  0x16   : > { %v172_v6 = vsel %vm170_vm1, %v168_v3, 0.0  ;;  %v182_v7 = vcombine.high %v180_v5, %v180_v5  ;;  %v184_v8 = vsel %vm170_vm1, %v180_v5, 0.0 }
  0x17   : > { %v173_v9 = vadd.f32 %v172_v6, %v171_v4 }
  0x18   : > { %v185_v10 = vsel %vm170_vm1, %v182_v7, 0.0 }
  0x19   : > { %174 = vadd.xlane.f32.xlu0 %v173_v9  ;;  %v186_v11 = vadd.f32 %v185_v10, %v184_v8 }
  0x1d   : > { %187 = vadd.xlane.f32.xlu0 %v186_v11 }
  0xa2   : > { %v175_v13 = vpop.xlane.xlu0 %174 }
  0xa3   : > { %v176_v14 = vadd.f32 %v175_v13, %v166_v12 }
  0xa5   : > { %178 = vst.msk [vmem:[%s364_s1] sm:$0xf] %vm177_vm2, %v176_v14 }
  0xa6   : > { %v188_v16 = vpop.xlane.xlu0 %187 }
  0xa7   : > { %v189_v17 = vadd.f32 %v188_v16, %v179_v15 }
  0xa9   : > { %190 = vst.msk [vmem:[%s365_s2] sm:$0xf] %vm177_vm2, %v189_v17 }
  0xaa PF: > { %s13_s11 = sadd.s32 1, %s297_s11   ;;  %s366_s9 = smov %s293_s10 }
  0xab   : > { %p10_p6 = scmp.ge.s32.totalorder %s13_s11, 4   ;;  %s367_s10 = smov %s369_s12 }
  0xad   :  { %12 = sbr.rel (!%p10_p6) target bundleno = 2 (0x2), region = 62 }

// kernel: fct_forward.9
= control target key start
LH: loop header
LB: loop body
LE: loop exit
PB: predicated region body
PF: predicated region fallthrough
CT: control target
= control target key end

     0   :  { %s601_s21 = smov 0   ;;  %s603_s22 = smov 0   ;;  %s649_s0 = inlined_call_operand.vmem [shape: f32[2,4,256], index: 0, kind: input, shape index: {}]   ;;  %s650_s1 = inlined_call_operand.vmem [shape: f32[2,4,256], index: 1, kind: input, shape index: {}]   ;;  %s651_s2 = inlined_call_operand.vmem [shape: f32[4,1], index: 2, kind: input, shape index: {}]   ;;  %s652_s3 = inlined_call_operand.vmem [shape: f32[4,1], index: 3, kind: input, shape index: {}]   ;;  %s653_s4 = inlined_call_operand.vmem [shape: f32[4,1], index: 4, kind: input, shape index: {}]   ;;  %s654_s5 = inlined_call_operand.vmem [shape: f32[4,1], index: 5, kind: input, shape index: {}]   ;;  %s655_s6 = inlined_call_operand.vmem [shape: f32[2,4,256], index: 6, kind: output, shape index: {}]  }
   0x1   :  { %s605_s23 = smov 0  }
   0x2 LB: > { %s28_s24 = sadd.s32 1, %s558_s22  ;;  %p498_p0 = scmp.ge.s32.totalorder %s562_s23, 1  ;;  %s562_s23 = sphi %s605_s23, %s16_s23   ;;  %s558_s22 = sphi %s603_s22, %s657_s22   ;;  %s554_s21 = sphi %s601_s21, %s656_s21  }
   0x3   : > { %p30_p1 = scmp.ge.s32.totalorder %s28_s24, 2  ;;  %p250_p2 = scmp.lt.s32.totalorder %s562_s23, 3 }
   0x5   : > { %s659_s24 = smov (%p30_p1, %s28_s24), 0  ;;  %p251_p3 = pnand %p498_p0, %p250_p2 }
   0x6   : > { %p298_p4 = scmp.lt.s32.totalorder (!%p251_p3), %s554_s21, 1 }
   0x7   : > { %254 = sbr.rel (%p251_p3) target bundleno = 168 (0xa8), region = 44 }
   0xc   : > { %v329_v0 = vld [vmem:[%s651_s2] sm:$0xf]  ;;  %v564_v2 = vmov 0   ;;  %s661_s21 = smov (!%p298_p4, %s554_s21), 1  ;;  %v565_v11 = vmov 839922192   ;;  %v346_v13 = vlaneseq }
   0xd   : > { %v331_v1 = vld [vmem:[%s652_s3] sm:$0xf]  ;;  %536 = vset.pattern.permute.xlu0 %v564_v2  ;;  %v330_v3 = vmul.f32 0.001953125, %v329_v0  ;;  %537 = vset.pattern.permute.xlu1 %v564_v2  ;;  %v344_v12 = vunpack.c.l.s4 %v565_v11  ;;  %s507_s9 = sshll.u32 %s661_s21, 3 }
   0xe   : > { %v332_v4 = vmul.f32 0.001953125, %v331_v1  ;;  %v338_v6 = vld [vmem:[%s653_s4] sm:$0xf]  ;;  %v347_v15 = vshrl.u32 %v346_v13, 7  ;;  %s305_s12 = scalar_lea.vmem %s649_s0, %s507_s9  ;;  %s315_s15 = scalar_lea.vmem %s650_s1, %s507_s9 }
   0xf   : > { %341 = vperm.xlu0 %536, %v330_v3   ;;  %v333_v5 = vmul.f32 %v330_v3, %v330_v3  ;;  %v374_v10 = vld [vmem:[%s654_s5] sm:$0xf]  ;;  %v345_v14 = vunpack.c.0.s8 %v344_v12  ;;  %s325_s18 = scalar_lea.vmem %s655_s6, %s507_s9 }
  0x10   : > { %v327_v18 = vld [vmem:[%s305_s12] sm:$0xff] }
  0x11   : > { %v334_v7 = vsub.f32 %v332_v4, %v333_v5  ;;  %v348_v16 = vsub.s32 %v345_v14, %v347_v15  ;;  %v328_v20 = vmax.f32 %v327_v18, 0.0  ;;  %v337_v29 = vld [vmem:[%s315_s15] sm:$0xff] }
  0x13   : > { %v335_v8 = vadd.f32 1e-05, %v334_v7  ;;  %354 = vperm.xlu0 %536, %v338_v6  }
  0x15   : > { %538 = vrsqrt.f32 %v335_v8 }
  0x22   : > { %v539_v9 = vpop.eup %538 }
  0x23   : > { %364 = vperm.xlu1 %537, %v539_v9  }
  0x27   : > { %377 = vperm.xlu1 %537, %v374_v10  }
  0x8a   : > { %v342_v17 = vpop.permute.xlu0 %341 }
  0x8b   : > { %v349_v19 = vrot.slane %v342_v17, %v348_v16 }
  0x8d   : > { %v351_v21 = vsub.f32 %v328_v20, %v349_v19 }
  0x8e   : > { %v355_v23 = vpop.permute.xlu0 %354 }
  0x8f   : > { %v358_v22 = vcombine.high %v351_v21, %v351_v21  ;;  %v360_v24 = vmul.f32 %v355_v23, %v351_v21 }
  0x91   : > { %v361_v25 = vmul.f32 %v358_v22, %v355_v23 }
  0x9e   : > { %v365_v26 = vpop.permute.xlu1 %364 }
  0x9f   : > { %v367_v27 = vmul.f32 %v365_v26, %v360_v24  ;;  %v368_v28 = vmul.f32 %v365_v26, %v361_v25 }
  0xa1   : > { %v371_v30 = vcombine.low %v367_v27, %v368_v28 }
  0xa2   : > { %v378_v31 = vpop.permute.xlu1 %377 }
  0xa3   : > { %v373_v32 = vadd.f32 %v371_v30, %v337_v29  ;;  %v385_v33 = vrot.slane %v378_v31, %v348_v16 }
  0xa5   : > { %v387_v34 = vadd.f32 %v385_v33, %v373_v32 }
  0xa7   : > { %388 = vst [vmem:[%s325_s18] sm:$0xff] %v387_v34 }
  0xa8 PF: > { %s16_s23 = sadd.s32 1, %s562_s23   ;;  %s656_s21 = smov %s558_s22 }
  0xa9   : > { %p13_p5 = scmp.ge.s32.totalorder %s16_s23, 4   ;;  %s657_s22 = smov %s659_s24 }
  0xab   :  { %15 = sbr.rel (!%p13_p5) target bundleno = 2 (0x2), region = 77 }

</bundles_post_ra>
